<compile_context>
chip_gen: v5e
topology: v5e:2x2
jax: 0.10.0
libtpu: 0.0.40
codegen_flags: <defaults>
</compile_context>

<pallas_src>
from functools import partial

import jax
import jax.numpy as jnp
from jax import lax
from jax.experimental import pallas as pl
from jax.experimental.pallas import tpu as pltpu

EPS = 1e-5

# Taps of a k=4, s=2, p=1 transposed conv: for output row 2*m + dy, the
# contributing (3x3-window row offset, kernel row) pairs.  Same table for
# columns (dx / kx).
_TAPS = {
    0: ((1, 1), (0, 3)),
    1: ((1, 2), (2, 0)),
}


def _vmem_limit_bytes():
    """Generation-aware scoped-VMEM budget (~75% of physical, <= 100 MiB)."""
    cap = 64 * 1024 * 1024
    try:
        cap = int(pltpu.get_tpu_info().vmem_capacity_bytes)
    except Exception:
        pass
    return max(32 << 20, min(int(cap * 0.75), 100 << 20))


def _largest_divisor(n, upper):
    upper = max(1, min(n, upper))
    for d in range(upper, 0, -1):
        if n % d == 0:
            return d
    return 1


def _pick_bn_rows(h2, w2, row_bytes, target_bytes=2 << 20):
    """Row tile for the BN/relayout pass: ~2 MiB blocks, a divisor of 2H, and
    TR*2W a multiple of 128 so the flattened NCHW output block is lane-legal."""
    want = max(8, target_bytes // max(row_bytes, 1))
    best = None
    for d in range(1, h2 + 1):
        if h2 % d == 0 and d <= want and (d * w2) % 128 == 0:
            best = d
    return best if best is not None else h2


def _deconv_kernel(x_ref, wp_ref, b_ref, out_ref, stats_ref, *, TH, W, Cout):
    """One (batch, row-tile): transposed conv as a single fused MXU matmul +
    per-tile BN partial sums.  Input tile is already ReLU'd and halo-padded."""
    x = x_ref[0, 0]                                    # (TH+2, W+2, Cin)
    Cin = x.shape[-1]

    # im2col: the 9 shifted 3x3-window views concatenated along channels.
    # TODO(synk): for Cin < 128 a shift-results formulation would avoid the
    #             lane-granularity concat (layout work); kept simple here.
    cols = [x[oy:oy + TH, ox:ox + W, :].reshape(TH * W, Cin)
            for oy in range(3) for ox in range(3)]
    lhs = jnp.concatenate(cols, axis=-1)               # (TH*W, 9*Cin)

    # One MXU matmul for all four (dy, dx) output phases; RHS columns are
    # ordered (dy, dx, cout).  f32 accumulation on the MXU.
    y = jnp.dot(lhs, wp_ref[...], preferred_element_type=jnp.float32)

    # BN partial sums on the un-biased f32 values (bias re-added to the mean
    # in the wrapper; variance is shift-invariant -> less cancellation).
    s = jnp.sum(y, axis=0, keepdims=True)              # (1, 4*Cout)
    q = jnp.sum(y * y, axis=0, keepdims=True)
    stats_ref[0, 0] = jnp.concatenate([s, q], axis=0)  # (2, 4*Cout)

    y = y + b_ref[...]
    C2 = 2 * Cout
    for dy in range(2):                                # two lane-aligned slices
        out_ref[0, :, dy, :, :] = (
            y[:, dy * C2:(dy + 1) * C2].reshape(TH, W, C2).astype(out_ref.dtype))


def _bn_to_nchw_kernel(x_ref, sc_ref, sh_ref, o_ref):
    """BN affine + fused channel relayout: one (rows, 2W, Cout) NHWC block ->
    one lane-dense (Cout, rows*2W) block of the flattened-spatial NCHW output
    (the 2-D transpose rides the otherwise-idle XLU in this HBM-bound pass)."""
    tr, w2, cout = x_ref.shape[1:]
    x = x_ref[0].reshape(tr * w2, cout).astype(jnp.float32)
    y = x * sc_ref[...] + sh_ref[...]                  # per-channel affine
    o_ref[0] = y.T.astype(o_ref.dtype)                 # (Cout, rows*2W)


@partial(jax.jit, static_argnames=("batch_norm", "tile_h", "inter_dtype"))
def deconv_block(x, w, b, gamma, beta, *, batch_norm=True, tile_h=16,
                 inter_dtype=jnp.bfloat16):
    """DeconvBlock.forward.

    x: (N, Cin, H, W) NCHW; w: (Cin, Cout, 4, 4) (PyTorch ConvTranspose2d
    layout); b/gamma/beta: (Cout,).  Returns (N, Cout, 2H, 2W).
    """
    N, Cin, H, W = x.shape
    Cout = w.shape[1]
    if W % 8:
        raise ValueError(f"W={W} must be a multiple of 8")
    TH = _largest_divisor(H, min(tile_h, H))
    GH = H // TH
    H2, W2 = 2 * H, 2 * W
    vmem_limit = _vmem_limit_bytes()

    # ---- fused XLA pre-pass on the (4x smaller) input: ReLU + NCHW->NHWC +
    # 1-px zero halo + disjoint row tiles (+2 halo rows) so the conv kernel's
    # BlockSpecs stay non-overlapping and fully auto-pipelined.
    x_nhwc = jnp.maximum(jnp.transpose(x, (0, 2, 3, 1)), 0)
    x_pad = jnp.pad(x_nhwc, ((0, 0), (1, 1), (1, 1), (0, 0)))
    x_tiles = jnp.stack([x_pad[:, j * TH:j * TH + TH + 2] for j in range(GH)],
                        axis=1)                        # (N, GH, TH+2, W+2, Cin)

    # ---- pack all 16 taps into one (9*Cin, 4*Cout) RHS; column order is
    # (dy, dx, cout) so both row and column phases come out of one matmul.
    w_t = jnp.transpose(w, (2, 3, 0, 1)).astype(x.dtype)   # (ky, kx, Cin, Cout)
    wp = jnp.zeros((3, 3, Cin, 2, 2, Cout), x.dtype)
    for dy, taps_y in _TAPS.items():
        for oy, ky in taps_y:
            for dx, taps_x in _TAPS.items():
                for ox, kx in taps_x:
                    wp = wp.at[oy, ox, :, dy, dx, :].set(w_t[ky, kx])
    w_pack = wp.reshape(9 * Cin, 4 * Cout)
    bias_row = jnp.tile(b.astype(jnp.float32), 4).reshape(1, 4 * Cout)

    conv, stats = pl.pallas_call(
        partial(_deconv_kernel, TH=TH, W=W, Cout=Cout),
        grid=(N, GH),
        in_specs=[
            pl.BlockSpec((1, 1, TH + 2, W + 2, Cin), lambda n, j: (n, j, 0, 0, 0)),
            pl.BlockSpec((9 * Cin, 4 * Cout), lambda n, j: (0, 0)),
            pl.BlockSpec((1, 4 * Cout), lambda n, j: (0, 0)),
        ],
        out_specs=[
            pl.BlockSpec((1, TH, 2, W, 2 * Cout), lambda n, j: (n, j, 0, 0, 0)),
            pl.BlockSpec((1, 1, 2, 4 * Cout), lambda n, j: (n, j, 0, 0)),
        ],
        out_shape=[
            # bf16 intermediate: halves HBM traffic of the dominant tensor.
            jax.ShapeDtypeStruct((N, H, 2, W, 2 * Cout), inter_dtype),
            jax.ShapeDtypeStruct((N, GH, 2, 4 * Cout), jnp.float32),
        ],
        compiler_params=pltpu.CompilerParams(
            dimension_semantics=("parallel", "parallel"),
            vmem_limit_bytes=vmem_limit),
    )(x_tiles, w_pack, bias_row)

    # ---- global training-mode BN statistics from the tiny per-tile partials.
    if batch_norm:
        cnt = jnp.float32(N * H2 * W2)
        tot = stats.sum(axis=(0, 1)).reshape(2, 4, Cout).sum(axis=1)   # (2, Cout)
        mean_nb = tot[0] / cnt                          # E[y - bias]
        var = jnp.maximum(tot[1] / cnt - mean_nb * mean_nb, 0.0)
        inv = lax.rsqrt(var + EPS)
        scale = gamma.astype(jnp.float32) * inv
        shift = beta.astype(jnp.float32) - (mean_nb + b.astype(jnp.float32)) * scale
    else:
        scale = jnp.ones((Cout,), jnp.float32)
        shift = jnp.zeros((Cout,), jnp.float32)

    # ---- pass 2: BN affine + fused NHWC->NCHW relayout, written directly as
    # lane-dense (Cout, rows*2W) blocks of the flattened-spatial NCHW output.
    inter = conv.reshape(N, H2, W2, Cout)               # free row-major view
    TR = _pick_bn_rows(H2, W2, W2 * Cout * jnp.dtype(inter_dtype).itemsize)
    out_flat = pl.pallas_call(
        _bn_to_nchw_kernel,
        grid=(N, H2 // TR),
        in_specs=[
            pl.BlockSpec((1, TR, W2, Cout), lambda n, r: (n, r, 0, 0)),
            pl.BlockSpec((1, Cout), lambda n, r: (0, 0)),
            pl.BlockSpec((1, Cout), lambda n, r: (0, 0)),
        ],
        out_specs=pl.BlockSpec((1, Cout, TR * W2), lambda n, r: (n, 0, r)),
        out_shape=jax.ShapeDtypeStruct((N, Cout, H2 * W2), x.dtype),
        compiler_params=pltpu.CompilerParams(
            dimension_semantics=("parallel", "parallel"),
            vmem_limit_bytes=vmem_limit),
    )(inter, scale.reshape(1, Cout), shift.reshape(1, Cout))

    return out_flat.reshape(N, Cout, H2, W2)            # free row-major view


def _reference(x_nchw, w, b, gamma, beta):
    """Pure-JAX reference of the PyTorch forward (training-mode BN)."""
    x = jnp.maximum(x_nchw.astype(jnp.float32), 0.0)
    # ConvTranspose2d(k=4, s=2, p=1) == dilated conv with flipped kernel, pad k-1-p=2.
    rhs = jnp.flip(jnp.transpose(w, (1, 0, 2, 3)), (2, 3)).astype(jnp.float32)
    y = lax.conv_general_dilated(
        x, rhs, window_strides=(1, 1), padding=((2, 2), (2, 2)),
        lhs_dilation=(2, 2), rhs_dilation=(1, 1),
        dimension_numbers=("NCHW", "OIHW", "NCHW"))
    y = y + b.reshape(1, -1, 1, 1)
    mean = jnp.mean(y, axis=(0, 2, 3), keepdims=True)
    var = jnp.mean((y - mean) ** 2, axis=(0, 2, 3), keepdims=True)
    y = (y - mean) * lax.rsqrt(var + EPS)
    return y * gamma.reshape(1, -1, 1, 1) + beta.reshape(1, -1, 1, 1)


if __name__ == "__main__":
    key = jax.random.PRNGKey(0)
    kx, kw, kb, kg, kbt = jax.random.split(key, 5)

    # Small shapes consistent with a generator DeconvBlock; 2*Cout = 128 keeps
    # the conv kernel's stores lane-dense and the dy-fused slices vreg-aligned.
    N, Cin, Cout, H, W = 2, 32, 64, 16, 16
    x = jax.random.normal(kx, (N, Cin, H, W), jnp.float32)
    bound = 1.0 / jnp.sqrt(Cout * 4 * 4)
    w = jax.random.uniform(kw, (Cin, Cout, 4, 4), jnp.float32, -bound, bound)
    b = jax.random.uniform(kb, (Cout,), jnp.float32, -bound, bound)
    gamma = 1.0 + 0.1 * jax.random.normal(kg, (Cout,), jnp.float32)
    beta = 0.1 * jax.random.normal(kbt, (Cout,), jnp.float32)

    out = jax.block_until_ready(deconv_block(x, w, b, gamma, beta))
    ref = jax.block_until_ready(_reference(x, w, b, gamma, beta))

    assert out.shape == (N, Cout, 2 * H, 2 * W), out.shape
    err = float(jnp.max(jnp.abs(out - ref)))
    # bf16 conv intermediate (perf feature) -> relaxed tolerance vs f32 reference.
    assert err < 5e-2, err
    print("KERNEL_OK")
</pallas_src>

<mosaic_0001>
module attributes {stable_mosaic.version = 11 : i64} {
  func.func @_deconv_kernel(%arg0: i32, %arg1: i32, %arg2: memref<1x1x18x18x32xf32, #tpu.memory_space<vmem>>, %arg3: memref<288x256xf32, #tpu.memory_space<vmem>>, %arg4: memref<1x256xf32, #tpu.memory_space<vmem>>, %arg5: memref<1x16x2x16x128xbf16, #tpu.memory_space<vmem>>, %arg6: memref<1x1x2x256xf32, #tpu.memory_space<vmem>>) attributes {dimension_semantics = [#tpu.dimension_semantics<parallel>, #tpu.dimension_semantics<parallel>], iteration_bounds = array<i64: 2, 1>, scalar_prefetch = 0 : i64, scratch_operands = 0 : i64, tpu.core_type = #tpu.core_type<tc>, window_params = [{transform_indices = @transform_0, window_bounds = array<i64: 1, 1, 18, 18, 32>}, {pipeline_mode = #tpu.pipeline_mode<synchronous>, transform_indices = @transform_1, window_bounds = array<i64: 288, 256>}, {pipeline_mode = #tpu.pipeline_mode<synchronous>, transform_indices = @transform_2, window_bounds = array<i64: 1, 256>}, {transform_indices = @transform_3, window_bounds = array<i64: 1, 16, 2, 16, 128>}, {transform_indices = @transform_4, window_bounds = array<i64: 1, 1, 2, 256>}]} {
    %c0 = arith.constant 0 : index
    %c0_0 = arith.constant 0 : index
    %c0_1 = arith.constant 0 : index
    %c0_2 = arith.constant 0 : index
    %c0_3 = arith.constant 0 : index
    %0 = vector.load %arg2[%c0, %c0_0, %c0_1, %c0_2, %c0_3] : memref<1x1x18x18x32xf32, #tpu.memory_space<vmem>>, vector<1x1x18x18x32xf32>
    %1 = vector.shape_cast %0 : vector<1x1x18x18x32xf32> to vector<18x18x32xf32>
    %2 = vector.extract_strided_slice %1 {offsets = [0, 0, 0], sizes = [16, 16, 32], strides = [1, 1, 1]} : vector<18x18x32xf32> to vector<16x16x32xf32>
    %3 = vector.shape_cast %2 : vector<16x16x32xf32> to vector<256x32xf32>
    %4 = vector.extract_strided_slice %1 {offsets = [0, 1, 0], sizes = [16, 16, 32], strides = [1, 1, 1]} : vector<18x18x32xf32> to vector<16x16x32xf32>
    %5 = vector.shape_cast %4 : vector<16x16x32xf32> to vector<256x32xf32>
    %6 = vector.extract_strided_slice %1 {offsets = [0, 2, 0], sizes = [16, 16, 32], strides = [1, 1, 1]} : vector<18x18x32xf32> to vector<16x16x32xf32>
    %7 = vector.shape_cast %6 : vector<16x16x32xf32> to vector<256x32xf32>
    %8 = vector.extract_strided_slice %1 {offsets = [1, 0, 0], sizes = [16, 16, 32], strides = [1, 1, 1]} : vector<18x18x32xf32> to vector<16x16x32xf32>
    %9 = vector.shape_cast %8 : vector<16x16x32xf32> to vector<256x32xf32>
    %10 = vector.extract_strided_slice %1 {offsets = [1, 1, 0], sizes = [16, 16, 32], strides = [1, 1, 1]} : vector<18x18x32xf32> to vector<16x16x32xf32>
    %11 = vector.shape_cast %10 : vector<16x16x32xf32> to vector<256x32xf32>
    %12 = vector.extract_strided_slice %1 {offsets = [1, 2, 0], sizes = [16, 16, 32], strides = [1, 1, 1]} : vector<18x18x32xf32> to vector<16x16x32xf32>
    %13 = vector.shape_cast %12 : vector<16x16x32xf32> to vector<256x32xf32>
    %14 = vector.extract_strided_slice %1 {offsets = [2, 0, 0], sizes = [16, 16, 32], strides = [1, 1, 1]} : vector<18x18x32xf32> to vector<16x16x32xf32>
    %15 = vector.shape_cast %14 : vector<16x16x32xf32> to vector<256x32xf32>
    %16 = vector.extract_strided_slice %1 {offsets = [2, 1, 0], sizes = [16, 16, 32], strides = [1, 1, 1]} : vector<18x18x32xf32> to vector<16x16x32xf32>
    %17 = vector.shape_cast %16 : vector<16x16x32xf32> to vector<256x32xf32>
    %18 = vector.extract_strided_slice %1 {offsets = [2, 2, 0], sizes = [16, 16, 32], strides = [1, 1, 1]} : vector<18x18x32xf32> to vector<16x16x32xf32>
    %19 = vector.shape_cast %18 : vector<16x16x32xf32> to vector<256x32xf32>
    %20 = tpu.concatenate %3, %5, %7, %9, %11, %13, %15, %17, %19 in 1 : vector<256x32xf32>, vector<256x32xf32>, vector<256x32xf32>, vector<256x32xf32>, vector<256x32xf32>, vector<256x32xf32>, vector<256x32xf32>, vector<256x32xf32>, vector<256x32xf32> -> vector<256x288xf32>
    %c0_4 = arith.constant 0 : index
    %c0_5 = arith.constant 0 : index
    %21 = vector.load %arg3[%c0_4, %c0_5] : memref<288x256xf32, #tpu.memory_space<vmem>>, vector<288x256xf32>
    %cst = arith.constant dense<0.000000e+00> : vector<256x256xf32>
    %22 = tpu.matmul %20, %21, %cst {dimension_numbers = #tpu.dot_dimension_numbers<[1], [0], [0], [1], [0, 0, 1, 1], [], []>} : vector<256x288xf32>, vector<288x256xf32>, vector<256x256xf32> -> vector<256x256xf32>
    %cst_6 = arith.constant dense<0.000000e+00> : vector<256xf32>
    %23 = vector.multi_reduction <add>, %22, %cst_6 [0] : vector<256x256xf32> to vector<256xf32>
    %24 = vector.shape_cast %23 : vector<256xf32> to vector<1x256xf32>
    %25 = arith.mulf %22, %22 : vector<256x256xf32>
    %cst_7 = arith.constant dense<0.000000e+00> : vector<256xf32>
    %26 = vector.multi_reduction <add>, %25, %cst_7 [0] : vector<256x256xf32> to vector<256xf32>
    %27 = vector.shape_cast %26 : vector<256xf32> to vector<1x256xf32>
    %28 = tpu.concatenate %24, %27 in 0 : vector<1x256xf32>, vector<1x256xf32> -> vector<2x256xf32>
    %c0_8 = arith.constant 0 : index
    %c0_9 = arith.constant 0 : index
    %c0_10 = arith.constant 0 : index
    %c0_11 = arith.constant 0 : index
    %29 = vector.load %arg6[%c0_8, %c0_9, %c0_10, %c0_11] : memref<1x1x2x256xf32, #tpu.memory_space<vmem>>, vector<1x1x2x256xf32>
    %30 = vector.shape_cast %29 : vector<1x1x2x256xf32> to vector<2x256xf32>
    %31 = vector.shape_cast %28 : vector<2x256xf32> to vector<1x1x2x256xf32>
    tpu.vector_store %arg6[%c0_8, %c0_9, %c0_10, %c0_11], %31 {strides = array<i32>} : memref<1x1x2x256xf32, #tpu.memory_space<vmem>>, vector<1x1x2x256xf32>,
    %c0_12 = arith.constant 0 : index
    %c0_13 = arith.constant 0 : index
    %32 = vector.load %arg4[%c0_12, %c0_13] : memref<1x256xf32, #tpu.memory_space<vmem>>, vector<1x256xf32>
    %33 = vector.broadcast %32 : vector<1x256xf32> to vector<256x256xf32>
    %34 = arith.addf %22, %33 : vector<256x256xf32>
    %35 = vector.extract_strided_slice %34 {offsets = [0, 0], sizes = [256, 128], strides = [1, 1]} : vector<256x256xf32> to vector<256x128xf32>
    %36 = vector.shape_cast %35 : vector<256x128xf32> to vector<16x16x128xf32>
    %37 = arith.truncf %36 : vector<16x16x128xf32> to vector<16x16x128xbf16>
    %c0_14 = arith.constant 0 : index
    %c0_15 = arith.constant 0 : index
    %c0_16 = arith.constant 0 : index
    %c0_17 = arith.constant 0 : index
    %c0_18 = arith.constant 0 : index
    %38 = vector.load %arg5[%c0_14, %c0_15, %c0_16, %c0_17, %c0_18] : memref<1x16x2x16x128xbf16, #tpu.memory_space<vmem>>, vector<1x16x1x16x128xbf16>
    %39 = vector.shape_cast %38 : vector<1x16x1x16x128xbf16> to vector<16x16x128xbf16>
    %40 = vector.shape_cast %37 : vector<16x16x128xbf16> to vector<1x16x1x16x128xbf16>
    tpu.vector_store %arg5[%c0_14, %c0_15, %c0_16, %c0_17, %c0_18], %40 {strides = array<i32>} : memref<1x16x2x16x128xbf16, #tpu.memory_space<vmem>>, vector<1x16x1x16x128xbf16>,
    %41 = vector.extract_strided_slice %34 {offsets = [0, 128], sizes = [256, 128], strides = [1, 1]} : vector<256x256xf32> to vector<256x128xf32>
    %42 = vector.shape_cast %41 : vector<256x128xf32> to vector<16x16x128xf32>
    %43 = arith.truncf %42 : vector<16x16x128xf32> to vector<16x16x128xbf16>
    %c0_19 = arith.constant 0 : index
    %c0_20 = arith.constant 0 : index
    %c1 = arith.constant 1 : index
    %c0_21 = arith.constant 0 : index
    %c0_22 = arith.constant 0 : index
    %44 = vector.load %arg5[%c0_19, %c0_20, %c1, %c0_21, %c0_22] : memref<1x16x2x16x128xbf16, #tpu.memory_space<vmem>>, vector<1x16x1x16x128xbf16>
    %45 = vector.shape_cast %44 : vector<1x16x1x16x128xbf16> to vector<16x16x128xbf16>
    %46 = vector.shape_cast %43 : vector<16x16x128xbf16> to vector<1x16x1x16x128xbf16>
    tpu.vector_store %arg5[%c0_19, %c0_20, %c1, %c0_21, %c0_22], %46 {strides = array<i32>} : memref<1x16x2x16x128xbf16, #tpu.memory_space<vmem>>, vector<1x16x1x16x128xbf16>,
    return
  }
  func.func @transform_0(%arg0: i32, %arg1: i32) -> (i32, i32, i32, i32, i32) {
    %c0_i32 = arith.constant 0 : i32
    %c0_i32_0 = arith.constant 0 : i32
    %c0_i32_1 = arith.constant 0 : i32
    %c0_i32_2 = arith.constant 0 : i32
    return %arg0, %arg1, %c0_i32, %c0_i32_0, %c0_i32_1 : i32, i32, i32, i32, i32
  }
  func.func @transform_1(%arg0: i32, %arg1: i32) -> (i32, i32) {
    %c0_i32 = arith.constant 0 : i32
    %c0_i32_0 = arith.constant 0 : i32
    %c0_i32_1 = arith.constant 0 : i32
    return %c0_i32, %c0_i32_0 : i32, i32
  }
  func.func @transform_2(%arg0: i32, %arg1: i32) -> (i32, i32) {
    %c0_i32 = arith.constant 0 : i32
    %c0_i32_0 = arith.constant 0 : i32
    %c0_i32_1 = arith.constant 0 : i32
    return %c0_i32, %c0_i32_0 : i32, i32
  }
  func.func @transform_3(%arg0: i32, %arg1: i32) -> (i32, i32, i32, i32, i32) {
    %c0_i32 = arith.constant 0 : i32
    %c0_i32_0 = arith.constant 0 : i32
    %c0_i32_1 = arith.constant 0 : i32
    %c0_i32_2 = arith.constant 0 : i32
    return %arg0, %arg1, %c0_i32, %c0_i32_0, %c0_i32_1 : i32, i32, i32, i32, i32
  }
  func.func @transform_4(%arg0: i32, %arg1: i32) -> (i32, i32, i32, i32) {
    %c0_i32 = arith.constant 0 : i32
    %c0_i32_0 = arith.constant 0 : i32
    %c0_i32_1 = arith.constant 0 : i32
    return %arg0, %arg1, %c0_i32, %c0_i32_0 : i32, i32, i32, i32
  }
}

module attributes {stable_mosaic.version = 11 : i64} {
  func.func @_bn_to_nchw_kernel(%arg0: i32, %arg1: i32, %arg2: memref<1x32x32x64xbf16, #tpu.memory_space<vmem>>, %arg3: memref<1x64xf32, #tpu.memory_space<vmem>>, %arg4: memref<1x64xf32, #tpu.memory_space<vmem>>, %arg5: memref<1x64x1024xf32, #tpu.memory_space<vmem>>) attributes {dimension_semantics = [#tpu.dimension_semantics<parallel>, #tpu.dimension_semantics<parallel>], iteration_bounds = array<i64: 2, 1>, scalar_prefetch = 0 : i64, scratch_operands = 0 : i64, tpu.core_type = #tpu.core_type<tc>, window_params = [{transform_indices = @transform_0, window_bounds = array<i64: 1, 32, 32, 64>}, {pipeline_mode = #tpu.pipeline_mode<synchronous>, transform_indices = @transform_1, window_bounds = array<i64: 1, 64>}, {pipeline_mode = #tpu.pipeline_mode<synchronous>, transform_indices = @transform_2, window_bounds = array<i64: 1, 64>}, {transform_indices = @transform_3, window_bounds = array<i64: 1, 64, 1024>}]} {
    %c0 = arith.constant 0 : index
    %c0_0 = arith.constant 0 : index
    %c0_1 = arith.constant 0 : index
    %c0_2 = arith.constant 0 : index
    %0 = vector.load %arg2[%c0, %c0_0, %c0_1, %c0_2] : memref<1x32x32x64xbf16, #tpu.memory_space<vmem>>, vector<1x32x32x64xbf16>
    %1 = vector.shape_cast %0 : vector<1x32x32x64xbf16> to vector<32x32x64xbf16>
    %2 = vector.shape_cast %1 : vector<32x32x64xbf16> to vector<1024x64xbf16>
    %3 = arith.extf %2 : vector<1024x64xbf16> to vector<1024x64xf32>
    %c0_3 = arith.constant 0 : index
    %c0_4 = arith.constant 0 : index
    %4 = vector.load %arg3[%c0_3, %c0_4] : memref<1x64xf32, #tpu.memory_space<vmem>>, vector<1x64xf32>
    %5 = vector.broadcast %4 : vector<1x64xf32> to vector<1024x64xf32>
    %6 = arith.mulf %3, %5 : vector<1024x64xf32>
    %c0_5 = arith.constant 0 : index
    %c0_6 = arith.constant 0 : index
    %7 = vector.load %arg4[%c0_5, %c0_6] : memref<1x64xf32, #tpu.memory_space<vmem>>, vector<1x64xf32>
    %8 = vector.broadcast %7 : vector<1x64xf32> to vector<1024x64xf32>
    %9 = arith.addf %6, %8 : vector<1024x64xf32>
    %10 = tpu.transpose %9, [1, 0] : vector<1024x64xf32> -> vector<64x1024xf32>
    %c0_7 = arith.constant 0 : index
    %c0_8 = arith.constant 0 : index
    %c0_9 = arith.constant 0 : index
    %11 = vector.load %arg5[%c0_7, %c0_8, %c0_9] : memref<1x64x1024xf32, #tpu.memory_space<vmem>>, vector<1x64x1024xf32>
    %12 = vector.shape_cast %11 : vector<1x64x1024xf32> to vector<64x1024xf32>
    %13 = vector.shape_cast %10 : vector<64x1024xf32> to vector<1x64x1024xf32>
    tpu.vector_store %arg5[%c0_7, %c0_8, %c0_9], %13 {strides = array<i32>} : memref<1x64x1024xf32, #tpu.memory_space<vmem>>, vector<1x64x1024xf32>,
    return
  }
  func.func @transform_0(%arg0: i32, %arg1: i32) -> (i32, i32, i32, i32) {
    %c0_i32 = arith.constant 0 : i32
    %c0_i32_0 = arith.constant 0 : i32
    %c0_i32_1 = arith.constant 0 : i32
    return %arg0, %arg1, %c0_i32, %c0_i32_0 : i32, i32, i32, i32
  }
  func.func @transform_1(%arg0: i32, %arg1: i32) -> (i32, i32) {
    %c0_i32 = arith.constant 0 : i32
    %c0_i32_0 = arith.constant 0 : i32
    %c0_i32_1 = arith.constant 0 : i32
    return %c0_i32, %c0_i32_0 : i32, i32
  }
  func.func @transform_2(%arg0: i32, %arg1: i32) -> (i32, i32) {
    %c0_i32 = arith.constant 0 : i32
    %c0_i32_0 = arith.constant 0 : i32
    %c0_i32_1 = arith.constant 0 : i32
    return %c0_i32, %c0_i32_0 : i32, i32
  }
  func.func @transform_3(%arg0: i32, %arg1: i32) -> (i32, i32, i32) {
    %c0_i32 = arith.constant 0 : i32
    %c0_i32_0 = arith.constant 0 : i32
    return %arg0, %c0_i32, %arg1 : i32, i32, i32
  }
}

</mosaic_0001>

<bundles_post_ra>
// kernel: tile.8
= control target key start
LH: loop header
LB: loop body
LE: loop exit
PB: predicated region body
PF: predicated region fallthrough
CT: control target
= control target key end

     0   :  { %s22_s0 = inlined_call_operand.vmem [shape: f32[64], index: 0, kind: input, shape index: {}]   ;;  %s23_s1 = inlined_call_operand.vmem [shape: f32[4,64], index: 1, kind: output, shape index: {}]  }
   0x1   :  { %v4_v0 = vld [vmem:[%s22_s0] ss:$0 sm:$0xff] }
   0x2   :  { %5 = vst [vmem:[%s23_s1] sm:$0xf] %v4_v0 }

// kernel: tile.9
= control target key start
LH: loop header
LB: loop body
LE: loop exit
PB: predicated region body
PF: predicated region fallthrough
CT: control target
= control target key end

     0   :  { %s6_s8 = smov 3  ;;  %vm8_vm0 = vcmask 523264   ;;  %s31_s9 = smov 64   ;;  %vm15_vm1 = vcmask 1048064   ;;  %s51_s0 = inlined_call_operand.vmem [shape: f32[4,64], index: 0, kind: input, shape index: {}]   ;;  %s52_s1 = inlined_call_operand.vmem [shape: f32[1,256], index: 1, kind: output, shape index: {}]  }
   0x1   :  { %v4_v0 = vld [vmem:[%s51_s0] sm:$0xf]  ;;  %s11_s0 = smov 3 }
   0x2   :  { %5 = vst [vmem:[#allocation1] sm:$0xf] %v4_v0 }
   0x9   :  { %v12_v1 = vld [vmem:[#allocation1 + $0x1] ss:$2 sm:%s11_s0]   ;;  %v7_v2 = vld [vmem:[#allocation1] ss:$2 sm:%s6_s8]  }
   0xa   :  { %13 = vrot.lane.b32.xlu0 %v12_v1, %s31_s9  ;;  %9 = vst.msk [vmem:[#allocation0] ss:$8 sm:$0x3] %vm8_vm0, %v7_v2  }
  0x7c   :  { %v14_v3 = vpop.permute.xlu0 %13  }
  0x7d   :  { %16 = vst.msk [vmem:[#allocation0] ss:$8 sm:$0x3] %vm15_vm1, %v14_v3  }
  0x84   :  { %v19_v4 = vld [vmem:[#allocation0] sm:$0x1]  ;;  %v24_v5 = vld [vmem:[#allocation0 + $0x8] sm:$0x1] }
  0x85   :  { %22 = vst [vmem:[%s52_s1] sm:$0x1] %v19_v4 }
  0x86   :  { %29 = vst [vmem:[%s52_s1 + $0x1] sm:$0x1] %v24_v5 }

// kernel: deconv_block.2
= control target key start
LH: loop header
LB: loop body
LE: loop exit
PB: predicated region body
PF: predicated region fallthrough
CT: control target
= control target key end

     0   :  { %s3623_s15 = smov 0   ;;  %s3625_s16 = smov 0   ;;  %s5632_s0 = inlined_call_operand.vmem [shape: f32[2,1,18,18,32], index: 0, kind: input, shape index: {}]   ;;  %s5633_s1 = inlined_call_operand.vmem [shape: f32[288,256], index: 1, kind: input, shape index: {}]   ;;  %s5634_s2 = inlined_call_operand.vmem [shape: f32[1,256], index: 2, kind: input, shape index: {}]   ;;  %s5635_s3 = inlined_call_operand.vmem [shape: bf16[2,16,2,16,128], index: 3, kind: output, shape index: {0}]   ;;  %s5636_s4 = inlined_call_operand.vmem [shape: f32[2,1,2,256], index: 4, kind: output, shape index: {1}]  }
   0x1   :  { %s3627_s17 = smov 0  }
   0x2 LB: > { %s27_s18 = sadd.s32 1, %s3589_s16  ;;  %p2741_p0 = scmp.ge.s32.totalorder %s3593_s17, 1  ;;  %s3593_s17 = sphi %s3627_s17, %s15_s17   ;;  %s3589_s16 = sphi %s3625_s16, %s5962_s16   ;;  %s3585_s15 = sphi %s3623_s15, %s5961_s15  }
   0x3   : > { %p29_p1 = scmp.ge.s32.totalorder %s27_s18, 2  ;;  %p187_p2 = scmp.lt.s32.totalorder %s3593_s17, 3 }
   0x5   : > { %s5964_s18 = smov (%p29_p1, %s27_s18), 0  ;;  %p188_p3 = pnand %p2741_p0, %p187_p2 }
   0x7   : > { %191 = sbr.rel (%p188_p3) target bundleno = 677 (0x2a5), region = 32 }
   0xc   : > { %p231_p4 = scmp.lt.s32.totalorder %s3585_s15, 1  ;;  %v1423_v0 = vld [vmem:[%s5633_s1 + $0x230] sm:$0xff]  ;;  %v1421_v1 = vld [vmem:[%s5633_s1 + $0x220] sm:$0xff]  ;;  %vm362_vm0 = vcmask 1046528   ;;  %vm443_vm1 = vcmask 1045504   ;;  %vm1158_vm2 = vcmask 261120  }
   0xd   : > { %3054 = vmatpush.msra.mxu3 %v1423_v0  ;;  %1727 = vmatpush.msra.mxu2 %v1423_v0  ;;  %v1419_v2 = vld [vmem:[%s5633_s1 + $0x210] sm:$0xff]  ;;  %v1417_v3 = vld [vmem:[%s5633_s1 + $0x200] sm:$0xff]  ;;  %s3595_s5 = smov 32   ;;  %s3596_s6 = smov 96   ;;  %vm1191_vm3 = vcmask 523264   ;;  %vm1224_vm4 = vcmask 785408  }
   0xe   : > { %s5966_s15 = smov (!%p231_p4, %s3585_s15), 1  ;;  %s3597_s7 = smov 64   ;;  %vm2379_vm5 = vcmask 1040384   ;;  %vm2385_vm6 = vcmask 1041408  }
   0xf   : > { %3055 = vmatpush.msra.mxu3 %v1421_v1  ;;  %1728 = vmatpush.msra.mxu2 %v1421_v1  ;;  %s3062_s25 = smul.u32 432, %s5966_s15  ;;  %s2846_s24 = sshll.u32 %s5966_s15, 2 }
  0x10   : > { %s259_s27 = scalar_lea.vmem %s5636_s4, %s2846_s24 }
  0x11   : > { %3056 = vmatpush.msra.mxu3 %v1419_v2  ;;  %1729 = vmatpush.msra.mxu2 %v1419_v2  ;;  %s3659_s30 = scalar_lea.vmem %s5632_s0, %s3062_s25 }
  0x12   : > { %v3662_v4 = vld [vmem:[%s3659_s30 + $0xc0] sm:$0xff]  ;;  %v3665_v5 = vld [vmem:[%s3659_s30 + $0xc8] sm:$0xff]  ;;  %v286_v6 = vld [vmem:[%s3659_s30 + $0xd0] sm:$0x3] }
  0x13   : > { %3057 = vmatpush.msra.mxu3 %v1417_v3  ;;  %1730 = vmatpush.msra.mxu2 %v1417_v3  ;;  %v403_v7 = vrot.slane %v3662_v4, 1  ;;  %v404_v8 = vrot.slane %v3665_v5, 1  ;;  %v406_v9 = vrot.slane %v286_v6, 1  ;;  %v3671_v10 = vld [vmem:[%s3659_s30] sm:$0xff]  ;;  %v3674_v11 = vld [vmem:[%s3659_s30 + $0x8] sm:$0xff]  ;;  %v3688_v20 = vld [vmem:[%s3659_s30 + $0x18] sm:$0xff] }
  0x14   : > { %v262_v12 = vld [vmem:[%s3659_s30 + $0x10] sm:$0x3]  ;;  %v363_v13 = vrot.slane %v3671_v10, 1  ;;  %v364_v14 = vrot.slane %v3674_v11, 1  ;;  %v444_v15 = vrot.slane %v3671_v10, 2  ;;  %v445_v19 = vrot.slane %v3674_v11, 2 }
  0x15   : > { %v3681_v16 = vsel %vm362_vm0, %v403_v7, %v404_v8  ;;  %v3684_v17 = vsel %vm362_vm0, %v404_v8, %v406_v9  ;;  %v366_v18 = vrot.slane %v262_v12, 1  ;;  %v3691_v21 = vld [vmem:[%s3659_s30 + $0x20] sm:$0xff]  ;;  %v3694_v22 = vld [vmem:[%s3659_s30 + $0x28] sm:$0x3]  ;;  %v484_v25 = vrot.slane %v3662_v4, 2  ;;  %v3706_v27 = vld [vmem:[%s3659_s30 + $0x110] sm:$0xff] }
  0x16   : > { %5729 = vst [vmem:[#allocation2_spill] sm:$0xff] %v3681_v16  ;;  %v3698_v23 = vpack.i.bf16 %v3684_v17, %v3681_v16  ;;  %v365_v24 = vsel %vm362_vm0, %v363_v13, %v364_v14  ;;  %v3703_v26 = vld [vmem:[%s3659_s30 + $0x108] sm:$0xff]  ;;  %v485_v29 = vrot.slane %v3665_v5, 2  ;;  %v368_v30 = vrot.slane %v3688_v20, 1  ;;  %v3722_v38 = vld [vmem:[%s3659_s30 + $0xd8] sm:$0xff]  ;;  %v3725_v39 = vld [vmem:[%s3659_s30 + $0xe0] sm:$0xff] }
  0x17   : > { %5730 = vst [vmem:[#allocation3_spill] sm:$0xff] %v3684_v17  ;;  %v367_v28 = vsel %vm362_vm0, %v364_v14, %v366_v18  ;;  %v369_v31 = vrot.slane %v3691_v21, 1  ;;  %v371_v33 = vrot.slane %v3694_v22, 1  ;;  %v499_v34 = vrot.slane %v3703_v26, 2  ;;  %v3728_v40 = vld [vmem:[%s3659_s30 + $0x118] sm:$0x3] }
  0x18   : > { %5731 = vst [vmem:[#allocation4_spill] sm:$0xff] %v3698_v23  ;;  %3101 = vrot.lane.b32.xlu1 %v3698_v23, %s3595_s5  ;;  %v3090_v32 = vpack.i.bf16 %v367_v28, %v365_v24  ;;  %v500_v35 = vrot.slane %v3706_v27, 2  ;;  %v446_v36 = vsel %vm443_vm1, %v444_v15, %v445_v19  ;;  %v3719_v37 = vsel %vm443_vm1, %v484_v25, %v485_v29  ;;  %v289_v44 = vld [vmem:[%s3659_s30 + $0xe8] sm:$0x3]  ;;  %v3757_v56 = vld [vmem:[%s3659_s30 + $0x38] sm:$0xff]  ;;  %v3767_v59 = vld [vmem:[%s3659_s30 + $0x30] sm:$0xff] }
  0x19   : > { %5732 = vst [vmem:[#allocation5_spill] sm:$0xff] %v3719_v37  ;;  %v487_v41 = vrot.slane %v286_v6, 2  ;;  %v447_v42 = vrot.slane %v262_v12, 2  ;;  %v3736_v45 = vsel %vm362_vm0, %v368_v30, %v369_v31  ;;  %v3739_v46 = vsel %vm362_vm0, %v369_v31, %v371_v33  ;;  %v3774_v62 = vld [vmem:[%s3659_s30 + $0x120] sm:$0xff]  ;;  %v3777_v63 = vld [vmem:[%s3659_s30 + $0x128] sm:$0xff]  ;;  %v3834_v33 = vld [vmem:[%s3659_s30 + $0xf0] sm:$0xff] }
  0x1a   : > { %3091 = vrot.lane.b32.xlu0 %v3090_v32, %s3595_s5  ;;  %v3732_v43 = vsel %vm443_vm1, %v499_v34, %v500_v35  ;;  %5734 = vst [vmem:[#allocation7_spill] sm:$0xff] %v3736_v45  ;;  %v3110_v47 = vpack.i.bf16 %v3688_v20, %v3722_v38  ;;  %v3105_v48 = vpack.i.bf16 %v446_v36, %v3719_v37  ;;  %v408_v49 = vrot.slane %v3722_v38, 1  ;;  %v3798_v14 = vld [vmem:[%s3659_s30 + $0x40] sm:$0x3]  ;;  %v3827_v31 = vld [vmem:[%s3659_s30 + $0x130] sm:$0x3] }
  0x1b   : > { %5733 = vst [vmem:[#allocation6_spill] sm:$0xff] %v3732_v43  ;;  %2765 = vmatmul.msk.f32.vlgmr.msra.gmra.mxu3 %vm1158_vm2, %v3732_v43  ;;  %v409_v50 = vrot.slane %v3725_v39, 1  ;;  %v502_v51 = vrot.slane %v3728_v40, 2  ;;  %v411_v52 = vrot.slane %v289_v44, 1  ;;  %v3095_v53 = vpack.i.bf16 %v3739_v46, %v3736_v45  ;;  %v3831_v32 = vld [vmem:[%s3659_s30 + $0xf8] sm:$0xff] }
  0x1c   : > { %5735 = vst [vmem:[#allocation8_spill] sm:$0xff] %v3739_v46  ;;  %3111 = vrot.lane.b32.xlu2 %v3110_v47, %s3596_s6  ;;  %v448_v54 = vsel %vm443_vm1, %v445_v19, %v447_v42  ;;  %v3754_v55 = vsel %vm443_vm1, %v485_v29, %v487_v41  ;;  %v454_v0 = vrot.slane %v3767_v59, 2  ;;  %v455_v1 = vrot.slane %v3757_v56, 2  ;;  %v3845_v41 = vld [vmem:[%s3659_s30 + $0x48] sm:$0xff]  ;;  %v3848_v42 = vld [vmem:[%s3659_s30 + $0x50] sm:$0xff]  ;;  %v3954_v17 = vld [vmem:[%s3659_s30 + $0x158] sm:$0xff] }
  0x1d   : > { %5736 = vst [vmem:[#allocation9_spill] sm:$0xff] %v3754_v55  ;;  %v3761_v57 = vsel %vm362_vm0, %v408_v49, %v409_v50  ;;  %v3764_v58 = vsel %vm443_vm1, %v500_v35, %v502_v51  ;;  %v3770_v60 = vsel %vm362_vm0, %v409_v50, %v411_v52  ;;  %v3120_v61 = vpack.i.bf16 %v448_v54, %v3754_v55 }
  0x1e   : > { %5737 = vst [vmem:[#allocation10_spill] sm:$0xff] %v3761_v57  ;;  %v450_v2 = vrot.slane %v3691_v21, 2  ;;  %v3786_v3 = vsel %vm443_vm1, %v454_v0, %v455_v1  ;;  %v449_v6 = vrot.slane %v3688_v20, 2  ;;  %v489_v7 = vrot.slane %v3722_v38, 2 }
  0x1f   : > { %5738 = vst [vmem:[#allocation11_spill] sm:$0xff] %v3764_v58  ;;  %v3792_v8 = vpack.i.bf16 %v3770_v60, %v3761_v57  ;;  %v490_v9 = vrot.slane %v3725_v39, 2  ;;  %v504_v12 = vrot.slane %v3774_v62, 2  ;;  %v505_v13 = vrot.slane %v3777_v63, 2  ;;  %2747 = vmatmul.msk.f32.vlgmr.msra.gmra.mxu2 %vm1158_vm2, %v3786_v3  ;;  %v3951_v57 = vld [vmem:[%s3659_s30 + $0x150] sm:$0xff] }
  0x20   : > { %3106 = vrot.lane.b32.xlu1 %v3105_v48, %s3597_s7  ;;  %5739 = vst [vmem:[#allocation12_spill] sm:$0xff] %v3770_v60  ;;  %v452_v15 = vrot.slane %v3694_v22, 2  ;;  %v492_v18 = vrot.slane %v289_v44, 2  ;;  %v3115_v19 = vpack.i.bf16 %v3691_v21, %v3725_v39  ;;  %v3807_v24 = vsel %vm443_vm1, %v449_v6, %v450_v2 }
  0x21   : > { %5740 = vst [vmem:[#allocation13_spill] sm:$0xff] %v3792_v8  ;;  %v3810_v25 = vsel %vm443_vm1, %v489_v7, %v490_v9  ;;  %v457_v28 = vrot.slane %v3798_v14, 2  ;;  %v3816_v22 = vsel %vm443_vm1, %v504_v12, %v505_v13  ;;  %v507_v36 = vrot.slane %v3827_v31, 2  ;;  %v292_v7 = vld [vmem:[%s3659_s30 + $0x100] sm:$0x3] }
  0x22   : > { %3096 = vrot.lane.b32.xlu0 %v3095_v53, %s3595_s5  ;;  %5741 = vst [vmem:[#allocation14_spill] sm:$0xff] %v3810_v25  ;;  %v3819_v29 = vsel %vm443_vm1, %v450_v2, %v452_v15  ;;  %v3822_v21 = vsel %vm443_vm1, %v490_v9, %v492_v18  ;;  %v3130_v30 = vpack.i.bf16 %v3807_v24, %v3810_v25  ;;  %v494_v44 = vrot.slane %v3834_v33, 2  ;;  %v3874_v2 = vld [vmem:[%s3659_s30 + $0x140] sm:$0xff] }
  0x23   : > { %2766 = vmatmul.msk.f32.gmra.mxu3 %vm1158_vm2, %v3764_v58  ;;  %5742 = vst [vmem:[#allocation15_spill] sm:$0xff] %v3816_v22  ;;  %v3839_v34 = vsel %vm443_vm1, %v455_v1, %v457_v28  ;;  %v3140_v35 = vpack.i.bf16 %v3819_v29, %v3822_v21  ;;  %v495_v47 = vrot.slane %v3831_v32, 2  ;;  %v3135_v48 = vpack.i.bf16 %v3767_v59, %v3834_v33  ;;  %v3871_v1 = vld [vmem:[%s3659_s30 + $0x138] sm:$0xff] }
  0x24   : > { %3121 = vrot.lane.b32.xlu2 %v3120_v61, %s3597_s7  ;;  %5743 = vst [vmem:[#allocation16_spill] sm:$0xff] %v3822_v21  ;;  %v373_v49 = vrot.slane %v3767_v59, 1  ;;  %v374_v50 = vrot.slane %v3757_v56, 1  ;;  %v413_v51 = vrot.slane %v3834_v33, 1  ;;  %v414_v52 = vrot.slane %v3831_v32, 1 }
  0x25   : > { %5744 = vst [vmem:[#allocation17_spill] sm:$0xff] %v3831_v32  ;;  %v459_v53 = vrot.slane %v3845_v41, 2  ;;  %v460_v54 = vrot.slane %v3848_v42, 2  ;;  %v3865_v61 = vsel %vm443_vm1, %v505_v13, %v507_v36  ;;  %v3868_v0 = vsel %vm443_vm1, %v494_v44, %v495_v47  ;;  %v271_v28 = vld [vmem:[%s3659_s30 + $0x58] sm:$0x3] }
  0x26   : > { %5745 = vst [vmem:[#allocation18_spill] sm:$0xff] %v3834_v33  ;;  %v3145_v6 = vpack.i.bf16 %v3757_v56, %v3831_v32  ;;  %v3881_v9 = vsel %vm362_vm0, %v373_v49, %v374_v50  ;;  %v3884_v12 = vsel %vm362_vm0, %v413_v51, %v414_v52  ;;  %v3155_v15 = vpack.i.bf16 %v3786_v3, %v3868_v0  ;;  %v1372_v33 = vld [vmem:[%s5633_s1 + $0x98] sm:$0xff] }
  0x27   : > { %2748 = vmatmul.msk.f32.gmra.mxu2 %vm1158_vm2, %v3839_v34  ;;  %5746 = vst [vmem:[#allocation19_spill] sm:$0xff] %v3865_v61  ;;  %v3889_v13 = vsel %vm443_vm1, %v459_v53, %v460_v54  ;;  %v509_v18 = vrot.slane %v3871_v1, 2  ;;  %v376_v36 = vrot.slane %v3798_v14, 1  ;;  %v416_v44 = vrot.slane %v292_v7, 1  ;;  %v3910_v53 = vld [vmem:[%s3659_s30 + $0x148] sm:$0x3] }
  0x28   : > { %3126 = vrot.lane.b32.xlu1 %v3792_v8, %s3595_s5  ;;  %5747 = vst [vmem:[#allocation20_spill] sm:$0xff] %v3868_v0  ;;  %v3175_v16 = vpack.i.bf16 %v3848_v42, %v3706_v27  ;;  %v4027_v8 = vld [vmem:[%s3659_s30 + $0x168] sm:$0xff] }
  0x29   : > { %5748 = vst [vmem:[#allocation21_spill] sm:$0xff] %v3884_v12  ;;  %v3916_v14 = vsel %vm362_vm0, %v374_v50, %v376_v36  ;;  %v3933_v50 = vld [vmem:[%s3659_s30 + $0x68] sm:$0xff]  ;;  %v418_v36 = vrot.slane %v3703_v26, 1 }
  0x2a   : > { %3116 = vrot.lane.b32.xlu0 %v3115_v19, %s3596_s6  ;;  %v510_v19 = vrot.slane %v3874_v2, 2  ;;  %v465_v60 = vrot.slane %v3933_v50, 2  ;;  %v3205_v23 = vpack.i.bf16 %v3933_v50, %v3777_v63 }
  0x2b   : > { %2767 = vmatmul.msk.f32.gmra.mxu3 %vm1158_vm2, %v3816_v22 }
  0x2c   : > { %3131 = vrot.lane.b32.xlu2 %v3130_v30, %s3597_s7  ;;  %v497_v30 = vrot.slane %v292_v7, 2  ;;  %v3904_v49 = vsel %vm443_vm1, %v509_v18, %v510_v19  ;;  %v3919_v7 = vsel %vm362_vm0, %v414_v52, %v416_v44  ;;  %v512_v18 = vrot.slane %v3910_v53, 2 }
  0x2d   : > { %5749 = vst [vmem:[#allocation22_spill] sm:$0xff] %v3904_v49  ;;  %v3165_v52 = vpack.i.bf16 %v3916_v14, %v3919_v7  ;;  %v419_v44 = vrot.slane %v3706_v27, 1  ;;  %v514_v27 = vrot.slane %v3951_v57, 2 }
  0x2e   : > { %v3907_v51 = vsel %vm443_vm1, %v495_v47, %v497_v30  ;;  %5751 = vst [vmem:[#allocation24_spill] sm:$0xff] %v3919_v7  ;;  %v3930_v30 = vld [vmem:[%s3659_s30 + $0x60] sm:$0xff] }
  0x2f   : > { %2749 = vmatmul.msk.f32.gmra.mxu2 %vm1158_vm2, %v3889_v13  ;;  %5750 = vst [vmem:[#allocation23_spill] sm:$0xff] %v3907_v51  ;;  %v3170_v47 = vpack.i.bf16 %v3839_v34, %v3907_v51  ;;  %v3963_v46 = vsel %vm362_vm0, %v418_v36, %v419_v44  ;;  %v421_v36 = vrot.slane %v3728_v40, 1  ;;  %v3190_v45 = vpack.i.bf16 %v3930_v30, %v3774_v62 }
  0x30   : > { %3141 = vrot.lane.b32.xlu1 %v3140_v35, %s3597_s7  ;;  %v3150_v35 = vpack.i.bf16 %v3881_v9, %v3884_v12  ;;  %5753 = vst [vmem:[#allocation26_spill] sm:$0xff] %v3963_v46  ;;  %v3986_v12 = vld [vmem:[%s3659_s30 + $0x160] sm:$0x3] }
  0x31   : > { %v3995_v40 = vsel %vm362_vm0, %v419_v44, %v421_v36  ;;  %v4012_v44 = vld [vmem:[%s3659_s30 + $0x80] sm:$0xff]  ;;  %v423_v36 = vrot.slane %v3774_v62, 1  ;;  %v1383_v62 = vld [vmem:[%s5633_s1 + $0xf0] sm:$0xff] }
  0x32   : > { %3136 = vrot.lane.b32.xlu0 %v3135_v48, %s3596_s6  ;;  %v462_v48 = vrot.slane %v271_v28, 2  ;;  %5755 = vst [vmem:[#allocation28_spill] sm:$0xff] %v3995_v40  ;;  %1489 = vmatpush.msra.mxu0 %v1383_v62  ;;  %v3235_v21 = vpack.i.bf16 %v4012_v44, %v3874_v2 }
  0x33   : > { %2768 = vmatmul.msk.f32.gmra.mxu3 %vm1158_vm2, %v3865_v61  ;;  %3038 = vmatpush.msra.mxu1 %v1383_v62 }
  0x34   : > { %3146 = vrot.lane.b32.xlu2 %v3145_v6, %s3596_s6  ;;  %v3160_v6 = vpack.i.bf16 %v3845_v41, %v3703_v26 }
  0x38   : > { %3156 = vrot.lane.b32.xlu1 %v3155_v15, %s3597_s7  ;;  %v3924_v15 = vsel %vm443_vm1, %v460_v54, %v462_v48  ;;  %v378_v54 = vrot.slane %v3845_v41, 1  ;;  %v464_v48 = vrot.slane %v3930_v30, 2 }
  0x39   : > { %2750 = vmatmul.msk.f32.gmra.mxu2 %vm1158_vm2, %v3924_v15 }
  0x3a   : > { %3151 = vrot.lane.b32.xlu0 %v3150_v35, %s3595_s5  ;;  %v379_v35 = vrot.slane %v3848_v42, 1 }
  0x3b   : > { %2769 = vmatmul.msk.f32.gmra.mxu3 %vm1158_vm2, %v3904_v49 }
  0x3c   : > { %3161 = vrot.lane.b32.xlu2 %v3160_v6, %s3596_s6  ;;  %v3948_v6 = vsel %vm443_vm1, %v510_v19, %v512_v18  ;;  %v3960_v26 = vsel %vm362_vm0, %v378_v54, %v379_v35  ;;  %v3968_v19 = vsel %vm443_vm1, %v464_v48, %v465_v60  ;;  %v515_v18 = vrot.slane %v3954_v17, 2 }
  0x3d   : > { %5752 = vst [vmem:[#allocation25_spill] sm:$0xff] %v3948_v6  ;;  %v3180_v54 = vpack.i.bf16 %v3960_v26, %v3963_v46  ;;  %v381_v48 = vrot.slane %v271_v28, 1 }
  0x40   : > { %3171 = vrot.lane.b32.xlu1 %v3170_v47, %s3597_s7  ;;  %v3185_v47 = vpack.i.bf16 %v3889_v13, %v3732_v43  ;;  %v3983_v43 = vsel %vm443_vm1, %v514_v27, %v515_v18  ;;  %v517_v27 = vrot.slane %v3986_v12, 2 }
  0x41   : > { %2751 = vmatmul.msk.f32.gmra.mxu2 %vm1158_vm2, %v3968_v19  ;;  %5754 = vst [vmem:[#allocation27_spill] sm:$0xff] %v3983_v43 }
  0x42   : > { %3166 = vrot.lane.b32.xlu0 %v3165_v52, %s3595_s5  ;;  %v274_v52 = vld [vmem:[%s3659_s30 + $0x70] sm:$0x3]  ;;  %v4022_v46 = vsel %vm443_vm1, %v515_v18, %v517_v27  ;;  %v3215_v27 = vpack.i.bf16 %v3968_v19, %v3816_v22  ;;  %v426_v22 = vrot.slane %v3827_v31, 1  ;;  %v1382_v31 = vld [vmem:[%s5633_s1 + $0xe8] sm:$0xff] }
  0x43   : > { %2770 = vmatmul.msk.f32.gmra.mxu3 %vm1158_vm2, %v3948_v6  ;;  %v467_v7 = vrot.slane %v274_v52, 2  ;;  %5757 = vst [vmem:[#allocation30_spill] sm:$0xff] %v4022_v46  ;;  %v386_v0 = vrot.slane %v274_v52, 1  ;;  %v1379_v52 = vld [vmem:[%s5633_s1 + $0xd0] sm:$0xff] }
  0x44   : > { %3176 = vrot.lane.b32.xlu2 %v3175_v16, %s3596_s6  ;;  %v3992_v16 = vsel %vm362_vm0, %v379_v35, %v381_v48  ;;  %v4009_v35 = vld [vmem:[%s3659_s30 + $0x78] sm:$0xff]  ;;  %v424_v48 = vrot.slane %v3777_v63, 1 }
  0x45   : > { %v4000_v28 = vsel %vm443_vm1, %v465_v60, %v467_v7  ;;  %v3195_v60 = vpack.i.bf16 %v3992_v16, %v3995_v40  ;;  %v383_v7 = vrot.slane %v3930_v30, 1  ;;  %v4030_v40 = vld [vmem:[%s3659_s30 + $0x170] sm:$0xff]  ;;  %v1384_v63 = vld [vmem:[%s5633_s1 + $0xf8] sm:$0xff]  ;;  %v3220_v62 = vpack.i.bf16 %v4009_v35, %v3871_v1 }
  0x46   : > { %5756 = vst [vmem:[#allocation29_spill] sm:$0xff] %v4000_v28  ;;  %1828 = vmatpush.msrb.mxu3 %v1384_v63 }
  0x48   : > { %3186 = vrot.lane.b32.xlu1 %v3185_v47, %s3597_s7  ;;  %v3200_v47 = vpack.i.bf16 %v3924_v15, %v3764_v58  ;;  %v5664_v58 = vrot.slane %v4012_v44, 2  ;;  %1829 = vmatpush.msrb.mxu3 %v1382_v31  ;;  %v388_v31 = vrot.slane %v4009_v35, 1 }
  0x49   : > { %2752 = vmatmul.msk.f32.gmra.mxu2 %vm1158_vm2, %v4000_v28 }
  0x4a   : > { %3181 = vrot.lane.b32.xlu0 %v3180_v54, %s3595_s5  ;;  %v384_v54 = vrot.slane %v3933_v50, 1 }
  0x4b   : > { %2771 = vmatmul.msk.f32.gmra.mxu3 %vm1158_vm2, %v3983_v43 }
  0x4c   : > { %3191 = vrot.lane.b32.xlu2 %v3190_v45, %s3596_s6  ;;  %v469_v45 = vrot.slane %v4009_v35, 2  ;;  %v4039_v18 = vsel %vm362_vm0, %v383_v7, %v384_v54  ;;  %v520_v7 = vrot.slane %v4030_v40, 2  ;;  %v4084_v63 = vsel %vm362_vm0, %v384_v54, %v386_v0  ;;  %v1416_v0 = vld [vmem:[%s5633_s1 + $0x1f8] sm:$0xff] }
  0x4d   : > { %1941 = vmatpush.msrb.mxu2 %v1416_v0  ;;  %v1374_v0 = vld [vmem:[%s5633_s1 + $0xa8] sm:$0xff] }
  0x50   : > { %3201 = vrot.lane.b32.xlu1 %v3200_v47, %s3597_s7  ;;  %v4042_v47 = vsel %vm362_vm0, %v423_v36, %v424_v48  ;;  %v4056_v36 = vsel %vm443_vm1, %v469_v45, %v5664_v58  ;;  %v4069_v45 = vld [vmem:[%s3659_s30 + $0x178] sm:$0x3] }
  0x51   : > { %5758 = vst [vmem:[#allocation31_spill] sm:$0xff] %v4042_v47  ;;  %2753 = vmatmul.msk.f32.gmra.mxu2 %vm1158_vm2, %v4056_v36  ;;  %v3210_v51 = vpack.i.bf16 %v4039_v18, %v4042_v47  ;;  %v522_v58 = vrot.slane %v4069_v45, 2  ;;  %v428_v47 = vrot.slane %v3871_v1, 1  ;;  %v1376_v1 = vld [vmem:[%s5633_s1 + $0xb8] sm:$0xff] }
  0x52   : > { %3196 = vrot.lane.b32.xlu0 %v3195_v60, %s3595_s5  ;;  %v519_v60 = vrot.slane %v4027_v8, 2  ;;  %5759 = vst [vmem:[#allocation32_spill] sm:$0xff] %v4056_v36 }
  0x53   : > { %2772 = vmatmul.msk.f32.gmra.mxu3 %vm1158_vm2, %v4022_v46 }
  0x54   : > { %3206 = vrot.lane.b32.xlu2 %v3205_v23, %s3596_s6  ;;  %v4066_v32 = vsel %vm443_vm1, %v519_v60, %v520_v7  ;;  %v1381_v23 = vld [vmem:[%s5633_s1 + $0xe0] sm:$0xff]  ;;  %v3230_v60 = vpack.i.bf16 %v4000_v28, %v3865_v61  ;;  %v429_v61 = vrot.slane %v3874_v2, 1  ;;  %v1370_v28 = vld [vmem:[%s5633_s1 + $0x88] sm:$0xff] }
  0x55   : > { %5760 = vst [vmem:[#allocation33_spill] sm:$0xff] %v4066_v32  ;;  %1490 = vmatpush.msra.mxu0 %v1381_v23  ;;  %3039 = vmatpush.msra.mxu1 %v1381_v23  ;;  %v1375_v23 = vld [vmem:[%s5633_s1 + $0xb0] sm:$0xff] }
  0x57   : > { %1491 = vmatpush.msra.mxu0 %v1379_v52  ;;  %3040 = vmatpush.msra.mxu1 %v1379_v52  ;;  %v4118_v52 = vsel %vm443_vm1, %v520_v7, %v522_v58  ;;  %v1373_v58 = vld [vmem:[%s5633_s1 + $0xa0] sm:$0xff]  ;;  %v1371_v7 = vld [vmem:[%s5633_s1 + $0x90] sm:$0xff] }
  0x58   : > { %3216 = vrot.lane.b32.xlu1 %v3215_v27, %s3597_s7  ;;  %v4087_v27 = vsel %vm362_vm0, %v424_v48, %v426_v22  ;;  %v1377_v22 = vld [vmem:[%s5633_s1 + $0xc0] sm:$0xff]  ;;  %v1378_v48 = vld [vmem:[%s5633_s1 + $0xc8] sm:$0xff]  ;;  %5762 = vst [vmem:[#allocation35_spill] sm:$0xff] %v4118_v52 }
  0x59   : > { %5761 = vst [vmem:[#allocation34_spill] sm:$0xff] %v4087_v27  ;;  %v3225_v54 = vpack.i.bf16 %v4084_v63, %v4087_v27  ;;  %1492 = vmatpush.msra.mxu0 %v1377_v22  ;;  %3041 = vmatpush.msra.mxu1 %v1377_v22  ;;  %v4124_v27 = vld [vmem:[%s3659_s30 + $0x188] sm:$0xff]  ;;  %v4143_v22 = vsel %vm362_vm0, %v428_v47, %v429_v61  ;;  %v1369_v47 = vld [vmem:[%s5633_s1 + $0x80] sm:$0xff] }
  0x5a   : > { %3211 = vrot.lane.b32.xlu0 %v3210_v51, %s3595_s5  ;;  %v1380_v51 = vld [vmem:[%s5633_s1 + $0xd8] sm:$0xff]  ;;  %5764 = vst [vmem:[#allocation37_spill] sm:$0xff] %v4143_v22 }
  0x5b   : > { %2773 = vmatmul.msk.f32.gmra.mxu3 %vm1158_vm2, %v4066_v32  ;;  %1493 = vmatpush.msra.mxu0 %v1375_v23 }
  0x5c   : > { %3221 = vrot.lane.b32.xlu2 %v3220_v62, %s3596_s6  ;;  %1830 = vmatpush.msrb.mxu3 %v1380_v51  ;;  %v389_v62 = vrot.slane %v4012_v44, 1  ;;  %v4121_v51 = vld [vmem:[%s3659_s30 + $0x180] sm:$0xff] }
  0x5d   : > { %3042 = vmatpush.msra.mxu1 %v1375_v23  ;;  %1494 = vmatpush.msra.mxu0 %v1373_v58  ;;  %v565_v23 = vrot.slane %v4124_v27, 2 }
  0x5e   : > { %1831 = vmatpush.msrb.mxu3 %v1378_v48  ;;  %v4140_v2 = vsel %vm362_vm0, %v388_v31, %v389_v62  ;;  %v564_v48 = vrot.slane %v4121_v51, 2 }
  0x5f   : > { %5763 = vst [vmem:[#allocation36_spill] sm:$0xff] %v4140_v2  ;;  %3043 = vmatpush.msra.mxu1 %v1373_v58  ;;  %1495 = vmatpush.msra.mxu0 %v1371_v7  ;;  %v1367_v58 = vld [vmem:[%s5633_s1 + $0x70] sm:$0xff] }
  0x60   : > { %3231 = vrot.lane.b32.xlu1 %v3230_v60, %s3597_s7  ;;  %v277_v60 = vld [vmem:[%s3659_s30 + $0x88] sm:$0x3]  ;;  %1832 = vmatpush.msrb.mxu3 %v1376_v1  ;;  %v3240_v1 = vpack.i.bf16 %v4140_v2, %v4143_v22  ;;  %v4175_v22 = vsel %vm443_vm1, %v564_v48, %v565_v23 }
  0x61   : > { %v472_v31 = vrot.slane %v277_v60, 2  ;;  %3044 = vmatpush.msra.mxu1 %v1371_v7  ;;  %1496 = vmatpush.msra.mxu0 %v1369_v47  ;;  %5765 = vst [vmem:[#allocation38_spill] sm:$0xff] %v4175_v22  ;;  %v4178_v7 = vld [vmem:[%s3659_s30 + $0x90] sm:$0xff] }
  0x62   : > { %3226 = vrot.lane.b32.xlu0 %v3225_v54, %s3595_s5  ;;  %v3245_v54 = vpack.i.bf16 %v4056_v36, %v3904_v49  ;;  %v1414_v49 = vld [vmem:[%s5633_s1 + $0x1e8] sm:$0xff]  ;;  %1833 = vmatpush.msrb.mxu3 %v1374_v0  ;;  %v391_v36 = vrot.slane %v277_v60, 1  ;;  %v5766_v0 = vrot.slane %v4012_v44, 2  ;;  %v310_v60 = vld [vmem:[%s3659_s30 + $0x190] sm:$0x3]  ;;  %v3250_v2 = vpack.i.bf16 %v4178_v7, %v3951_v57 }
  0x63   : > { %2774 = vmatmul.msk.f32.gmra.mxu3 %vm1158_vm2, %v4118_v52  ;;  %1942 = vmatpush.msrb.mxu2 %v1414_v49  ;;  %v1368_v49 = vld [vmem:[%s5633_s1 + $0x78] sm:$0xff] }
  0x64   : > { %3236 = vrot.lane.b32.xlu2 %v3235_v21, %s3596_s6  ;;  %v431_v21 = vrot.slane %v3910_v53, 1  ;;  %1834 = vmatpush.msrb.mxu3 %v1372_v33  ;;  %v4183_v53 = vsel %vm443_vm1, %v5766_v0, %v472_v31  ;;  %v1365_v33 = vld [vmem:[%s5633_s1 + $0x60] sm:$0xff]  ;;  %v4199_v48 = vsel %vm362_vm0, %v389_v62, %v391_v36  ;;  %v474_v36 = vrot.slane %v4178_v7, 2 }
  0x65   : > { %3045 = vmatpush.msra.mxu1 %v1369_v47  ;;  %1497 = vmatpush.msra.mxu0 %v1367_v58  ;;  %5767 = vst [vmem:[#allocation39_spill] sm:$0xff] %v4199_v48  ;;  %v1366_v47 = vld [vmem:[%s5633_s1 + $0x68] sm:$0xff]  ;;  %v393_v0 = vrot.slane %v4178_v7, 1 }
  0x66   : > { %1835 = vmatpush.msrb.mxu3 %v1370_v28  ;;  %v4202_v31 = vsel %vm362_vm0, %v429_v61, %v431_v21  ;;  %v3260_v28 = vpack.i.bf16 %v4183_v53, %v3948_v6  ;;  %v1363_v61 = vld [vmem:[%s5633_s1 + $0x50] sm:$0xff]  ;;  %2754 = vmatmul.msk.f32.gmra.mxu2 %vm1158_vm2, %v4183_v53  ;;  %v4246_v6 = vld [vmem:[%s3659_s30 + $0x1a0] sm:$0xff] }
  0x67   : > { %5768 = vst [vmem:[#allocation40_spill] sm:$0xff] %v4202_v31  ;;  %3046 = vmatpush.msra.mxu1 %v1367_v58  ;;  %1498 = vmatpush.msra.mxu0 %v1365_v33  ;;  %v1364_v58 = vld [vmem:[%s5633_s1 + $0x58] sm:$0xff]  ;;  %v3255_v21 = vpack.i.bf16 %v4199_v48, %v4202_v31 }
  0x68   : > { %3246 = vrot.lane.b32.xlu1 %v3245_v54, %s3597_s7  ;;  %v4193_v54 = vld [vmem:[%s3659_s30 + $0x98] sm:$0xff]  ;;  %1836 = vmatpush.msrb.mxu3 %v1368_v49  ;;  %v433_v49 = vrot.slane %v3951_v57, 1  ;;  %v1359_v57 = vld [vmem:[%s5633_s1 + $0x30] sm:$0xff] }
  0x69   : > { %v475_v62 = vrot.slane %v4193_v54, 2  ;;  %3047 = vmatpush.msra.mxu1 %v1365_v33  ;;  %1499 = vmatpush.msra.mxu0 %v1363_v61  ;;  %v434_v33 = vrot.slane %v3954_v17, 1  ;;  %v3265_v48 = vpack.i.bf16 %v4193_v54, %v3954_v17  ;;  %v1357_v17 = vld [vmem:[%s5633_s1 + $0x20] sm:$0xff] }
  0x6a   : > { %3241 = vrot.lane.b32.xlu0 %v3240_v1, %s3595_s5  ;;  %v567_v1 = vrot.slane %v310_v60, 2  ;;  %1837 = vmatpush.msrb.mxu3 %v1366_v47  ;;  %v394_v60 = vrot.slane %v4193_v54, 1  ;;  %v1362_v47 = vld [vmem:[%s5633_s1 + $0x48] sm:$0xff] }
  0x6b   : > { %2775 = vmatmul.msk.f32.gmra.mxu3 %vm1158_vm2, %v4175_v22  ;;  %3048 = vmatpush.msra.mxu1 %v1363_v61  ;;  %v4242_v31 = vsel %vm443_vm1, %v474_v36, %v475_v62  ;;  %v311_v61 = vld [vmem:[%s3659_s30 + $0x198] sm:$0xff] }
  0x6c   : > { %3251 = vrot.lane.b32.xlu2 %v3250_v2, %s3596_s6  ;;  %v1361_v2 = vld [vmem:[%s5633_s1 + $0x40] sm:$0xff]  ;;  %v4236_v22 = vsel %vm443_vm1, %v565_v23, %v567_v1  ;;  %1838 = vmatpush.msrb.mxu3 %v1364_v58  ;;  %5770 = vst [vmem:[#allocation42_spill] sm:$0xff] %v4242_v31  ;;  %v1360_v23 = vld [vmem:[%s5633_s1 + $0x38] sm:$0xff]  ;;  %v4259_v36 = vsel %vm362_vm0, %v393_v0, %v394_v60  ;;  %v1358_v0 = vld [vmem:[%s5633_s1 + $0x28] sm:$0xff] }
  0x6d   : > { %5769 = vst [vmem:[#allocation41_spill] sm:$0xff] %v4236_v22  ;;  %1500 = vmatpush.msra.mxu0 %v1361_v2  ;;  %3049 = vmatpush.msra.mxu1 %v1361_v2  ;;  %v1412_v1 = vld [vmem:[%s5633_s1 + $0x1d8] sm:$0xff]  ;;  %v4262_v58 = vsel %vm362_vm0, %v433_v49, %v434_v33  ;;  %v577_v2 = vrot.slane %v311_v61, 2 }
  0x6e   : > { %1839 = vmatpush.msrb.mxu3 %v1362_v47  ;;  %5771 = vst [vmem:[#allocation43_spill] sm:$0xff] %v4259_v36  ;;  %v578_v47 = vrot.slane %v4246_v6, 2  ;;  %1943 = vmatpush.msrb.mxu2 %v1412_v1  ;;  %v3270_v61 = vpack.i.bf16 %v4259_v36, %v4262_v58  ;;  %v1356_v6 = vld [vmem:[%s5633_s1 + $0x18] sm:$0xff] }
  0x6f   : > { %5772 = vst [vmem:[#allocation44_spill] sm:$0xff] %v4262_v58  ;;  %1501 = vmatpush.msra.mxu0 %v1359_v57  ;;  %3050 = vmatpush.msra.mxu1 %v1359_v57  ;;  %v436_v57 = vrot.slane %v3986_v12, 1  ;;  %v1354_v58 = vld [vmem:[%s5633_s1 + $0x8] sm:$0xff] }
  0x70   : > { %3261 = vrot.lane.b32.xlu1 %v3260_v28, %s3597_s7  ;;  %v280_v28 = vld [vmem:[%s3659_s30 + $0xa0] sm:$0x3]  ;;  %1840 = vmatpush.msrb.mxu3 %v1360_v23  ;;  %v4294_v1 = vsel %vm443_vm1, %v577_v2, %v578_v47  ;;  %v4313_v2 = vld [vmem:[%s3659_s30 + $0xb0] sm:$0xff] }
  0x71   : > { %v477_v49 = vrot.slane %v280_v28, 2  ;;  %1502 = vmatpush.msra.mxu0 %v1357_v17  ;;  %3051 = vmatpush.msra.mxu1 %v1357_v17  ;;  %v396_v23 = vrot.slane %v280_v28, 1  ;;  %5773 = vst [vmem:[#allocation45_spill] sm:$0xff] %v4294_v1  ;;  %v4297_v17 = vld [vmem:[%s3659_s30 + $0xa8] sm:$0xff] }
  0x72   : > { %3256 = vrot.lane.b32.xlu0 %v3255_v21, %s3595_s5  ;;  %v3275_v21 = vpack.i.bf16 %v4242_v31, %v3983_v43  ;;  %1841 = vmatpush.msrb.mxu3 %v1358_v0  ;;  %v313_v28 = vld [vmem:[%s3659_s30 + $0x1a8] sm:$0x3]  ;;  %v3280_v0 = vpack.i.bf16 %v4297_v17, %v4027_v8  ;;  %v479_v36 = vrot.slane %v4297_v17, 2 }
  0x73   : > { %2776 = vmatmul.msk.f32.gmra.mxu3 %vm1158_vm2, %v4236_v22  ;;  %v1355_v22 = vld [vmem:[%s5633_s1 + $0x10] sm:$0xff]  ;;  %2755 = vmatmul.msk.f32.gmra.mxu2 %vm1158_vm2, %v4242_v31  ;;  %v4300_v12 = vsel %vm443_vm1, %v475_v62, %v477_v49  ;;  %v1410_v62 = vld [vmem:[%s5633_s1 + $0x1c8] sm:$0xff]  ;;  %v4322_v49 = vsel %vm362_vm0, %v434_v33, %v436_v57  ;;  %v480_v31 = vrot.slane %v4313_v2, 2  ;;  %v398_v57 = vrot.slane %v4297_v17, 1 }
  0x74   : > { %3266 = vrot.lane.b32.xlu2 %v3265_v48, %s3596_s6  ;;  %v1353_v48 = vld [vmem:[%s5633_s1] sm:$0xff]  ;;  %1503 = vmatpush.msra.mxu0 %v1355_v22  ;;  %5774 = vst [vmem:[#allocation46_spill] sm:$0xff] %v4300_v12 }
  0x75   : > { %3052 = vmatpush.msra.mxu1 %v1355_v22  ;;  %1842 = vmatpush.msrb.mxu3 %v1356_v6  ;;  %v4319_v22 = vsel %vm362_vm0, %v394_v60, %v396_v23  ;;  %v580_v6 = vrot.slane %v313_v28, 2  ;;  %v1424_v60 = vld [vmem:[%s5633_s1 + $0x238] sm:$0xff]  ;;  %v438_v23 = vrot.slane %v4027_v8, 1  ;;  %v3295_v8 = vpack.i.bf16 %v4313_v2, %v4030_v40 }
  0x76   : > { %v4285_v43 = vpop.permute.xlu2 %3111  ;;  %1504 = vmatpush.msra.mxu0 %v1353_v48  ;;  %5775 = vst [vmem:[#allocation47_spill] sm:$0xff] %v4319_v22  ;;  %1944 = vmatpush.msrb.mxu2 %v1410_v62  ;;  %v3285_v33 = vpack.i.bf16 %v4319_v22, %v4322_v49  ;;  %v4352_v62 = vsel %vm443_vm1, %v479_v36, %v480_v31 }
  0x77   : > { %3053 = vmatpush.msra.mxu1 %v1353_v48  ;;  %1843 = vmatpush.msrb.mxu3 %v1354_v58  ;;  %v399_v58 = vrot.slane %v4313_v2, 1  ;;  %v439_v48 = vrot.slane %v4030_v40, 1  ;;  %5777 = vst [vmem:[#allocation49_spill] sm:$0xff] %v4352_v62  ;;  %v1408_v40 = vld [vmem:[%s5633_s1 + $0x1b8] sm:$0xff] }
  0x78   : > { %3276 = vrot.lane.b32.xlu1 %v3275_v21, %s3597_s7  ;;  %v1415_v21 = vld [vmem:[%s5633_s1 + $0x1f0] sm:$0xff]  ;;  %2066 = vmatpush.msrb.mxu0 %v1424_v60 }
  0x79   : > { %1602 = vmatpush.msrb.mxu1 %v1415_v21  ;;  %3058 = vmatpush.msra.mxu3 %v1424_v60  ;;  %v1413_v21 = vld [vmem:[%s5633_s1 + $0x1e0] sm:$0xff]  ;;  %v4358_v60 = vsel %vm362_vm0, %v398_v57, %v399_v58  ;;  %v283_v57 = vld [vmem:[%s3659_s30 + $0xb8] sm:$0x3] }
  0x7a   : > { %3271 = vrot.lane.b32.xlu0 %v3270_v61, %s3595_s5  ;;  %v3290_v61 = vpack.i.bf16 %v4300_v12, %v4022_v46  ;;  %5778 = vst [vmem:[#allocation50_spill] sm:$0xff] %v4358_v60  ;;  %1945 = vmatpush.msrb.mxu2 %v1408_v40 }
  0x7b   : > { %2777 = vmatmul.msk.f32.gmra.mxu3 %vm1158_vm2, %v4294_v1  ;;  %2756 = vmatmul.msk.f32.gmra.mxu2 %vm1158_vm2, %v4300_v12 }
  0x7c   : > { %3281 = vrot.lane.b32.xlu2 %v3280_v0, %s3596_s6  ;;  %v4346_v0 = vsel %vm443_vm1, %v578_v47, %v580_v6  ;;  %1603 = vmatpush.msrb.mxu1 %v1413_v21  ;;  %v4361_v47 = vsel %vm362_vm0, %v438_v23, %v439_v48  ;;  %v441_v6 = vrot.slane %v4069_v45, 1  ;;  %v1411_v23 = vld [vmem:[%s5633_s1 + $0x1d0] sm:$0xff]  ;;  %v3310_v21 = vpack.i.bf16 %v3662_v4, %v4121_v51 }
  0x7d   : > { %5776 = vst [vmem:[#allocation48_spill] sm:$0xff] %v4346_v0  ;;  %v3300_v36 = vpack.i.bf16 %v4358_v60, %v4361_v47  ;;  %v482_v45 = vrot.slane %v283_v57, 2 }
  0x7e   : > { %v4340_v28 = vpop.permute.xlu2 %3121  ;;  %5779 = vst [vmem:[#allocation51_spill] sm:$0xff] %v4361_v47  ;;  %1604 = vmatpush.msrb.mxu1 %v1411_v23  ;;  %v4387_v40 = vsel %vm362_vm0, %v439_v48, %v441_v6  ;;  %v401_v23 = vrot.slane %v283_v57, 1  ;;  %v3114_v57 = vunpack.i.h.bf16 %v4285_v43 }
  0x7f   : > { %5780 = vst [vmem:[#allocation52_spill] sm:$0xff] %v4387_v40  ;;  %v3315_v51 = vpack.i.bf16 %v3807_v24, %v4387_v40  ;;  %v3325_v24 = vpack.i.bf16 %v3881_v9, %v4124_v27 }
  0x80   : > { %3291 = vrot.lane.b32.xlu1 %v3290_v61, %s3597_s7  ;;  %v3305_v61 = vpack.i.bf16 %v4352_v62, %v4066_v32  ;;  %v4413_v47 = vsel %vm362_vm0, %v399_v58, %v401_v23 }
  0x81   : > { %5782 = vst [vmem:[#allocation54_spill] sm:$0xff] %v4413_v47 }
  0x82   : > { %3286 = vrot.lane.b32.xlu0 %v3285_v33, %s3595_s5 }
  0x83   : > { %2778 = vmatmul.msk.f32.gmra.mxu3 %vm1158_vm2, %v4346_v0  ;;  %2757 = vmatmul.msk.f32.gmra.mxu2 %vm1158_vm2, %v4352_v62  ;;  %v3320_v0 = vpack.i.bf16 %v3767_v59, %v4118_v52 }
  0x84   : > { %3296 = vrot.lane.b32.xlu2 %v3295_v8, %s3596_s6 }
  0x86   : > { %v4374_v33 = vpop.permute.xlu2 %3131 }
  0x88   : > { %3306 = vrot.lane.b32.xlu1 %v3305_v61, %s3597_s7  ;;  %v1406_v61 = vld [vmem:[%s5633_s1 + $0x1a8] sm:$0xff] }
  0x89   : > { %1946 = vmatpush.msrb.mxu2 %v1406_v61 }
  0x8a   : > { %3301 = vrot.lane.b32.xlu0 %v3300_v36, %s3595_s5  ;;  %v3102_v8 = vpop.permute.xlu1 %3101  ;;  %v4398_v36 = vsel %vm443_vm1, %v480_v31, %v482_v45 }
  0x8b   : > { %5781 = vst [vmem:[#allocation53_spill] sm:$0xff] %v4398_v36  ;;  %2758 = vmatmul.msk.f32.gmra.mxu2 %vm1158_vm2, %v4398_v36  ;;  %v3103_v59 = vunpack.i.l.bf16 %v3102_v8 }
  0x8c   : > { %v3092_v1 = vpop.permute.xlu0 %3091  ;;  %3311 = vrot.lane.b32.xlu2 %v3310_v21, %s3596_s6  ;;  %v1409_v21 = vld [vmem:[%s5633_s1 + $0x1c0] sm:$0xff] }
  0x8d   : > { %v3093_v6 = vunpack.i.l.bf16 %v3092_v1  ;;  %1605 = vmatpush.msrb.mxu1 %v1409_v21  ;;  %v3335_v21 = vpack.i.bf16 %v3757_v56, %v4398_v36  ;;  %v3104_v56 = vunpack.i.h.bf16 %v3102_v8  ;;  %v3094_v23 = vunpack.i.h.bf16 %v3092_v1 }
  0x8e   : > { %v4400_v48 = vpop.permute.xlu2 %3146  ;;  %v3123_v1 = vunpack.i.l.bf16 %v4340_v28 }
  0x8f   : > { %v1159_v27 = vsel %vm1158_vm2, %v3671_v10, %v3093_v6  ;;  %v3340_v6 = vpack.i.bf16 %v3916_v14, %v3665_v5 }
  0x90   : > { %3321 = vrot.lane.b32.xlu1 %v3320_v0, %s3597_s7  ;;  %v3113_v0 = vunpack.i.l.bf16 %v4285_v43  ;;  %v1404_v43 = vld [vmem:[%s5633_s1 + $0x198] sm:$0xff] }
  0x91   : > { %1947 = vmatpush.msrb.mxu2 %v1404_v43 }
  0x92   : > { %3316 = vrot.lane.b32.xlu0 %v3315_v51, %s3595_s5  ;;  %v3107_v31 = vpop.permute.xlu1 %3106  ;;  %v1175_v51 = vsel %vm1158_vm2, %v3662_v4, %v3103_v59  ;;  %v3330_v4 = vpack.i.bf16 %v3819_v29, %v4413_v47  ;;  %v3124_v29 = vunpack.i.h.bf16 %v4340_v28  ;;  %v1422_v28 = vld [vmem:[%s5633_s1 + $0x228] sm:$0xff] }
  0x93   : > { %v3109_v45 = vunpack.i.h.bf16 %v3107_v31  ;;  %v3108_v61 = vunpack.i.l.bf16 %v3107_v31  ;;  %2759 = vmatmul.msk.f32.gmra.mxu2 %vm1158_vm2, %v3719_v37  ;;  %2067 = vmatpush.msrb.mxu0 %v1422_v28 }
  0x94   : > { %v4416_v52 = vpop.permute.xlu0 %3096  ;;  %3326 = vrot.lane.b32.xlu2 %v3325_v24, %s3596_s6  ;;  %v1160_v24 = vsel %vm1158_vm2, %v3674_v11, %v3094_v23  ;;  %v1402_v11 = vld [vmem:[%s5633_s1 + $0x188] sm:$0xff]  ;;  %3059 = vmatpush.msra.mxu3 %v1422_v28 }
  0x95   : > { %v1192_v32 = vsel %vm1191_vm3, %v1159_v27, %v3109_v45  ;;  %v1208_v31 = vsel %vm1191_vm3, %v1175_v51, %v3108_v61  ;;  %v3350_v51 = vpack.i.bf16 %v3848_v42, %v3845_v41  ;;  %1948 = vmatpush.msrb.mxu2 %v1402_v11  ;;  %v3098_v41 = vunpack.i.l.bf16 %v4416_v52 }
  0x96   : > { %v1225_v58 = vsel %vm1224_vm4, %v1192_v32, %v3114_v57  ;;  %v4432_v10 = vsel %vm1224_vm4, %v1208_v31, %v3113_v0  ;;  %v4437_v59 = vpop.permute.xlu2 %3161  ;;  %v1407_v32 = vld [vmem:[%s5633_s1 + $0x1b0] sm:$0xff]  ;;  %v1176_v57 = vsel %vm1158_vm2, %v3665_v5, %v3104_v56  ;;  %v3345_v31 = vpack.i.bf16 %v3839_v34, %v3786_v3  ;;  %v1405_v56 = vld [vmem:[%s5633_s1 + $0x1a0] sm:$0xff] }
  0x97   : > { %1505 = vmatmul.f32.vlgmr.msra.gmra.mxu0 %v1225_v58  ;;  %1553 = vmatmul.f32.vlgmr.msra.gmra.mxu1 %v4432_v10  ;;  %v1209_v5 = vsel %vm1191_vm3, %v1176_v57, %v3123_v1  ;;  %v1161_v1 = vsel %vm1158_vm2, %v3688_v20, %v3098_v41  ;;  %v3099_v20 = vunpack.i.h.bf16 %v4416_v52  ;;  %v1400_v52 = vld [vmem:[%s5633_s1 + $0x178] sm:$0xff]  ;;  %v3149_v41 = vunpack.i.h.bf16 %v4400_v48 }
  0x98   : > { %1844 = vmatmul.f32.vlgmr.msrb.gmra.mxu3 %v1225_v58  ;;  %3336 = vrot.lane.b32.xlu1 %v3335_v21, %s3597_s7  ;;  %v1193_v21 = vsel %vm1191_vm3, %v1160_v24, %v3124_v29 }
  0x99   : > { %1606 = vmatpush.msrb.mxu1 %v1407_v32  ;;  %v3355_v32 = vpack.i.bf16 %v3992_v16, %v3960_v26  ;;  %1949 = vmatpush.msrb.mxu2 %v1400_v52 }
  0x9a   : > { %3331 = vrot.lane.b32.xlu0 %v3330_v4, %s3595_s5  ;;  %v3127_v8 = vpop.permute.xlu1 %3126  ;;  %v3133_v4 = vunpack.i.l.bf16 %v4374_v33 }
  0x9b   : > { %v3128_v61 = vunpack.i.l.bf16 %v3127_v8  ;;  %1607 = vmatpush.msrb.mxu1 %v1405_v56  ;;  %2760 = vmatmul.msk.f32.gmra.mxu2 %vm1158_vm2, %v3754_v55 }
  0x9c   : > { %v3117_v45 = vpop.permute.xlu0 %3116  ;;  %3341 = vrot.lane.b32.xlu2 %v3340_v6, %s3596_s6  ;;  %v3134_v6 = vunpack.i.h.bf16 %v4374_v33 }
  0x9d   : > { %v3119_v0 = vunpack.i.h.bf16 %v3117_v45  ;;  %v3118_v27 = vunpack.i.l.bf16 %v3117_v45  ;;  %v1177_v23 = vsel %vm1158_vm2, %v3722_v38, %v3128_v61  ;;  %v3129_v45 = vunpack.i.h.bf16 %v3127_v8 }
  0x9e   : > { %v4472_v58 = vpop.permute.xlu2 %3176  ;;  %v1210_v57 = vsel %vm1191_vm3, %v1177_v23, %v3133_v4  ;;  %v1194_v33 = vsel %vm1191_vm3, %v1161_v1, %v3134_v6  ;;  %v3540_v4 = vld [vmem:[%s3659_s30 + $0x20] sm:$0xff]  ;;  %v3380_v1 = vpack.i.bf16 %v4012_v44, %v4009_v35  ;;  %v3541_v44 = vld [vmem:[%s3659_s30 + $0x30] sm:$0xff] }
  0x9f   : > { %v1226_v42 = vsel %vm1224_vm4, %v1193_v21, %v3119_v0  ;;  %v4470_v43 = vsel %vm1224_vm4, %v1209_v5, %v3118_v27  ;;  %v3365_v0 = vpack.i.bf16 %v3933_v50, %v3930_v30  ;;  %v3360_v27 = vpack.i.bf16 %v3924_v15, %v3889_v13  ;;  %v1403_v30 = vld [vmem:[%s5633_s1 + $0x190] sm:$0xff]  ;;  %v1401_v35 = vld [vmem:[%s5633_s1 + $0x180] sm:$0xff] }
  0xa0   : > { %1508 = vmatmul.f32.gmra.mxu0 %v1226_v42  ;;  %1556 = vmatmul.f32.gmra.mxu1 %v4470_v43  ;;  %v1178_v50 = vsel %vm1158_vm2, %v3725_v39, %v3129_v45  ;;  %v3370_v5 = vpack.i.bf16 %v4084_v63, %v4039_v18  ;;  %v1162_v39 = vsel %vm1158_vm2, %v3540_v4, %v3099_v20 }
  0xa1   : > { %1847 = vmatmul.f32.gmra.mxu3 %v1226_v42  ;;  %3351 = vrot.lane.b32.xlu1 %v3350_v51, %s3597_s7  ;;  %v3148_v42 = vunpack.i.l.bf16 %v4400_v48  ;;  %v5783_v48 = vld [vmem:[#allocation29_spill] sm:$0xff]  ;;  %v3395_v4 = vpack.i.bf16 %v4193_v54, %v4178_v7 }
  0xa2   : > { %3346 = vrot.lane.b32.xlu0 %v3345_v31, %s3595_s5  ;;  %v3142_v29 = vpop.permute.xlu1 %3141  ;;  %1608 = vmatpush.msrb.mxu1 %v1403_v30  ;;  %v3163_v30 = vunpack.i.l.bf16 %v4437_v59 }
  0xa3   : > { %v3144_v11 = vunpack.i.h.bf16 %v3142_v29  ;;  %v3143_v21 = vunpack.i.l.bf16 %v3142_v29  ;;  %2761 = vmatmul.msk.f32.gmra.mxu2 %vm1158_vm2, %v3810_v25 }
  0xa4   : > { %v3137_v24 = vpop.permute.xlu0 %3136  ;;  %3356 = vrot.lane.b32.xlu2 %v3355_v32, %s3596_s6  ;;  %1609 = vmatpush.msrb.mxu1 %v1401_v35  ;;  %v1396_v35 = vld [vmem:[%s5633_s1 + $0x158] sm:$0xff] }
  0xa5   : > { %v3139_v38 = vunpack.i.h.bf16 %v3137_v24  ;;  %v3138_v61 = vunpack.i.l.bf16 %v3137_v24  ;;  %v1195_v23 = vsel %vm1191_vm3, %v1162_v39, %v3144_v11  ;;  %v1211_v32 = vsel %vm1191_vm3, %v1178_v50, %v3143_v21  ;;  %v5786_v39 = vld [vmem:[#allocation32_spill] sm:$0xff] }
  0xa6   : > { %v4502_v8 = vpop.permute.xlu2 %3191  ;;  %v3375_v24 = vpack.i.bf16 %v5783_v48, %v3968_v19  ;;  %v4532_v45 = vsel %vm1224_vm4, %v1211_v32, %v3148_v42  ;;  %v3164_v21 = vunpack.i.h.bf16 %v4437_v59 }
  0xa7   : > { %v1227_v51 = vsel %vm1224_vm4, %v1194_v33, %v3139_v38  ;;  %v4500_v28 = vsel %vm1224_vm4, %v1210_v57, %v3138_v61  ;;  %v1228_v57 = vsel %vm1224_vm4, %v1195_v23, %v3149_v41 }
  0xa8   : > { %1511 = vmatmul.f32.gmra.mxu0 %v1227_v51  ;;  %1559 = vmatmul.f32.gmra.mxu1 %v4500_v28 }
  0xa9   : > { %1850 = vmatmul.f32.gmra.mxu3 %v1227_v51  ;;  %3366 = vrot.lane.b32.xlu1 %v3365_v0, %s3597_s7  ;;  %v1398_v51 = vld [vmem:[%s5633_s1 + $0x168] sm:$0xff] }
  0xaa   : > { %v3157_v31 = vpop.permute.xlu1 %3156  ;;  %3361 = vrot.lane.b32.xlu0 %v3360_v27, %s3595_s5  ;;  %v5784_v27 = vld [vmem:[#allocation18_spill] sm:$0xff]  ;;  %1950 = vmatpush.msrb.mxu2 %v1398_v51  ;;  %v3179_v51 = vunpack.i.h.bf16 %v4472_v58 }
  0xab   : > { %v3159_v61 = vunpack.i.h.bf16 %v3157_v31  ;;  %v3158_v0 = vunpack.i.l.bf16 %v3157_v31  ;;  %v5785_v31 = vld [vmem:[#allocation16_spill] sm:$0xff] }
  0xac   : > { %v3152_v56 = vpop.permute.xlu0 %3151  ;;  %3371 = vrot.lane.b32.xlu2 %v3370_v5, %s3596_s6  ;;  %2762 = vmatmul.msk.f32.gmra.mxu2 %vm1158_vm2, %v5785_v31 }
  0xad   : > { %v3154_v6 = vunpack.i.h.bf16 %v3152_v56  ;;  %v3153_v29 = vunpack.i.l.bf16 %v3152_v56  ;;  %v3390_v56 = vpack.i.bf16 %v4183_v53, %v5786_v39  ;;  %1951 = vmatpush.msrb.mxu2 %v1396_v35 }
  0xae   : > { %v4534_v38 = vpop.permute.xlu2 %3206 }
  0xaf   : > { %v1163_v33 = vsel %vm1158_vm2, %v3541_v44, %v3154_v6  ;;  %v1179_v20 = vsel %vm1158_vm2, %v5784_v27, %v3153_v29  ;;  %v5788_v44 = vld [vmem:[#allocation36_spill] sm:$0xff] }
  0xb0   : > { %1514 = vmatmul.f32.gmra.mxu0 %v1228_v57  ;;  %1562 = vmatmul.f32.gmra.mxu1 %v4532_v45  ;;  %v1196_v52 = vsel %vm1191_vm3, %v1163_v33, %v3159_v61  ;;  %v1212_v5 = vsel %vm1191_vm3, %v1179_v20, %v3158_v0  ;;  %v5787_v61 = vld [vmem:[#allocation17_spill] sm:$0xff]  ;;  %v5789_v33 = vld [vmem:[#allocation39_spill] sm:$0xff] }
  0xb1   : > { %1853 = vmatmul.f32.gmra.mxu3 %v1228_v57  ;;  %3381 = vrot.lane.b32.xlu1 %v3380_v1, %s3597_s7  ;;  %v1229_v59 = vsel %vm1224_vm4, %v1196_v52, %v3164_v21  ;;  %v4561_v23 = vsel %vm1224_vm4, %v1212_v5, %v3163_v30  ;;  %v1399_v1 = vld [vmem:[%s5633_s1 + $0x170] sm:$0xff]  ;;  %v3385_v27 = vpack.i.bf16 %v5789_v33, %v5788_v44  ;;  %v4583_v21 = vpop.f32.mrf.mxu3 }
  0xb2   : > { %v3172_v11 = vpop.permute.xlu1 %3171  ;;  %3376 = vrot.lane.b32.xlu0 %v3375_v24, %s3595_s5  ;;  %v3542_v24 = vld [vmem:[%s3659_s30 + $0x38] sm:$0xff]  ;;  %1610 = vmatpush.msrb.mxu1 %v1399_v1  ;;  %5790 = vst [vmem:[#allocation29_spill] sm:$0xff] %v4583_v21  ;;  %v5791_v5 = vld [vmem:[#allocation20_spill] sm:$0xff]  ;;  %v3543_v1 = vld [vmem:[%s3659_s30 + $0x48] sm:$0xff] }
  0xb3   : > { %v3174_v32 = vunpack.i.h.bf16 %v3172_v11  ;;  %v3173_v6 = vunpack.i.l.bf16 %v3172_v11  ;;  %v3178_v11 = vunpack.i.l.bf16 %v4472_v58  ;;  %v1420_v58 = vld [vmem:[%s5633_s1 + $0x218] sm:$0xff] }
  0xb4   : > { %v3167_v50 = vpop.permute.xlu0 %3166  ;;  %3386 = vrot.lane.b32.xlu2 %v3385_v27, %s3596_s6  ;;  %2763 = vmatmul.msk.f32.gmra.mxu2 %vm1158_vm2, %v5791_v5  ;;  %v1394_v27 = vld [vmem:[%s5633_s1 + $0x148] sm:$0xff] }
  0xb5   : > { %v3169_v41 = vunpack.i.h.bf16 %v3167_v50  ;;  %v3168_v42 = vunpack.i.l.bf16 %v3167_v50  ;;  %2068 = vmatpush.msrb.mxu0 %v1420_v58  ;;  %3060 = vmatpush.msra.mxu3 %v1420_v58  ;;  %v5793_v58 = vld [vmem:[#allocation23_spill] sm:$0xff] }
  0xb6   : > { %v4564_v29 = vpop.permute.xlu2 %3221  ;;  %1952 = vmatpush.msrb.mxu2 %v1394_v27 }
  0xb7   : > { %v1164_v57 = vsel %vm1158_vm2, %v3542_v24, %v3169_v41  ;;  %v1180_v0 = vsel %vm1158_vm2, %v5787_v61, %v3168_v42 }
  0xb8   : > { %1517 = vmatmul.f32.gmra.mxu0 %v1229_v59  ;;  %1565 = vmatmul.f32.gmra.mxu1 %v4561_v23  ;;  %v1197_v50 = vsel %vm1191_vm3, %v1164_v57, %v3174_v32  ;;  %v1213_v52 = vsel %vm1191_vm3, %v1180_v0, %v3173_v6  ;;  %v1397_v6 = vld [vmem:[%s5633_s1 + $0x160] sm:$0xff]  ;;  %v4603_v57 = vld [vmem:[%s3659_s30 + $0x108] sm:$0xff] }
  0xb9   : > { %1856 = vmatmul.f32.gmra.mxu3 %v1229_v59  ;;  %3396 = vrot.lane.b32.xlu1 %v3395_v4, %s3597_s7  ;;  %v1230_v4 = vsel %vm1224_vm4, %v1197_v50, %v3179_v51  ;;  %v5792_v0 = vld [vmem:[#allocation42_spill] sm:$0xff]  ;;  %v3193_v50 = vunpack.i.l.bf16 %v4502_v8 }
  0xba   : > { %v3187_v20 = vpop.permute.xlu1 %3186  ;;  %3391 = vrot.lane.b32.xlu0 %v3390_v56, %s3595_s5  ;;  %v4594_v56 = vsel %vm1224_vm4, %v1213_v52, %v3178_v11  ;;  %1611 = vmatpush.msrb.mxu1 %v1397_v6  ;;  %v3405_v35 = vpack.i.bf16 %v4300_v12, %v5792_v0  ;;  %v3410_v11 = vpack.i.bf16 %v4313_v2, %v4297_v17 }
  0xbb   : > { %v3189_v59 = vunpack.i.h.bf16 %v3187_v20  ;;  %v3188_v32 = vunpack.i.l.bf16 %v3187_v20 }
  0xbc   : > { %v3182_v30 = vpop.permute.xlu0 %3181  ;;  %2764 = vmatmul.msk.f32.gmra.mxu2 %vm1158_vm2, %v5793_v58 }
  0xbd   : > { %v3184_v41 = vunpack.i.h.bf16 %v3182_v30  ;;  %v3183_v42 = vunpack.i.l.bf16 %v3182_v30  ;;  %v3194_v30 = vunpack.i.h.bf16 %v4502_v8 }
  0xbe   : > { %v4612_v51 = vpop.permute.xlu2 %3236 }
  0xbf   : > { %v1165_v24 = vsel %vm1158_vm2, %v3543_v1, %v3184_v41  ;;  %v1181_v61 = vsel %vm1158_vm2, %v4603_v57, %v3183_v42  ;;  %v4624_v1 = vpop.f32.mrf.mxu3 }
  0xc0   : > { %1520 = vmatmul.f32.gmra.mxu0 %v1230_v4  ;;  %1568 = vmatmul.f32.gmra.mxu1 %v4594_v56  ;;  %v1198_v41 = vsel %vm1191_vm3, %v1165_v24, %v3189_v59  ;;  %v1214_v42 = vsel %vm1191_vm3, %v1181_v61, %v3188_v32  ;;  %5794 = vst [vmem:[#allocation18_spill] sm:$0xff] %v4624_v1  ;;  %v1395_v59 = vld [vmem:[%s5633_s1 + $0x150] sm:$0xff]  ;;  %v1392_v1 = vld [vmem:[%s5633_s1 + $0x138] sm:$0xff] }
  0xc1   : > { %1859 = vmatmul.f32.gmra.mxu3 %v1230_v4  ;;  %3411 = vrot.lane.b32.xlu1 %v3410_v11, %s3597_s7  ;;  %v1231_v8 = vsel %vm1224_vm4, %v1198_v41, %v3194_v30  ;;  %v3545_v32 = vld [vmem:[%s3659_s30 + $0x50] sm:$0xff]  ;;  %v5795_v30 = vld [vmem:[#allocation43_spill] sm:$0xff]  ;;  %v3208_v41 = vunpack.i.l.bf16 %v4534_v38 }
  0xc2   : > { %v3202_v20 = vpop.permute.xlu1 %3201  ;;  %3406 = vrot.lane.b32.xlu0 %v3405_v35, %s3595_s5  ;;  %v4628_v35 = vsel %vm1224_vm4, %v1214_v42, %v3193_v50  ;;  %v4637_v61 = vld [vmem:[%s3659_s30 + $0x110] sm:$0xff]  ;;  %1612 = vmatpush.msrb.mxu1 %v1395_v59 }
  0xc3   : > { %v3204_v27 = vunpack.i.h.bf16 %v3202_v20  ;;  %v3203_v21 = vunpack.i.l.bf16 %v3202_v20  ;;  %v3400_v20 = vpack.i.bf16 %v4319_v22, %v5795_v30  ;;  %1953 = vmatpush.msrb.mxu2 %v1392_v1  ;;  %v3547_v1 = vld [vmem:[%s3659_s30 + $0x60] sm:$0xff]  ;;  %v3224_v22 = vunpack.i.h.bf16 %v4564_v29 }
  0xc4   : > { %v3197_v52 = vpop.permute.xlu0 %3196 }
  0xc5   : > { %v3199_v4 = vunpack.i.h.bf16 %v3197_v52  ;;  %v3198_v6 = vunpack.i.l.bf16 %v3197_v52  ;;  %v3209_v52 = vunpack.i.h.bf16 %v4534_v38  ;;  %3401 = vrot.lane.b32.xlu2 %v3400_v20, %s3596_s6 }
  0xc7   : > { %v1166_v24 = vsel %vm1158_vm2, %v3545_v32, %v3199_v4  ;;  %v1182_v11 = vsel %vm1158_vm2, %v4637_v61, %v3198_v6  ;;  %v4648_v32 = vpop.permute.xlu2 %3251 }
  0xc8   : > { %1523 = vmatmul.f32.gmra.mxu0 %v1231_v8  ;;  %1571 = vmatmul.f32.gmra.mxu1 %v4628_v35  ;;  %v1215_v4 = vsel %vm1191_vm3, %v1182_v11, %v3203_v21  ;;  %v1393_v11 = vld [vmem:[%s5633_s1 + $0x140] sm:$0xff] }
  0xc9   : > { %1862 = vmatmul.f32.gmra.mxu3 %v1231_v8  ;;  %v1199_v8 = vsel %vm1191_vm3, %v1166_v24, %v3204_v27  ;;  %v4655_v20 = vsel %vm1224_vm4, %v1215_v4, %v3208_v41  ;;  %v4657_v27 = vpop.f32.mrf.mxu3  ;;  %1613 = vmatpush.msrb.mxu1 %v1393_v11  ;;  %v3549_v4 = vld [vmem:[%s3659_s30 + $0xc0] sm:$0xff] }
  0xca   : > { %v3217_v50 = vpop.permute.xlu1 %3216  ;;  %v1232_v38 = vsel %vm1224_vm4, %v1199_v8, %v3209_v52  ;;  %5796 = vst [vmem:[#allocation32_spill] sm:$0xff] %v4657_v27  ;;  %v3550_v27 = vld [vmem:[%s3659_s30 + $0xc8] sm:$0xff] }
  0xcb   : > { %v3219_v21 = vunpack.i.h.bf16 %v3217_v50  ;;  %v3218_v24 = vunpack.i.l.bf16 %v3217_v50  ;;  %v3420_v50 = vpack.i.bf16 %v4398_v36, %v4352_v62  ;;  %v3425_v12 = vpack.i.bf16 %v3550_v27, %v3549_v4  ;;  %v1390_v27 = vld [vmem:[%s5633_s1 + $0x128] sm:$0xff] }
  0xcc   : > { %v3212_v42 = vpop.permute.xlu0 %3211  ;;  %1954 = vmatpush.msrb.mxu2 %v1390_v27  ;;  %v3238_v27 = vunpack.i.l.bf16 %v4612_v51 }
  0xcd   : > { %v3214_v6 = vunpack.i.h.bf16 %v3212_v42  ;;  %v3213_v59 = vunpack.i.l.bf16 %v3212_v42  ;;  %v4666_v42 = vld [vmem:[%s3659_s30 + $0x120] sm:$0xff]  ;;  %3421 = vrot.lane.b32.xlu0 %v3420_v50, %s3595_s5  ;;  %3426 = vrot.lane.b32.xlu1 %v3425_v12, %s3597_s7  ;;  %v1391_v12 = vld [vmem:[%s5633_s1 + $0x130] sm:$0xff] }
  0xce   : > { %1614 = vmatpush.msrb.mxu1 %v1391_v12  ;;  %v4709_v12 = vpop.f32.mrf.mxu2 }
  0xcf   : > { %v1167_v52 = vsel %vm1158_vm2, %v3547_v1, %v3214_v6  ;;  %v1183_v41 = vsel %vm1158_vm2, %v4666_v42, %v3213_v59  ;;  %v4683_v4 = vpop.permute.xlu2 %3266  ;;  %5798 = vst [vmem:[#allocation36_spill] sm:$0xff] %v4709_v12  ;;  %v3556_v12 = vld [vmem:[%s3659_s30 + $0xe0] sm:$0xff] }
  0xd0   : > { %1526 = vmatmul.f32.gmra.mxu0 %v1232_v38  ;;  %1574 = vmatmul.f32.gmra.mxu1 %v4655_v20  ;;  %v1200_v1 = vsel %vm1191_vm3, %v1167_v52, %v3219_v21  ;;  %v1216_v59 = vsel %vm1191_vm3, %v1183_v41, %v3218_v24  ;;  %v3551_v24 = vld [vmem:[%s3659_s30 + $0x68] sm:$0xff] }
  0xd1   : > { %1865 = vmatmul.f32.gmra.mxu3 %v1232_v38  ;;  %v3223_v38 = vunpack.i.l.bf16 %v4564_v29  ;;  %v1233_v29 = vsel %vm1224_vm4, %v1200_v1, %v3224_v22 }
  0xd2   : > { %v3232_v8 = vpop.permute.xlu1 %3231 }
  0xd3   : > { %v4687_v50 = vsel %vm1224_vm4, %v1216_v59, %v3223_v38  ;;  %v3234_v21 = vunpack.i.h.bf16 %v3232_v8  ;;  %v3233_v52 = vunpack.i.l.bf16 %v3232_v8  ;;  %v3415_v8 = vpack.i.bf16 %v4413_v47, %v4358_v60  ;;  %v4702_v38 = vpop.f32.mrf.mxu3 }
  0xd4   : > { %v3227_v6 = vpop.permute.xlu0 %3226  ;;  %5797 = vst [vmem:[#allocation17_spill] sm:$0xff] %v4702_v38  ;;  %v3239_v59 = vunpack.i.h.bf16 %v4612_v51  ;;  %v1388_v38 = vld [vmem:[%s5633_s1 + $0x118] sm:$0xff]  ;;  %v1418_v51 = vld [vmem:[%s5633_s1 + $0x208] sm:$0xff]  ;;  %v3254_v60 = vunpack.i.h.bf16 %v4648_v32 }
  0xd5   : > { %v3229_v11 = vunpack.i.h.bf16 %v3227_v6  ;;  %v3228_v36 = vunpack.i.l.bf16 %v3227_v6  ;;  %v4696_v6 = vld [vmem:[%s3659_s30 + $0x128] sm:$0xff]  ;;  %3416 = vrot.lane.b32.xlu2 %v3415_v8, %s3596_s6  ;;  %1955 = vmatpush.msrb.mxu2 %v1388_v38  ;;  %v1389_v38 = vld [vmem:[%s5633_s1 + $0x120] sm:$0xff] }
  0xd6   : > { %2069 = vmatpush.msrb.mxu0 %v1418_v51  ;;  %3061 = vmatpush.msra.mxu3 %v1418_v51  ;;  %v3555_v51 = vld [vmem:[%s3659_s30 + $0xd8] sm:$0xff] }
  0xd7   : > { %v1168_v41 = vsel %vm1158_vm2, %v3551_v24, %v3229_v11  ;;  %v1184_v22 = vsel %vm1158_vm2, %v4696_v6, %v3228_v36  ;;  %v4722_v8 = vpop.permute.xlu2 %3281  ;;  %1615 = vmatpush.msrb.mxu1 %v1389_v38  ;;  %v3440_v47 = vpack.i.bf16 %v3556_v12, %v3555_v51  ;;  %v4746_v12 = vpop.f32.mrf.mxu2 }
  0xd8   : > { %1529 = vmatmul.f32.gmra.mxu0 %v1233_v29  ;;  %1577 = vmatmul.f32.gmra.mxu1 %v4687_v50  ;;  %v1201_v11 = vsel %vm1191_vm3, %v1168_v41, %v3234_v21  ;;  %v1217_v24 = vsel %vm1191_vm3, %v1184_v22, %v3233_v52  ;;  %5801 = vst [vmem:[#allocation43_spill] sm:$0xff] %v4746_v12 }
  0xd9   : > { %1868 = vmatmul.f32.gmra.mxu3 %v1233_v29  ;;  %v1234_v21 = vsel %vm1224_vm4, %v1201_v11, %v3239_v59  ;;  %v4719_v52 = vsel %vm1224_vm4, %v1217_v24, %v3238_v27  ;;  %v4730_v27 = vld [vmem:[%s3659_s30 + $0x138] sm:$0xff]  ;;  %3441 = vrot.lane.b32.xlu1 %v3440_v47, %s3597_s7  ;;  %v1387_v47 = vld [vmem:[%s5633_s1 + $0x110] sm:$0xff] }
  0xda   : > { %v3247_v1 = vpop.permute.xlu1 %3246  ;;  %5799 = vst [vmem:[#allocation39_spill] sm:$0xff] %v4719_v52  ;;  %1616 = vmatpush.msrb.mxu1 %v1387_v47 }
  0xdb   : > { %v3249_v41 = vunpack.i.h.bf16 %v3247_v1  ;;  %v3248_v22 = vunpack.i.l.bf16 %v3247_v1  ;;  %v3435_v1 = vpack.i.bf16 %v3754_v55, %v3719_v37 }
  0xdc   : > { %v3242_v29 = vpop.permute.xlu0 %3241 }
  0xdd   : > { %v3244_v62 = vunpack.i.h.bf16 %v3242_v29  ;;  %v3243_v36 = vunpack.i.l.bf16 %v3242_v29  ;;  %v3553_v29 = vld [vmem:[%s3659_s30 + $0x78] sm:$0xff]  ;;  %3436 = vrot.lane.b32.xlu0 %v3435_v1, %s3595_s5 }
  0xdf   : > { %v1169_v59 = vsel %vm1158_vm2, %v3553_v29, %v3244_v62  ;;  %v1185_v11 = vsel %vm1158_vm2, %v4730_v27, %v3243_v36  ;;  %v4741_v62 = vpop.f32.mrf.mxu3 }
  0xe0   : > { %1532 = vmatmul.f32.gmra.mxu0 %v1234_v21  ;;  %1580 = vmatmul.f32.gmra.mxu1 %v4719_v52  ;;  %5800 = vst [vmem:[#allocation42_spill] sm:$0xff] %v4741_v62  ;;  %v1202_v52 = vsel %vm1191_vm3, %v1169_v59, %v3249_v41  ;;  %v1218_v36 = vsel %vm1191_vm3, %v1185_v11, %v3248_v22  ;;  %v3557_v22 = vld [vmem:[%s3659_s30 + $0x80] sm:$0xff] }
  0xe1   : > { %1871 = vmatmul.f32.gmra.mxu3 %v1234_v21  ;;  %v3253_v21 = vunpack.i.l.bf16 %v4648_v32  ;;  %v1386_v32 = vld [vmem:[%s5633_s1 + $0x108] sm:$0xff]  ;;  %v1235_v1 = vsel %vm1224_vm4, %v1202_v52, %v3254_v60 }
  0xe2   : > { %v3262_v24 = vpop.permute.xlu1 %3261  ;;  %1956 = vmatpush.msrb.mxu2 %v1386_v32 }
  0xe3   : > { %v4753_v51 = vsel %vm1224_vm4, %v1218_v36, %v3253_v21  ;;  %v3264_v41 = vunpack.i.h.bf16 %v3262_v24  ;;  %v3263_v59 = vunpack.i.l.bf16 %v3262_v24  ;;  %v4766_v21 = vpop.permute.xlu2 %3296  ;;  %v3269_v24 = vunpack.i.h.bf16 %v4683_v4 }
  0xe4   : > { %v3257_v29 = vpop.permute.xlu0 %3256  ;;  %v3268_v36 = vunpack.i.l.bf16 %v4683_v4 }
  0xe5   : > { %v3259_v38 = vunpack.i.h.bf16 %v3257_v29  ;;  %v3258_v55 = vunpack.i.l.bf16 %v3257_v29  ;;  %v4762_v29 = vld [vmem:[%s3659_s30 + $0x140] sm:$0xff] }
  0xe7   : > { %v1170_v11 = vsel %vm1158_vm2, %v3557_v22, %v3259_v38  ;;  %v1186_v60 = vsel %vm1158_vm2, %v4762_v29, %v3258_v55  ;;  %v5802_v38 = vld [vmem:[#allocation4_spill] sm:$0xff]  ;;  %v4774_v55 = vpop.f32.mrf.mxu2  ;;  %v4776_v47 = vpop.f32.mrf.mxu3 }
  0xe8   : > { %1535 = vmatmul.f32.gmra.mxu0 %v1235_v1  ;;  %1583 = vmatmul.f32.gmra.mxu1 %v4753_v51  ;;  %v1203_v62 = vsel %vm1191_vm3, %v1170_v11, %v3264_v41  ;;  %5803 = vst [vmem:[#allocation4_spill] sm:$0xff] %v4774_v55 }
  0xe9   : > { %1874 = vmatmul.f32.gmra.mxu3 %v1235_v1  ;;  %v1219_v1 = vsel %vm1191_vm3, %v1186_v60, %v3263_v59  ;;  %3431 = vrot.lane.b32.xlu2 %v5802_v38, %s3596_s6  ;;  %5804 = vst [vmem:[#allocation55_spill] sm:$0xff] %v4776_v47  ;;  %v1236_v37 = vsel %vm1224_vm4, %v1203_v62, %v3269_v24  ;;  %v1385_v59 = vld [vmem:[%s5633_s1 + $0x100] sm:$0xff]  ;;  %v3284_v47 = vunpack.i.h.bf16 %v4722_v8 }
  0xea   : > { %v3277_v52 = vpop.permute.xlu1 %3276  ;;  %v4780_v4 = vsel %vm1224_vm4, %v1219_v1, %v3268_v36  ;;  %1617 = vmatpush.msrb.mxu1 %v1385_v59  ;;  %v3560_v36 = vld [vmem:[%s3659_s30 + $0xf8] sm:$0xff]  ;;  %v3561_v1 = vld [vmem:[%s3659_s30 + $0xf0] sm:$0xff] }
  0xeb   : > { %5805 = vst [vmem:[#allocation56_spill] sm:$0xff] %v4780_v4  ;;  %v3279_v41 = vunpack.i.h.bf16 %v3277_v52  ;;  %v3278_v11 = vunpack.i.l.bf16 %v3277_v52  ;;  %v3450_v52 = vpack.i.bf16 %v5785_v31, %v3810_v25  ;;  %v3455_v38 = vpack.i.bf16 %v3560_v36, %v3561_v1  ;;  %v3312_v59 = vpop.permute.xlu2 %3311 }
  0xec   : > { %v3272_v32 = vpop.permute.xlu0 %3271 }
  0xed   : > { %v3274_v22 = vunpack.i.h.bf16 %v3272_v32  ;;  %v3273_v12 = vunpack.i.l.bf16 %v3272_v32  ;;  %v4789_v32 = vld [vmem:[%s3659_s30 + $0x150] sm:$0xff]  ;;  %3451 = vrot.lane.b32.xlu0 %v3450_v52, %s3595_s5  ;;  %3456 = vrot.lane.b32.xlu1 %v3455_v38, %s3597_s7  ;;  %v3298_v38 = vunpack.i.l.bf16 %v4766_v21 }
  0xef   : > { %v1171_v60 = vsel %vm1158_vm2, %v4178_v7, %v3274_v22  ;;  %v1187_v62 = vsel %vm1158_vm2, %v4789_v32, %v3273_v12  ;;  %v4803_v25 = vpop.f32.mrf.mxu2 }
  0xf0   : > { %1538 = vmatmul.f32.gmra.mxu0 %v1236_v37  ;;  %1586 = vmatmul.f32.gmra.mxu1 %v4780_v4  ;;  %v1204_v22 = vsel %vm1191_vm3, %v1171_v60, %v3279_v41  ;;  %v1220_v12 = vsel %vm1191_vm3, %v1187_v62, %v3278_v11  ;;  %5806 = vst [vmem:[#allocation57_spill] sm:$0xff] %v4803_v25  ;;  %v4815_v11 = vld [vmem:[%s3659_s30 + $0x158] sm:$0xff]  ;;  %v3299_v62 = vunpack.i.h.bf16 %v4766_v21 }
  0xf1   : > { %1877 = vmatmul.f32.gmra.mxu3 %v1236_v37  ;;  %v3283_v37 = vunpack.i.l.bf16 %v4722_v8  ;;  %v1237_v36 = vsel %vm1224_vm4, %v1204_v22, %v3284_v47  ;;  %v4809_v8 = vpop.f32.mrf.mxu3 }
  0xf2   : > { %v3292_v24 = vpop.permute.xlu1 %3291  ;;  %5807 = vst [vmem:[#allocation58_spill] sm:$0xff] %v4809_v8 }
  0xf3   : > { %v4807_v1 = vsel %vm1224_vm4, %v1220_v12, %v3283_v37  ;;  %v3294_v52 = vunpack.i.h.bf16 %v3292_v24  ;;  %v3293_v4 = vunpack.i.l.bf16 %v3292_v24 }
  0xf4   : > { %v3287_v7 = vpop.permute.xlu0 %3286 }
  0xf5   : > { %v3289_v55 = vunpack.i.h.bf16 %v3287_v7  ;;  %v3288_v31 = vunpack.i.l.bf16 %v3287_v7 }
  0xf7   : > { %v1172_v41 = vsel %vm1158_vm2, %v4193_v54, %v3289_v55  ;;  %v1188_v60 = vsel %vm1158_vm2, %v4815_v11, %v3288_v31  ;;  %v5808_v54 = vld [vmem:[#allocation13_spill] sm:$0xff]  ;;  %v3327_v55 = vpop.permute.xlu2 %3326  ;;  %v4829_v8 = vpop.f32.mrf.mxu2 }
  0xf8   : > { %1541 = vmatmul.f32.gmra.mxu0 %v1237_v36  ;;  %1589 = vmatmul.f32.gmra.mxu1 %v4807_v1  ;;  %v1205_v24 = vsel %vm1191_vm3, %v1172_v41, %v3294_v52  ;;  %v1221_v7 = vsel %vm1191_vm3, %v1188_v60, %v3293_v4  ;;  %5809 = vst [vmem:[#allocation13_spill] sm:$0xff] %v4829_v8  ;;  %v4835_v52 = vld [vmem:[%s3659_s30 + $0x168] sm:$0xff] }
  0xf9   : > { %1880 = vmatmul.f32.gmra.mxu3 %v1237_v36  ;;  %3446 = vrot.lane.b32.xlu2 %v5808_v54, %s3596_s6  ;;  %v1238_v36 = vsel %vm1224_vm4, %v1205_v24, %v3299_v62  ;;  %v4827_v31 = vsel %vm1224_vm4, %v1221_v7, %v3298_v38  ;;  %v3465_v60 = vpack.i.bf16 %v5793_v58, %v5791_v5  ;;  %v4841_v62 = vpop.f32.mrf.mxu3  ;;  %v3313_v24 = vunpack.i.l.bf16 %v3312_v59 }
  0xfa   : > { %v3307_v47 = vpop.permute.xlu1 %3306  ;;  %5810 = vst [vmem:[#allocation59_spill] sm:$0xff] %v4841_v62  ;;  %v3329_v62 = vunpack.i.h.bf16 %v3327_v55 }
  0xfb   : > { %v3309_v21 = vunpack.i.h.bf16 %v3307_v47  ;;  %v3308_v25 = vunpack.i.l.bf16 %v3307_v47  ;;  %v3470_v47 = vpack.i.bf16 %v4637_v61, %v4603_v57  ;;  %3466 = vrot.lane.b32.xlu0 %v3465_v60, %s3595_s5  ;;  %v5811_v61 = vld [vmem:[#allocation7_spill] sm:$0xff] }
  0xfc   : > { %v3302_v37 = vpop.permute.xlu0 %3301 }
  0xfd   : > { %v3304_v22 = vunpack.i.h.bf16 %v3302_v37  ;;  %v3303_v12 = vunpack.i.l.bf16 %v3302_v37  ;;  %v3314_v37 = vunpack.i.h.bf16 %v3312_v59  ;;  %3471 = vrot.lane.b32.xlu1 %v3470_v47, %s3597_s7 }
  0xff   : > { %v1173_v4 = vsel %vm1158_vm2, %v4297_v17, %v3304_v22  ;;  %v1189_v41 = vsel %vm1158_vm2, %v4835_v52, %v3303_v12 }
 0x100   : > { %1544 = vmatmul.f32.gmra.mxu0 %v1238_v36  ;;  %1592 = vmatmul.f32.gmra.mxu1 %v4827_v31  ;;  %v1206_v22 = vsel %vm1191_vm3, %v1173_v4, %v3309_v21  ;;  %v1222_v12 = vsel %vm1191_vm3, %v1189_v41, %v3308_v25  ;;  %v3342_v25 = vpop.permute.xlu2 %3341  ;;  %v4859_v41 = vld [vmem:[%s3659_s30 + $0x170] sm:$0xff] }
 0x101   : > { %1883 = vmatmul.f32.gmra.mxu3 %v1238_v36  ;;  %v1239_v8 = vsel %vm1224_vm4, %v1206_v22, %v3314_v37  ;;  %v4851_v57 = vsel %vm1224_vm4, %v1222_v12, %v3313_v24  ;;  %v4863_v37 = vpop.f32.mrf.mxu2  ;;  %v5814_v22 = vld [vmem:[#allocation24_spill] sm:$0xff]  ;;  %v3344_v58 = vunpack.i.h.bf16 %v3342_v25  ;;  %v3343_v5 = vunpack.i.l.bf16 %v3342_v25 }
 0x102   : > { %v3322_v38 = vpop.permute.xlu1 %3321  ;;  %5812 = vst [vmem:[#allocation7_spill] sm:$0xff] %v4863_v37  ;;  %v5816_v37 = vld [vmem:[#allocation8_spill] sm:$0xff] }
 0x103   : > { %v3324_v17 = vunpack.i.h.bf16 %v3322_v38  ;;  %v3323_v60 = vunpack.i.l.bf16 %v3322_v38  ;;  %v5813_v38 = vld [vmem:[#allocation21_spill] sm:$0xff] }
 0x104   : > { %v3317_v7 = vpop.permute.xlu0 %3316  ;;  %v3460_v12 = vpack.i.bf16 %v5814_v22, %v5813_v38 }
 0x105   : > { %v3319_v54 = vunpack.i.h.bf16 %v3317_v7  ;;  %v3318_v36 = vunpack.i.l.bf16 %v3317_v7  ;;  %v3328_v7 = vunpack.i.l.bf16 %v3327_v55 }
 0x106   : > { %3461 = vrot.lane.b32.xlu2 %v3460_v12, %s3596_s6 }
 0x107   : > { %v1257_v59 = vsel %vm1158_vm2, %v5811_v61, %v3319_v54  ;;  %v1190_v47 = vsel %vm1158_vm2, %v4859_v41, %v3318_v36  ;;  %v4867_v54 = vpop.f32.mrf.mxu3 }
 0x108   : > { %1547 = vmatmul.f32.gmra.mxu0 %v1239_v8  ;;  %1595 = vmatmul.f32.gmra.mxu1 %v4851_v57  ;;  %v1289_v21 = vsel %vm1191_vm3, %v1257_v59, %v3324_v17  ;;  %5815 = vst [vmem:[#allocation21_spill] sm:$0xff] %v4867_v54 }
 0x109   : > { %1886 = vmatmul.f32.gmra.mxu3 %v1239_v8  ;;  %v1321_v4 = vsel %vm1224_vm4, %v1289_v21, %v3329_v62  ;;  %v1223_v62 = vsel %vm1191_vm3, %v1190_v47, %v3323_v60  ;;  %v5817_v47 = vld [vmem:[#allocation6_spill] sm:$0xff] }
 0x10a   : > { %1957 = vmatmul.f32.vlgmr.msrb.gmra.mxu2 %v1321_v4  ;;  %v3337_v24 = vpop.permute.xlu1 %3336  ;;  %v4872_v36 = vsel %vm1224_vm4, %v1223_v62, %v3328_v7  ;;  %v3357_v62 = vpop.permute.xlu2 %3356 }
 0x10b   : > { %v3339_v61 = vunpack.i.h.bf16 %v3337_v24  ;;  %v3338_v8 = vunpack.i.l.bf16 %v3337_v24 }
 0x10c   : > { %v3332_v17 = vpop.permute.xlu0 %3331 }
 0x10d   : > { %v3334_v59 = vunpack.i.h.bf16 %v3332_v17  ;;  %v3333_v21 = vunpack.i.l.bf16 %v3332_v17  ;;  %v5818_v17 = vld [vmem:[#allocation11_spill] sm:$0xff] }
 0x10e   : > { %v3480_v25 = vpack.i.bf16 %v5818_v17, %v5817_v47 }
 0x10f   : > { %v1174_v55 = vsel %vm1158_vm2, %v4313_v2, %v3333_v21  ;;  %v1258_v54 = vsel %vm1158_vm2, %v5816_v37, %v3334_v59  ;;  %v3485_v2 = vpack.i.bf16 %v4696_v6, %v4666_v42  ;;  %v4887_v59 = vpop.f32.mrf.mxu2 }
 0x110   : > { %1598 = vmatmul.f32.gmra.mxu1 %v4872_v36  ;;  %v1207_v24 = vsel %vm1191_vm3, %v1174_v55, %v3338_v8  ;;  %v1290_v60 = vsel %vm1191_vm3, %v1258_v54, %v3339_v61  ;;  %5819 = vst [vmem:[#allocation24_spill] sm:$0xff] %v4887_v59  ;;  %3481 = vrot.lane.b32.xlu0 %v3480_v25, %s3595_s5  ;;  %v4895_v55 = vpop.f32.mrf.mxu3 }
 0x111   : > { %v1240_v12 = vsel %vm1224_vm4, %v1207_v24, %v3343_v5  ;;  %v1322_v7 = vsel %vm1224_vm4, %v1290_v60, %v3344_v58  ;;  %3486 = vrot.lane.b32.xlu1 %v3485_v2, %s3597_s7  ;;  %v3358_v58 = vunpack.i.l.bf16 %v3357_v62  ;;  %5821 = vst [vmem:[#allocation6_spill] sm:$0xff] %v4895_v55  ;;  %v5822_v2 = vld [vmem:[#allocation26_spill] sm:$0xff] }
 0x112   : > { %1550 = vmatmul.f32.gmra.mxu0 %v1240_v12  ;;  %1889 = vmatmul.f32.gmra.mxu3 %v1240_v12  ;;  %v3372_v59 = vpop.permute.xlu2 %3371 }
 0x113   : > { %1960 = vmatmul.f32.gmra.mxu2 %v1322_v7  ;;  %v3352_v37 = vpop.permute.xlu1 %3351 }
 0x114   : > { %v3347_v54 = vpop.permute.xlu0 %3346  ;;  %v3353_v61 = vunpack.i.l.bf16 %v3352_v37  ;;  %v4890_v8 = vpop.f32.mrf.mxu0  ;;  %v3354_v60 = vunpack.i.h.bf16 %v3352_v37 }
 0x115   : > { %v3348_v5 = vunpack.i.l.bf16 %v3347_v54  ;;  %v4893_v21 = vpop.f32.mrf.mxu1  ;;  %v3349_v24 = vunpack.i.h.bf16 %v3347_v54  ;;  %v5823_v54 = vld [vmem:[#allocation28_spill] sm:$0xff] }
 0x116   : > { %5820 = vst [vmem:[#allocation8_spill] sm:$0xff] %v4893_v21  ;;  %v3475_v55 = vpack.i.bf16 %v5823_v54, %v5822_v2  ;;  %v3359_v21 = vunpack.i.h.bf16 %v3357_v62  ;;  %v5827_v62 = vld [vmem:[#allocation19_spill] sm:$0xff] }
 0x117   : > { %v1259_v42 = vsel %vm1158_vm2, %v3881_v9, %v3348_v5  ;;  %v1260_v12 = vsel %vm1158_vm2, %v3916_v14, %v3349_v24  ;;  %v5826_v24 = vld [vmem:[#allocation15_spill] sm:$0xff] }
 0x118   : > { %1618 = vmatmul.f32.vlgmr.msrb.gmra.mxu1 %v1321_v4  ;;  %v1291_v6 = vsel %vm1191_vm3, %v1259_v42, %v3353_v61  ;;  %v1292_v37 = vsel %vm1191_vm3, %v1260_v12, %v3354_v60  ;;  %3476 = vrot.lane.b32.xlu2 %v3475_v55, %s3596_s6  ;;  %v3495_v42 = vpack.i.bf16 %v5827_v62, %v5826_v24 }
 0x119   : > { %v1323_v25 = vsel %vm1224_vm4, %v1291_v6, %v3358_v58  ;;  %v4916_v58 = vpop.f32.mrf.mxu3  ;;  %v1324_v14 = vsel %vm1224_vm4, %v1292_v37, %v3359_v21  ;;  %v3500_v60 = vpack.i.bf16 %v4762_v29, %v4730_v27 }
 0x11a   : > { %1892 = vmatmul.f32.gmra.mxu3 %v4432_v10  ;;  %2779 = vmatmul.msk.f32.vlgmr.msrb.gmra.mxu0 %vm1158_vm2, %v3786_v3  ;;  %v4914_v3 = vpop.f32.mrf.mxu2  ;;  %5825 = vst [vmem:[#allocation26_spill] sm:$0xff] %v4916_v58 }
 0x11b   : > { %1963 = vmatmul.f32.gmra.mxu2 %v1323_v25  ;;  %v3367_v5 = vpop.permute.xlu1 %3366  ;;  %3496 = vrot.lane.b32.xlu0 %v3495_v42, %s3595_s5 }
 0x11c   : > { %v3362_v9 = vpop.permute.xlu0 %3361  ;;  %v3368_v6 = vunpack.i.l.bf16 %v3367_v5  ;;  %3501 = vrot.lane.b32.xlu1 %v3500_v60, %s3597_s7 }
 0x11d   : > { %v4908_v4 = vpop.f32.mrf.mxu0  ;;  %v4910_v61 = vpop.f32.mrf.mxu1  ;;  %v3363_v10 = vunpack.i.l.bf16 %v3362_v9  ;;  %v3364_v37 = vunpack.i.h.bf16 %v3362_v9  ;;  %v5831_v9 = vld [vmem:[#allocation34_spill] sm:$0xff] }
 0x11e   : > { %5824 = vst [vmem:[#allocation11_spill] sm:$0xff] %v4910_v61 }
 0x11f   : > { %v1261_v55 = vsel %vm1158_vm2, %v3960_v26, %v3363_v10  ;;  %v3369_v10 = vunpack.i.h.bf16 %v3367_v5  ;;  %v1262_v29 = vsel %vm1158_vm2, %v3992_v16, %v3364_v37  ;;  %v5833_v16 = vld [vmem:[#allocation22_spill] sm:$0xff]  ;;  %v5834_v37 = vld [vmem:[#allocation25_spill] sm:$0xff] }
 0x120   : > { %1621 = vmatmul.f32.gmra.mxu1 %v1322_v7  ;;  %v3373_v7 = vunpack.i.l.bf16 %v3372_v59 }
 0x121   : > { %v4938_v27 = vpop.f32.mrf.mxu3  ;;  %v1294_v5 = vsel %vm1191_vm3, %v1262_v29, %v3369_v10 }
 0x122   : > { %1895 = vmatmul.f32.gmra.mxu3 %v4470_v43  ;;  %2780 = vmatmul.msk.f32.gmra.mxu0 %vm1158_vm2, %v3839_v34  ;;  %v1293_v43 = vsel %vm1191_vm3, %v1261_v55, %v3368_v6  ;;  %v4936_v26 = vpop.f32.mrf.mxu2  ;;  %5829 = vst [vmem:[#allocation15_spill] sm:$0xff] %v4938_v27  ;;  %v5830_v6 = vld [vmem:[#allocation31_spill] sm:$0xff]  ;;  %v3374_v55 = vunpack.i.h.bf16 %v3372_v59  ;;  %v3510_v27 = vpack.i.bf16 %v5834_v37, %v5833_v16 }
 0x123   : > { %1966 = vmatmul.f32.gmra.mxu2 %v1324_v14  ;;  %v1325_v34 = vsel %vm1224_vm4, %v1293_v43, %v3373_v7  ;;  %v3382_v43 = vpop.permute.xlu1 %3381 }
 0x124   : > { %v3377_v42 = vpop.permute.xlu0 %3376  ;;  %v3383_v58 = vunpack.i.l.bf16 %v3382_v43  ;;  %3511 = vrot.lane.b32.xlu0 %v3510_v27, %s3595_s5  ;;  %v5838_v27 = vld [vmem:[#allocation37_spill] sm:$0xff] }
 0x125   : > { %v4930_v21 = vpop.f32.mrf.mxu0  ;;  %v4932_v12 = vpop.f32.mrf.mxu1 }
 0x126   : > { %5828 = vst [vmem:[#allocation28_spill] sm:$0xff] %v4932_v12  ;;  %v3387_v12 = vpop.permute.xlu2 %3386 }
 0x128   : > { %1624 = vmatmul.f32.gmra.mxu1 %v1323_v25  ;;  %v3490_v25 = vpack.i.bf16 %v5831_v9, %v5830_v6 }
 0x129   : > { %v4966_v29 = vpop.f32.mrf.mxu3 }
 0x12a   : > { %1898 = vmatmul.f32.gmra.mxu3 %v4500_v28  ;;  %2781 = vmatmul.msk.f32.gmra.mxu0 %vm1158_vm2, %v3889_v13  ;;  %v3378_v28 = vunpack.i.l.bf16 %v3377_v42  ;;  %v1326_v13 = vsel %vm1224_vm4, %v1294_v5, %v3374_v55  ;;  %v4961_v10 = vpop.f32.mrf.mxu2  ;;  %5836 = vst [vmem:[#allocation34_spill] sm:$0xff] %v4966_v29 }
 0x12b   : > { %1969 = vmatmul.f32.gmra.mxu2 %v1325_v34  ;;  %3491 = vrot.lane.b32.xlu2 %v3490_v25, %s3596_s6  ;;  %5835 = vst [vmem:[#allocation31_spill] sm:$0xff] %v4961_v10  ;;  %v3388_v25 = vunpack.i.l.bf16 %v3387_v12 }
 0x12c   : > { %v1263_v59 = vsel %vm1158_vm2, %v4039_v18, %v3378_v28  ;;  %v3379_v18 = vunpack.i.h.bf16 %v3377_v42  ;;  %v3384_v28 = vunpack.i.h.bf16 %v3382_v43 }
 0x12d   : > { %v4947_v60 = vpop.f32.mrf.mxu0  ;;  %v4949_v7 = vpop.f32.mrf.mxu1 }
 0x12e   : > { %5832 = vst [vmem:[#allocation19_spill] sm:$0xff] %v4949_v7 }
 0x130   : > { %1627 = vmatmul.f32.gmra.mxu1 %v1324_v14  ;;  %v3515_v14 = vpack.i.bf16 %v4815_v11, %v4789_v32  ;;  %v1264_v32 = vsel %vm1158_vm2, %v4084_v63, %v3379_v18  ;;  %v3392_v11 = vpop.permute.xlu0 %3391  ;;  %v3397_v63 = vpop.permute.xlu1 %3396 }
 0x131   : > { %v3393_v43 = vunpack.i.l.bf16 %v3392_v11  ;;  %v3402_v18 = vpop.permute.xlu2 %3401 }
 0x132   : > { %1901 = vmatmul.f32.gmra.mxu3 %v4532_v45  ;;  %2782 = vmatmul.msk.f32.gmra.mxu0 %vm1158_vm2, %v3924_v15  ;;  %v1295_v15 = vsel %vm1191_vm3, %v1263_v59, %v3383_v58  ;;  %v4982_v58 = vpop.f32.mrf.mxu2 }
 0x133   : > { %1972 = vmatmul.f32.gmra.mxu2 %v1326_v13  ;;  %3516 = vrot.lane.b32.xlu1 %v3515_v14, %s3597_s7  ;;  %v1327_v5 = vsel %vm1224_vm4, %v1295_v15, %v3388_v25  ;;  %v5839_v14 = vld [vmem:[#allocation40_spill] sm:$0xff]  ;;  %5840 = vst [vmem:[#allocation25_spill] sm:$0xff] %v4982_v58  ;;  %v5843_v25 = vld [vmem:[#allocation27_spill] sm:$0xff]  ;;  %v3398_v15 = vunpack.i.l.bf16 %v3397_v63 }
 0x134   : > { %v3505_v29 = vpack.i.bf16 %v5839_v14, %v5838_v27 }
 0x135   : > { %v4969_v45 = vpop.f32.mrf.mxu0  ;;  %v4971_v55 = vpop.f32.mrf.mxu1 }
 0x136   : > { %5837 = vst [vmem:[#allocation22_spill] sm:$0xff] %v4971_v55  ;;  %v3389_v55 = vunpack.i.h.bf16 %v3387_v12  ;;  %3506 = vrot.lane.b32.xlu2 %v3505_v29, %s3596_s6  ;;  %v3525_v12 = vpack.i.bf16 %v4022_v46, %v5843_v25  ;;  %v1265_v29 = vsel %vm1158_vm2, %v5788_v44, %v3393_v43 }
 0x138   : > { %1630 = vmatmul.f32.gmra.mxu1 %v1325_v34  ;;  %3526 = vrot.lane.b32.xlu0 %v3525_v12, %s3595_s5  ;;  %v3407_v43 = vpop.permute.xlu0 %3406  ;;  %v5846_v12 = vld [vmem:[#allocation44_spill] sm:$0xff] }
 0x13a   : > { %1904 = vmatmul.f32.gmra.mxu3 %v4561_v23  ;;  %2783 = vmatmul.msk.f32.gmra.mxu0 %vm1158_vm2, %v3968_v19  ;;  %v1296_v23 = vsel %vm1191_vm3, %v1264_v32, %v3384_v28  ;;  %v4990_v19 = vpop.f32.mrf.mxu3  ;;  %v3530_v28 = vpack.i.bf16 %v4859_v41, %v4835_v52  ;;  %v3399_v52 = vunpack.i.h.bf16 %v3397_v63 }
 0x13b   : > { %1975 = vmatmul.f32.gmra.mxu2 %v1327_v5  ;;  %5842 = vst [vmem:[#allocation40_spill] sm:$0xff] %v4990_v19  ;;  %v1328_v59 = vsel %vm1224_vm4, %v1296_v23, %v3389_v55  ;;  %v3394_v23 = vunpack.i.h.bf16 %v3392_v11  ;;  %v3520_v11 = vpack.i.bf16 %v4322_v49, %v5846_v12 }
 0x13c   : > { %3531 = vrot.lane.b32.xlu1 %v3530_v28, %s3597_s7 }
 0x13d   : > { %v4984_v34 = vpop.f32.mrf.mxu0  ;;  %v4986_v42 = vpop.f32.mrf.mxu1  ;;  %v1266_v41 = vsel %vm1158_vm2, %v5789_v33, %v3394_v23 }
 0x13e   : > { %5841 = vst [vmem:[#allocation37_spill] sm:$0xff] %v4986_v42  ;;  %3521 = vrot.lane.b32.xlu2 %v3520_v11, %s3596_s6  ;;  %v3412_v33 = vpop.permute.xlu1 %3411 }
 0x13f   : > { %v3413_v23 = vunpack.i.l.bf16 %v3412_v33  ;;  %v3414_v61 = vunpack.i.h.bf16 %v3412_v33 }
 0x140   : > { %1633 = vmatmul.f32.gmra.mxu1 %v1326_v13  ;;  %v3403_v13 = vunpack.i.l.bf16 %v3402_v18  ;;  %1116 = vrot.lane.b32.xlu0 %v4387_v40, %s3596_s6  ;;  %v5871_v40 = vld [vmem:[#allocation56_spill] sm:$0xff] }
 0x142   : > { %1907 = vmatmul.f32.gmra.mxu3 %v4594_v56  ;;  %2784 = vmatmul.msk.f32.gmra.mxu0 %vm1158_vm2, %v5783_v48  ;;  %v1297_v56 = vsel %vm1191_vm3, %v1265_v29, %v3398_v15  ;;  %v5009_v48 = vpop.f32.mrf.mxu2  ;;  %v5011_v19 = vpop.f32.mrf.mxu3 }
 0x143   : > { %1978 = vmatmul.f32.gmra.mxu2 %v1328_v59  ;;  %5845 = vst [vmem:[#allocation60_spill] sm:$0xff] %v5009_v48  ;;  %v1329_v44 = vsel %vm1224_vm4, %v1297_v56, %v3403_v13  ;;  %v5849_v13 = vld [vmem:[#allocation33_spill] sm:$0xff]  ;;  %v5850_v56 = vld [vmem:[#allocation35_spill] sm:$0xff] }
 0x145   : > { %v5004_v55 = vpop.f32.mrf.mxu0  ;;  %v5006_v32 = vpop.f32.mrf.mxu1 }
 0x146   : > { %5844 = vst [vmem:[#allocation27_spill] sm:$0xff] %v5006_v32  ;;  %v3417_v32 = vpop.permute.xlu2 %3416 }
 0x148   : > { %1636 = vmatmul.f32.gmra.mxu1 %v1327_v5  ;;  %v3404_v5 = vunpack.i.h.bf16 %v3402_v18  ;;  %v3535_v18 = vpack.i.bf16 %v5850_v56, %v5849_v13 }
 0x14a   : > { %1910 = vmatmul.f32.gmra.mxu3 %v4628_v35  ;;  %2785 = vmatmul.msk.f32.gmra.mxu0 %vm1158_vm2, %v5786_v39  ;;  %v1298_v35 = vsel %vm1191_vm3, %v1266_v41, %v3399_v52  ;;  %v3408_v39 = vunpack.i.l.bf16 %v3407_v43  ;;  %v5030_v28 = vpop.f32.mrf.mxu2  ;;  %v5034_v42 = vpop.f32.mrf.mxu3  ;;  %v3565_v41 = vld [vmem:[%s3659_s30 + $0x180] sm:$0xff] }
 0x14b   : > { %1981 = vmatmul.f32.gmra.mxu2 %v1329_v44  ;;  %v1330_v29 = vsel %vm1224_vm4, %v1298_v35, %v3404_v5  ;;  %5848 = vst [vmem:[#allocation61_spill] sm:$0xff] %v5030_v28  ;;  %3536 = vrot.lane.b32.xlu1 %v3535_v18, %s3595_s5  ;;  %v527_v11 = vrot.slane %v3565_v41, 1  ;;  %v5044_v5 = vld [vmem:[%s3659_s30 + $0x188] sm:$0xff]  ;;  %v5860_v28 = vld [vmem:[#allocation46_spill] sm:$0xff] }
 0x14c   : > { %v1267_v52 = vsel %vm1158_vm2, %v5795_v30, %v3408_v39  ;;  %v5724_v35 = vrot.slane %v5044_v5, 1  ;;  %v3409_v30 = vunpack.i.h.bf16 %v3407_v43 }
 0x14d   : > { %v5023_v15 = vpop.f32.mrf.mxu0  ;;  %v5025_v63 = vpop.f32.mrf.mxu1 }
 0x14e   : > { %5847 = vst [vmem:[#allocation44_spill] sm:$0xff] %v5025_v63  ;;  %v5057_v39 = vsel %vm362_vm0, %v527_v11, %v5724_v35  ;;  %v3422_v11 = vpop.permute.xlu0 %3421 }
 0x14f   : > { %5853 = vst [vmem:[#allocation63_spill] sm:$0xff] %v5057_v39  ;;  %1118 = vrot.lane.b32.xlu0 %v5057_v39, %s3596_s6  ;;  %v5866_v39 = vld [vmem:[#allocation49_spill] sm:$0xff] }
 0x150   : > { %1639 = vmatmul.f32.gmra.mxu1 %v1328_v59  ;;  %v3418_v59 = vunpack.i.l.bf16 %v3417_v32 }
 0x152   : > { %1913 = vmatmul.f32.gmra.mxu3 %v4655_v20  ;;  %2786 = vmatmul.msk.f32.gmra.mxu0 %vm1158_vm2, %v4183_v53  ;;  %v1299_v20 = vsel %vm1191_vm3, %v1267_v52, %v3413_v23  ;;  %v5852_v53 = vld [vmem:[#allocation51_spill] sm:$0xff]  ;;  %v5067_v52 = vpop.f32.mrf.mxu2  ;;  %v5071_v35 = vpop.f32.mrf.mxu3 }
 0x153   : > { %1984 = vmatmul.f32.gmra.mxu2 %v1330_v29  ;;  %1114 = vrot.lane.b32.xlu2 %v5852_v53, %s3596_s6  ;;  %v1331_v18 = vsel %vm1224_vm4, %v1299_v20, %v3418_v59  ;;  %v5854_v23 = vld [vmem:[#allocation47_spill] sm:$0xff]  ;;  %v3423_v59 = vunpack.i.l.bf16 %v3422_v11  ;;  %v3427_v20 = vpop.permute.xlu1 %3426 }
 0x154   : > { %v1268_v43 = vsel %vm1158_vm2, %v5854_v23, %v3409_v30  ;;  %5855 = vst [vmem:[#allocation47_spill] sm:$0xff] %v5067_v52  ;;  %1024 = vrot.lane.b32.xlu1 %v5044_v5, %s3597_s7  ;;  %v5858_v30 = vld [vmem:[#allocation38_spill] sm:$0xff]  ;;  %v3432_v52 = vpop.permute.xlu2 %3431  ;;  %v3429_v56 = vunpack.i.h.bf16 %v3427_v20 }
 0x155   : > { %v5047_v63 = vpop.f32.mrf.mxu0  ;;  %v5049_v7 = vpop.f32.mrf.mxu1 }
 0x156   : > { %5851 = vst [vmem:[#allocation62_spill] sm:$0xff] %v5049_v7  ;;  %v3428_v7 = vunpack.i.l.bf16 %v3427_v20 }
 0x157   : > { %930 = vrot.lane.b32.xlu0 %v5858_v30, %s3595_s5  ;;  %v3424_v30 = vunpack.i.h.bf16 %v3422_v11  ;;  %v3434_v11 = vunpack.i.h.bf16 %v3432_v52 }
 0x158   : > { %1642 = vmatmul.f32.gmra.mxu1 %v1329_v44  ;;  %v3419_v44 = vunpack.i.h.bf16 %v3417_v32  ;;  %v5859_v32 = vld [vmem:[#allocation39_spill] sm:$0xff] }
 0x15a   : > { %1916 = vmatmul.f32.gmra.mxu3 %v4687_v50  ;;  %2787 = vmatmul.msk.f32.gmra.mxu0 %vm1158_vm2, %v5792_v0  ;;  %v1300_v0 = vsel %vm1191_vm3, %v1268_v43, %v3414_v61  ;;  %v3433_v43 = vunpack.i.l.bf16 %v3432_v52  ;;  %v5872_v52 = vld [vmem:[#allocation53_spill] sm:$0xff] }
 0x15b   : > { %1987 = vmatmul.f32.gmra.mxu2 %v1331_v18  ;;  %1022 = vrot.lane.b32.xlu2 %v3565_v41, %s3597_s7  ;;  %v1332_v23 = vsel %vm1224_vm4, %v1300_v0, %v3419_v44  ;;  %v5088_v41 = vld [vmem:[%s3659_s30 + $0x198] sm:$0xff] }
 0x15c   : > { %1026 = vrot.lane.b32.xlu1 %v5088_v41, %s3597_s7  ;;  %v3447_v48 = vpop.permute.xlu2 %3446 }
 0x15d   : > { %v5073_v33 = vpop.f32.mrf.mxu0  ;;  %v5075_v50 = vpop.f32.mrf.mxu1  ;;  %v3448_v13 = vunpack.i.l.bf16 %v3447_v48 }
 0x15e   : > { %5856 = vst [vmem:[#allocation64_spill] sm:$0xff] %v5073_v33 }
 0x15f   : > { %5857 = vst [vmem:[#allocation65_spill] sm:$0xff] %v5075_v50  ;;  %v5861_v50 = vld [vmem:[#allocation50_spill] sm:$0xff] }
 0x160   : > { %1645 = vmatmul.f32.gmra.mxu1 %v1330_v29  ;;  %v1269_v61 = vsel %vm1158_vm2, %v5861_v50, %v3423_v59  ;;  %v5092_v29 = vpop.f32.mrf.mxu2  ;;  %v5865_v50 = vld [vmem:[#allocation41_spill] sm:$0xff] }
 0x161   : > { %5862 = vst [vmem:[#allocation39_spill] sm:$0xff] %v5092_v29  ;;  %932 = vrot.lane.b32.xlu0 %v5865_v50, %s3595_s5  ;;  %v5867_v29 = vld [vmem:[#allocation54_spill] sm:$0xff] }
 0x162   : > { %1919 = vmatmul.f32.gmra.mxu3 %v5859_v32  ;;  %2788 = vmatmul.msk.f32.gmra.mxu0 %vm1158_vm2, %v5860_v28  ;;  %v1301_v32 = vsel %vm1191_vm3, %v1269_v61, %v3428_v7  ;;  %v5099_v28 = vpop.f32.mrf.mxu3  ;;  %v3437_v7 = vpop.permute.xlu0 %3436  ;;  %v5110_v61 = vld [vmem:[%s3659_s30 + $0x1a0] sm:$0xff] }
 0x163   : > { %1990 = vmatmul.f32.gmra.mxu2 %v1332_v23  ;;  %v1333_v59 = vsel %vm1224_vm4, %v1301_v32, %v3433_v43  ;;  %v3438_v43 = vunpack.i.l.bf16 %v3437_v7 }
 0x164   : > { %1028 = vrot.lane.b32.xlu1 %v5110_v61, %s3597_s7 }
 0x165   : > { %v5094_v44 = vpop.f32.mrf.mxu0  ;;  %v5096_v0 = vpop.f32.mrf.mxu1 }
 0x166   : > { %5863 = vst [vmem:[#allocation46_spill] sm:$0xff] %v5094_v44  ;;  %v5896_v44 = vld [vmem:[#allocation43_spill] sm:$0xff] }
 0x167   : > { %5864 = vst [vmem:[#allocation50_spill] sm:$0xff] %v5096_v0  ;;  %v1270_v0 = vsel %vm1158_vm2, %v5867_v29, %v3424_v30 }
 0x168   : > { %1648 = vmatmul.f32.gmra.mxu1 %v1331_v18  ;;  %v5119_v32 = vpop.f32.mrf.mxu2 }
 0x169   : > { %5870 = vst [vmem:[#allocation66_spill] sm:$0xff] %v5119_v32 }
 0x16a   : > { %1922 = vmatmul.f32.gmra.mxu3 %v4753_v51  ;;  %2789 = vmatmul.msk.f32.gmra.mxu0 %vm1158_vm2, %v5866_v39  ;;  %v1302_v51 = vsel %vm1191_vm3, %v1270_v0, %v3429_v56  ;;  %v3442_v39 = vpop.permute.xlu1 %3441  ;;  %v5121_v30 = vpop.f32.mrf.mxu3  ;;  %v3569_v56 = vld [vmem:[%s3659_s30 + $0x190] sm:$0x3] }
 0x16b   : > { %1993 = vmatmul.f32.gmra.mxu2 %v1333_v59  ;;  %v1334_v29 = vsel %vm1224_vm4, %v1302_v51, %v3434_v11  ;;  %v3443_v50 = vunpack.i.l.bf16 %v3442_v39  ;;  %v530_v0 = vrot.slane %v3569_v56, 1  ;;  %v5876_v11 = vrot.slane %v5044_v5, 1  ;;  %v5880_v5 = vld [vmem:[#allocation3_spill] sm:$0xff] }
 0x16c   : > { %v3439_v51 = vunpack.i.h.bf16 %v3437_v7  ;;  %v3452_v7 = vpop.permute.xlu0 %3451 }
 0x16d   : > { %v5114_v18 = vpop.f32.mrf.mxu0  ;;  %v5116_v20 = vpop.f32.mrf.mxu1 }
 0x16e   : > { %5868 = vst [vmem:[#allocation49_spill] sm:$0xff] %v5114_v18  ;;  %v5873_v18 = vld [vmem:[#allocation2_spill] sm:$0xff] }
 0x16f   : > { %5869 = vst [vmem:[#allocation54_spill] sm:$0xff] %v5116_v20  ;;  %v1271_v20 = vsel %vm1158_vm2, %v5873_v18, %v3438_v43  ;;  %v3444_v43 = vunpack.i.h.bf16 %v3442_v39 }
 0x170   : > { %1651 = vmatmul.f32.gmra.mxu1 %v1332_v23  ;;  %v1303_v23 = vsel %vm1191_vm3, %v1271_v20, %v3443_v50  ;;  %v5879_v50 = vld [vmem:[#allocation5_spill] sm:$0xff]  ;;  %v1272_v20 = vsel %vm1158_vm2, %v5880_v5, %v3439_v51  ;;  %v5884_v5 = vld [vmem:[#allocation10_spill] sm:$0xff] }
 0x171   : > { %v1335_v18 = vsel %vm1224_vm4, %v1303_v23, %v3448_v13  ;;  %v573_v13 = vrot.slane %v5110_v61, 1  ;;  %v5883_v61 = vld [vmem:[#allocation9_spill] sm:$0xff] }
 0x172   : > { %1925 = vmatmul.f32.gmra.mxu3 %v5871_v40  ;;  %2790 = vmatmul.msk.f32.gmra.mxu0 %vm1158_vm2, %v5872_v52  ;;  %v5138_v40 = vsel %vm362_vm0, %v5876_v11, %v530_v0  ;;  %v5143_v52 = vpop.f32.mrf.mxu2  ;;  %v5145_v56 = vpop.f32.mrf.mxu3  ;;  %v3449_v0 = vunpack.i.h.bf16 %v3447_v48  ;;  %v1304_v11 = vsel %vm1191_vm3, %v1272_v20, %v3444_v43 }
 0x173   : > { %1996 = vmatmul.f32.gmra.mxu2 %v1334_v29  ;;  %5877 = vst [vmem:[#allocation2_spill] sm:$0xff] %v5138_v40  ;;  %1120 = vrot.lane.b32.xlu2 %v5138_v40, %s3596_s6 }
 0x174   : > { %5878 = vst [vmem:[#allocation67_spill] sm:$0xff] %v5143_v52  ;;  %v1336_v48 = vsel %vm1224_vm4, %v1304_v11, %v3449_v0  ;;  %v3454_v11 = vunpack.i.h.bf16 %v3452_v7 }
 0x175   : > { %v5130_v32 = vpop.f32.mrf.mxu0  ;;  %v5132_v58 = vpop.f32.mrf.mxu1 }
 0x176   : > { %5874 = vst [vmem:[#allocation56_spill] sm:$0xff] %v5130_v32 }
 0x177   : > { %5875 = vst [vmem:[#allocation53_spill] sm:$0xff] %v5132_v58  ;;  %v3457_v58 = vpop.permute.xlu1 %3456 }
 0x178   : > { %1654 = vmatmul.f32.gmra.mxu1 %v1333_v59  ;;  %v572_v59 = vrot.slane %v5088_v41, 1  ;;  %v3458_v51 = vunpack.i.l.bf16 %v3457_v58  ;;  %v3462_v41 = vpop.permute.xlu2 %3461 }
 0x17a   : > { %1928 = vmatmul.f32.gmra.mxu3 %v4807_v1  ;;  %2791 = vmatmul.msk.f32.gmra.mxu0 %vm1158_vm2, %v5879_v50  ;;  %v3453_v1 = vunpack.i.l.bf16 %v3452_v7  ;;  %v574_v50 = vsel %vm362_vm0, %v572_v59, %v573_v13  ;;  %v5167_v20 = vpop.f32.mrf.mxu2  ;;  %v3463_v59 = vunpack.i.l.bf16 %v3462_v41 }
 0x17b   : > { %1999 = vmatmul.f32.gmra.mxu2 %v1335_v18  ;;  %1122 = vrot.lane.b32.xlu2 %v574_v50, %s3596_s6  ;;  %5885 = vst [vmem:[#allocation9_spill] sm:$0xff] %v5167_v20  ;;  %v3570_v50 = vld [vmem:[%s3659_s30 + $0x1a8] sm:$0x3]  ;;  %v5888_v20 = vld [vmem:[#allocation14_spill] sm:$0xff] }
 0x17c   : > { %v1273_v43 = vsel %vm1158_vm2, %v5884_v5, %v3453_v1  ;;  %v3459_v5 = vunpack.i.h.bf16 %v3457_v58 }
 0x17d   : > { %v5154_v39 = vpop.f32.mrf.mxu0  ;;  %v5156_v23 = vpop.f32.mrf.mxu1 }
 0x17e   : > { %5881 = vst [vmem:[#allocation5_spill] sm:$0xff] %v5154_v39 }
 0x17f   : > { %5882 = vst [vmem:[#allocation3_spill] sm:$0xff] %v5156_v23  ;;  %v5169_v23 = vpop.f32.mrf.mxu3  ;;  %v3472_v58 = vpop.permute.xlu1 %3471 }
 0x180   : > { %1657 = vmatmul.f32.gmra.mxu1 %v1334_v29  ;;  %v575_v29 = vrot.slane %v3570_v50, 1  ;;  %v5889_v50 = vld [vmem:[#allocation12_spill] sm:$0xff] }
 0x182   : > { %1931 = vmatmul.f32.gmra.mxu3 %v4827_v31  ;;  %2792 = vmatmul.msk.f32.gmra.mxu0 %vm1158_vm2, %v5883_v61  ;;  %v1305_v31 = vsel %vm1191_vm3, %v1273_v43, %v3458_v51  ;;  %v576_v61 = vsel %vm362_vm0, %v573_v13, %v575_v29  ;;  %v3464_v51 = vunpack.i.h.bf16 %v3462_v41 }
 0x183   : > { %2002 = vmatmul.f32.gmra.mxu2 %v1336_v48  ;;  %1124 = vrot.lane.b32.xlu2 %v576_v61, %s3596_s6  ;;  %v1337_v1 = vsel %vm1224_vm4, %v1305_v31, %v3463_v59  ;;  %v3477_v31 = vpop.permute.xlu2 %3476  ;;  %s2845_s6 = sshll.u32 %s5966_s15, 8 }
 0x184   : > { %s5239_s23 = scalar_lea.vmem %s5635_s3, %s2845_s6 }
 0x185   : > { %v5172_v52 = vpop.f32.mrf.mxu0  ;;  %v5174_v0 = vpop.f32.mrf.mxu1 }
 0x186   : > { %5886 = vst [vmem:[#allocation10_spill] sm:$0xff] %v5172_v52  ;;  %v1274_v52 = vsel %vm1158_vm2, %v5889_v50, %v3454_v11  ;;  %v5892_v11 = vld [vmem:[#allocation16_spill] sm:$0xff] }
 0x187   : > { %5887 = vst [vmem:[#allocation68_spill] sm:$0xff] %v5174_v0  ;;  %v3467_v0 = vpop.permute.xlu0 %3466  ;;  %v1306_v13 = vsel %vm1191_vm3, %v1274_v52, %v3459_v5  ;;  %v3478_v52 = vunpack.i.l.bf16 %v3477_v31  ;;  %v3487_v40 = vpop.permute.xlu1 %3486 }
 0x188   : > { %1660 = vmatmul.f32.gmra.mxu1 %v1335_v18  ;;  %v5188_v18 = vpop.f32.mrf.mxu3  ;;  %v3468_v59 = vunpack.i.l.bf16 %v3467_v0  ;;  %v3469_v50 = vunpack.i.h.bf16 %v3467_v0 }
 0x18a   : > { %1934 = vmatmul.f32.gmra.mxu3 %v4851_v57  ;;  %2793 = vmatmul.msk.f32.gmra.mxu0 %vm1158_vm2, %v5888_v20  ;;  %v1338_v57 = vsel %vm1224_vm4, %v1306_v13, %v3464_v51  ;;  %v3473_v20 = vunpack.i.l.bf16 %v3472_v58  ;;  %v1275_v41 = vsel %vm1158_vm2, %v5813_v38, %v3468_v59  ;;  %v2389_v38 = vld [vmem:[%s5634_s2] sm:$0x3]  ;;  %v5893_v59 = vld [vmem:[#allocation20_spill] sm:$0xff]  ;;  %v1276_v0 = vsel %vm1158_vm2, %v5814_v22, %v3469_v50 }
 0x18b   : > { %2005 = vmatmul.f32.gmra.mxu2 %v1337_v1 }
 0x18c   : > { %v1307_v5 = vsel %vm1191_vm3, %v1275_v41, %v3473_v20  ;;  %v5895_v41 = vld [vmem:[#allocation36_spill] sm:$0xff] }
 0x18d   : > { %v1958_v7 = vpop.f32.mrf.mxu2  ;;  %v5185_v43 = vpop.f32.mrf.mxu1  ;;  %v1339_v51 = vsel %vm1224_vm4, %v1307_v5, %v3478_v52 }
 0x18e   : > { %5890 = vst [vmem:[#allocation14_spill] sm:$0xff] %v5185_v43 }
 0x18f   : > { %v5190_v29 = vpop.f32.mrf.mxu0  ;;  %v5210_v20 = vpop.permute.xlu0 %3481 }
 0x190   : > { %5891 = vst [vmem:[#allocation12_spill] sm:$0xff] %v5190_v29  ;;  %1663 = vmatmul.f32.gmra.mxu1 %v1336_v48  ;;  %v5199_v29 = vpop.f32.mrf.mxu3  ;;  %v3484_v46 = vunpack.i.h.bf16 %v5210_v20 }
 0x192   : > { %1937 = vmatmul.f32.gmra.mxu3 %v4872_v36  ;;  %2794 = vmatmul.msk.f32.gmra.mxu0 %vm1158_vm2, %v5892_v11  ;;  %v3474_v36 = vunpack.i.h.bf16 %v3472_v58  ;;  %v5894_v11 = vld [vmem:[#allocation48_spill] sm:$0xff]  ;;  %v5214_v58 = vperm.slane %v2389_v38, 0 }
 0x193   : > { %2008 = vmatmul.f32.gmra.mxu2 %v1338_v57 }
 0x194   : > { %v1308_v5 = vsel %vm1191_vm3, %v1276_v0, %v3474_v36 }
 0x195   : > { %v1619_v61 = vpop.f32.mrf.mxu1 }
 0x196   : > { %v1961_v43 = vpop.f32.mrf.mxu2  ;;  %v1620_v13 = vadd.f32 %v1619_v61, %v4890_v8  ;;  %v1959_v8 = vadd.f32 %v1958_v7, %v5011_v19 }
 0x197   : > { %v2071_v48 = vpop.f32.mrf.mxu0  ;;  %v1962_v22 = vadd.f32 %v1961_v43, %v5034_v42  ;;  %v3492_v42 = vpop.permute.xlu2 %3491 }
 0x198   : > { %1666 = vmatmul.f32.gmra.mxu1 %v1337_v1  ;;  %v3479_v1 = vunpack.i.h.bf16 %v3477_v31  ;;  %v1733_v52 = vadd.f32 %v5895_v41, %v1620_v13  ;;  %v2072_v32 = vadd.f32 %v2071_v48, %v1959_v8  ;;  %v3488_v41 = vunpack.i.l.bf16 %v3487_v40  ;;  %v5230_v43 = vpop.f32.mrf.mxu3 }
 0x199   : > { %5897 = vst [vmem:[#allocation16_spill] sm:$0xff] %v5230_v43 }
 0x19a   : > { %2795 = vmatmul.msk.f32.gmra.mxu0 %vm1158_vm2, %v5893_v59  ;;  %2810 = vmatmul.msk.f32.vlgmr.msra.gmra.mxu3 %vm1158_vm2, %v5894_v11  ;;  %v3483_v59 = vunpack.i.l.bf16 %v5210_v20  ;;  %v5222_v11 = vperm.slane %v2389_v38, 1  ;;  %v1340_v13 = vsel %vm1224_vm4, %v1308_v5, %v3479_v1  ;;  %v2241_v36 = vmul.f32 %v1733_v52, %v1733_v52  ;;  %v3497_v20 = vpop.permute.xlu0 %3496 }
 0x19b   : > { %2011 = vmatmul.f32.gmra.mxu2 %v1339_v51  ;;  %v2395_v0 = vadd.f32 %v5214_v58, %v1733_v52 }
 0x19d   : > { %v1622_v61 = vpop.f32.mrf.mxu1 }
 0x19e   : > { %v1964_v50 = vpop.f32.mrf.mxu2  ;;  %v1623_v39 = vadd.f32 %v1622_v61, %v4908_v4  ;;  %v1277_v4 = vsel %vm1158_vm2, %v5822_v2, %v3483_v59  ;;  %v3493_v59 = vunpack.i.l.bf16 %v3492_v42 }
 0x19f   : > { %v2074_v31 = vpop.f32.mrf.mxu0 }
 0x1a0   : > { %v1736_v19 = vadd.f32 %v5896_v44, %v1623_v39  ;;  %v2075_v7 = vadd.f32 %v2074_v31, %v1962_v22  ;;  %1669 = vmatmul.f32.gmra.mxu1 %v1338_v57  ;;  %v5898_v44 = vld [vmem:[#allocation23_spill] sm:$0xff]  ;;  %v2242_v39 = vmul.f32 %v2072_v32, %v2072_v32  ;;  %v2396_v57 = vadd.f32 %v5222_v11, %v2072_v32 }
 0x1a2   : > { %v2167_v48 = vadd.f32 %v1736_v19, %v1733_v52  ;;  %v2243_v38 = vmul.f32 %v1736_v19, %v1736_v19  ;;  %v2397_v8 = vadd.f32 %v5214_v58, %v1736_v19  ;;  %v2204_v61 = vadd.f32 %v2075_v7, %v2072_v32  ;;  %2796 = vmatmul.msk.f32.gmra.mxu0 %vm1158_vm2, %v5898_v44 }
 0x1a3   : > { %v2244_v2 = vmul.f32 %v2075_v7, %v2075_v7  ;;  %v2398_v1 = vadd.f32 %v5222_v11, %v2075_v7  ;;  %2014 = vmatmul.f32.gmra.mxu2 %v1340_v13  ;;  %v1309_v44 = vsel %vm1191_vm3, %v1277_v4, %v3488_v41  ;;  %v1965_v32 = vadd.f32 %v1964_v50, %v5071_v35  ;;  %v5899_v7 = vld [vmem:[#allocation4_spill] sm:$0xff]  ;;  %v5254_v50 = vpop.f32.mrf.mxu3 }
 0x1a4   : > { %v2305_v52 = vadd.f32 %v2243_v38, %v2241_v36  ;;  %v2850_v5 = vpack.c.bf16 %v2397_v8, %v2395_v0  ;;  %v1341_v0 = vsel %vm1224_vm4, %v1309_v44, %v3493_v59  ;;  %v3489_v38 = vunpack.i.h.bf16 %v3487_v40 }
 0x1a5   : > { %v2342_v22 = vadd.f32 %v2244_v2, %v2242_v39  ;;  %v2930_v31 = vpack.c.bf16 %v2398_v1, %v2396_v57  ;;  %v1625_v19 = vpop.f32.mrf.mxu1  ;;  %v1278_v35 = vsel %vm1158_vm2, %v5823_v54, %v3484_v46  ;;  %v3502_v2 = vpop.permute.xlu1 %3501  ;;  %v5900_v46 = vld [vmem:[#allocation57_spill] sm:$0xff] }
 0x1a6   : > { %2851 = vst [vmem:[%s5239_s23] sm:$0xff] %v2850_v5   ;;  %v1967_v53 = vpop.f32.mrf.mxu2  ;;  %v1626_v10 = vadd.f32 %v1625_v19, %v4930_v21  ;;  %v1310_v40 = vsel %vm1191_vm3, %v1278_v35, %v3489_v38 }
 0x1a7   : > { %3022 = vst [vmem:[%s5239_s23 + $0x8] sm:$0xff] %v2930_v31   ;;  %v2077_v33 = vpop.f32.mrf.mxu0 }
 0x1a8   : > { %v1739_v43 = vadd.f32 %v5899_v7, %v1626_v10  ;;  %v2078_v36 = vadd.f32 %v2077_v33, %v1965_v32  ;;  %1672 = vmatmul.f32.gmra.mxu1 %v1339_v51  ;;  %v3494_v10 = vunpack.i.h.bf16 %v3492_v42 }
 0x1aa   : > { %v2168_v8 = vadd.f32 %v2167_v48, %v1739_v43  ;;  %v2245_v39 = vmul.f32 %v1739_v43, %v1739_v43  ;;  %v2205_v41 = vadd.f32 %v2204_v61, %v2078_v36  ;;  %2797 = vmatmul.msk.f32.gmra.mxu0 %vm1158_vm2, %v5817_v47  ;;  %v2246_v21 = vmul.f32 %v2078_v36, %v2078_v36 }
 0x1ab   : > { %2017 = vmatmul.f32.gmra.mxu2 %v1341_v0  ;;  %v3498_v48 = vunpack.i.l.bf16 %v3497_v20  ;;  %v1968_v61 = vadd.f32 %v1967_v53, %v5099_v28  ;;  %v1342_v59 = vsel %vm1224_vm4, %v1310_v40, %v3494_v10  ;;  %v2399_v42 = vadd.f32 %v5214_v58, %v1739_v43  ;;  %v5901_v40 = vld [vmem:[#allocation13_spill] sm:$0xff] }
 0x1ac   : > { %v2306_v33 = vadd.f32 %v2305_v52, %v2245_v39  ;;  %v2343_v51 = vadd.f32 %v2342_v22, %v2246_v21  ;;  %v3503_v52 = vunpack.i.l.bf16 %v3502_v2  ;;  %v3507_v22 = vpop.permute.xlu2 %3506  ;;  %v5270_v21 = vpop.f32.mrf.mxu3 }
 0x1ad   : > { %v1628_v4 = vpop.f32.mrf.mxu1  ;;  %v1279_v31 = vsel %vm1158_vm2, %v5830_v6, %v3498_v48  ;;  %v3508_v38 = vunpack.i.l.bf16 %v3507_v22 }
 0x1ae   : > { %v1970_v57 = vpop.f32.mrf.mxu2  ;;  %v1629_v47 = vadd.f32 %v1628_v4, %v4947_v60  ;;  %v1311_v35 = vsel %vm1191_vm3, %v1279_v31, %v3503_v52 }
 0x1af   : > { %v2080_v1 = vpop.f32.mrf.mxu0 }
 0x1b0   : > { %v1742_v54 = vadd.f32 %v5900_v46, %v1629_v47  ;;  %v2081_v5 = vadd.f32 %v2080_v1, %v1968_v61  ;;  %1675 = vmatmul.f32.gmra.mxu1 %v1340_v13  ;;  %v2400_v13 = vadd.f32 %v5222_v11, %v2078_v36  ;;  %v3504_v61 = vunpack.i.h.bf16 %v3502_v2 }
 0x1b2   : > { %v2169_v19 = vadd.f32 %v2168_v8, %v1742_v54  ;;  %v2247_v53 = vmul.f32 %v1742_v54, %v1742_v54  ;;  %v2401_v28 = vadd.f32 %v5214_v58, %v1742_v54  ;;  %v2206_v60 = vadd.f32 %v2205_v41, %v2081_v5  ;;  %2798 = vmatmul.msk.f32.gmra.mxu0 %vm1158_vm2, %v5818_v17 }
 0x1b3   : > { %v2248_v44 = vmul.f32 %v2081_v5, %v2081_v5  ;;  %v2402_v43 = vadd.f32 %v5222_v11, %v2081_v5  ;;  %2020 = vmatmul.f32.gmra.mxu2 %v1342_v59  ;;  %v1971_v41 = vadd.f32 %v1970_v57, %v5121_v30  ;;  %v3499_v17 = vunpack.i.h.bf16 %v3497_v20  ;;  %v3512_v20 = vpop.permute.xlu0 %3511 }
 0x1b4   : > { %v2307_v32 = vadd.f32 %v2306_v33, %v2247_v53  ;;  %v2855_v7 = vpack.c.bf16 %v2401_v28, %v2399_v42  ;;  %v3509_v57 = vunpack.i.h.bf16 %v3507_v22  ;;  %v3513_v52 = vunpack.i.l.bf16 %v3512_v20  ;;  %v3517_v53 = vpop.permute.xlu1 %3516  ;;  %v5285_v28 = vpop.f32.mrf.mxu3 }
 0x1b5   : > { %v2344_v6 = vadd.f32 %v2343_v51, %v2248_v44  ;;  %v2935_v8 = vpack.c.bf16 %v2402_v43, %v2400_v13  ;;  %v1631_v39 = vpop.f32.mrf.mxu1  ;;  %v1343_v51 = vsel %vm1224_vm4, %v1311_v35, %v3508_v38  ;;  %v1280_v30 = vsel %vm1158_vm2, %v5831_v9, %v3499_v17  ;;  %v5902_v9 = vld [vmem:[#allocation7_spill] sm:$0xff] }
 0x1b6   : > { %3007 = vst [vmem:[%s5239_s23 + $0x10] sm:$0xff] %v2855_v7   ;;  %v1973_v36 = vpop.f32.mrf.mxu2  ;;  %v1632_v10 = vadd.f32 %v1631_v39, %v4969_v45  ;;  %v3518_v43 = vunpack.i.l.bf16 %v3517_v53 }
 0x1b7   : > { %3023 = vst [vmem:[%s5239_s23 + $0x18] sm:$0xff] %v2935_v8   ;;  %v2083_v4 = vpop.f32.mrf.mxu0  ;;  %v1974_v2 = vadd.f32 %v1973_v36, %v5145_v56  ;;  %v1281_v56 = vsel %vm1158_vm2, %v5838_v27, %v3513_v52 }
 0x1b8   : > { %v1745_v33 = vadd.f32 %v5901_v40, %v1632_v10  ;;  %v2084_v48 = vadd.f32 %v2083_v4, %v1971_v41  ;;  %1678 = vmatmul.f32.gmra.mxu1 %v1341_v0  ;;  %v1312_v0 = vsel %vm1191_vm3, %v1280_v30, %v3504_v61  ;;  %v1313_v4 = vsel %vm1191_vm3, %v1281_v56, %v3518_v43 }
 0x1b9   : > { %v1344_v22 = vsel %vm1224_vm4, %v1312_v0, %v3509_v57 }
 0x1ba   : > { %v2170_v47 = vadd.f32 %v2169_v19, %v1745_v33  ;;  %v2249_v1 = vmul.f32 %v1745_v33, %v1745_v33  ;;  %v2207_v46 = vadd.f32 %v2206_v60, %v2084_v48  ;;  %2799 = vmatmul.msk.f32.gmra.mxu0 %vm1158_vm2, %v5826_v24  ;;  %v2250_v45 = vmul.f32 %v2084_v48, %v2084_v48 }
 0x1bb   : > { %2023 = vmatmul.f32.gmra.mxu2 %v1343_v51  ;;  %v2403_v44 = vadd.f32 %v5214_v58, %v1745_v33  ;;  %v3514_v33 = vunpack.i.h.bf16 %v3512_v20 }
 0x1bc   : > { %v2308_v54 = vadd.f32 %v2307_v32, %v2249_v1  ;;  %v2345_v5 = vadd.f32 %v2344_v6, %v2250_v45  ;;  %v3522_v32 = vpop.permute.xlu2 %3521  ;;  %v3519_v45 = vunpack.i.h.bf16 %v3517_v53  ;;  %v5304_v57 = vpop.f32.mrf.mxu3 }
 0x1bd   : > { %v1634_v42 = vpop.f32.mrf.mxu1  ;;  %v3523_v17 = vunpack.i.l.bf16 %v3522_v32  ;;  %v3524_v0 = vunpack.i.h.bf16 %v3522_v32 }
 0x1be   : > { %v1976_v31 = vpop.f32.mrf.mxu2  ;;  %v1635_v19 = vadd.f32 %v1634_v42, %v4984_v34 }
 0x1bf   : > { %v2086_v24 = vpop.f32.mrf.mxu0  ;;  %v1977_v40 = vadd.f32 %v1976_v31, %v5169_v23  ;;  %v1345_v30 = vsel %vm1224_vm4, %v1313_v4, %v3523_v17  ;;  %v3527_v23 = vpop.permute.xlu0 %3526 }
 0x1c0   : > { %v1748_v60 = vadd.f32 %v5902_v9, %v1635_v19  ;;  %v2087_v13 = vadd.f32 %v2086_v24, %v1974_v2  ;;  %1681 = vmatmul.f32.gmra.mxu1 %v1342_v59  ;;  %v2404_v59 = vadd.f32 %v5222_v11, %v2084_v48  ;;  %v3528_v19 = vunpack.i.l.bf16 %v3527_v23 }
 0x1c2   : > { %v2171_v7 = vadd.f32 %v2170_v47, %v1748_v60  ;;  %v2251_v38 = vmul.f32 %v1748_v60, %v1748_v60  ;;  %v2405_v34 = vadd.f32 %v5214_v58, %v1748_v60  ;;  %v2208_v6 = vadd.f32 %v2207_v46, %v2087_v13  ;;  %2800 = vmatmul.msk.f32.gmra.mxu0 %vm1158_vm2, %v5827_v62  ;;  %v5903_v47 = vld [vmem:[#allocation24_spill] sm:$0xff]  ;;  %v3532_v60 = vpop.permute.xlu1 %3531 }
 0x1c3   : > { %v2252_v8 = vmul.f32 %v2087_v13, %v2087_v13  ;;  %v2406_v39 = vadd.f32 %v5222_v11, %v2087_v13  ;;  %2026 = vmatmul.f32.gmra.mxu2 %v1344_v22  ;;  %v3533_v32 = vunpack.i.l.bf16 %v3532_v60  ;;  %v1283_v56 = vsel %vm1158_vm2, %v5846_v12, %v3528_v19 }
 0x1c4   : > { %v2309_v35 = vadd.f32 %v2308_v54, %v2251_v38  ;;  %v2860_v41 = vpack.c.bf16 %v2405_v34, %v2403_v44 }
 0x1c5   : > { %v2346_v27 = vadd.f32 %v2345_v5, %v2252_v8  ;;  %v2940_v36 = vpack.c.bf16 %v2406_v39, %v2404_v59  ;;  %v1637_v10 = vpop.f32.mrf.mxu1  ;;  %v1315_v17 = vsel %vm1191_vm3, %v1283_v56, %v3533_v32  ;;  %v5908_v32 = vld [vmem:[#allocation30_spill] sm:$0xff] }
 0x1c6   : > { %3008 = vst [vmem:[%s5239_s23 + $0x20] sm:$0xff] %v2860_v41   ;;  %v1979_v62 = vpop.f32.mrf.mxu2  ;;  %v1638_v48 = vadd.f32 %v1637_v10, %v5004_v55  ;;  %v1282_v55 = vsel %vm1158_vm2, %v5839_v14, %v3514_v33  ;;  %v1115_v41 = vpop.permute.xlu2 %1114 }
 0x1c7   : > { %3024 = vst [vmem:[%s5239_s23 + $0x28] sm:$0xff] %v2940_v36   ;;  %v2089_v61 = vpop.f32.mrf.mxu0  ;;  %v1314_v31 = vsel %vm1191_vm3, %v1282_v55, %v3519_v45  ;;  %v1980_v53 = vadd.f32 %v1979_v62, %v5188_v18  ;;  %v1347_v62 = vsel %vm1224_vm4, %v1315_v17, %v1115_v41  ;;  %v1117_v45 = vpop.permute.xlu0 %1116 }
 0x1c8   : > { %v1751_v1 = vadd.f32 %v5903_v47, %v1638_v48  ;;  %v2090_v46 = vadd.f32 %v2089_v61, %v1977_v40  ;;  %1684 = vmatmul.f32.gmra.mxu1 %v1343_v51  ;;  %v1346_v44 = vsel %vm1224_vm4, %v1314_v31, %v3524_v0  ;;  %v3534_v48 = vunpack.i.h.bf16 %v3532_v60 }
 0x1ca   : > { %v2172_v54 = vadd.f32 %v2171_v7, %v1751_v1  ;;  %v2253_v5 = vmul.f32 %v1751_v1, %v1751_v1  ;;  %v2209_v42 = vadd.f32 %v2208_v6, %v2090_v46  ;;  %2801 = vmatmul.msk.f32.gmra.mxu0 %vm1158_vm2, %v5833_v16  ;;  %v2254_v20 = vmul.f32 %v2090_v46, %v2090_v46  ;;  %v5323_v6 = vpop.f32.mrf.mxu3 }
 0x1cb   : > { %2029 = vmatmul.f32.gmra.mxu2 %v1345_v30  ;;  %v2407_v43 = vadd.f32 %v5214_v58, %v1751_v1 }
 0x1cc   : > { %v2310_v52 = vadd.f32 %v2309_v35, %v2253_v5  ;;  %v2347_v51 = vadd.f32 %v2346_v27, %v2254_v20 }
 0x1cd   : > { %v1640_v2 = vpop.f32.mrf.mxu1 }
 0x1ce   : > { %v1982_v24 = vpop.f32.mrf.mxu2  ;;  %v1641_v9 = vadd.f32 %v1640_v2, %v5023_v15  ;;  %v1023_v2 = vpop.permute.xlu2 %1022 }
 0x1cf   : > { %v2092_v16 = vpop.f32.mrf.mxu0  ;;  %v1983_v27 = vadd.f32 %v1982_v24, %v5199_v29 }
 0x1d0   : > { %v1754_v13 = vadd.f32 %v4914_v3, %v1641_v9  ;;  %v2093_v14 = vadd.f32 %v2092_v16, %v1980_v53  ;;  %1687 = vmatmul.f32.gmra.mxu1 %v1344_v22  ;;  %v2408_v3 = vadd.f32 %v5222_v11, %v2090_v46  ;;  %v3537_v46 = vpop.permute.xlu1 %3536  ;;  %v5907_v9 = vld [vmem:[#allocation51_spill] sm:$0xff] }
 0x1d2   : > { %v2173_v7 = vadd.f32 %v2172_v54, %v1754_v13  ;;  %v2255_v38 = vmul.f32 %v1754_v13, %v1754_v13  ;;  %v2409_v18 = vadd.f32 %v5214_v58, %v1754_v13  ;;  %v2210_v15 = vadd.f32 %v2209_v42, %v2093_v14  ;;  %2802 = vmatmul.msk.f32.gmra.mxu0 %vm1158_vm2, %v5834_v37  ;;  %v5337_v55 = vpop.f32.mrf.mxu3 }
 0x1d3   : > { %v2256_v22 = vmul.f32 %v2093_v14, %v2093_v14  ;;  %v2410_v34 = vadd.f32 %v5222_v11, %v2093_v14  ;;  %2032 = vmatmul.f32.gmra.mxu2 %v1346_v44  ;;  %v3529_v37 = vunpack.i.h.bf16 %v3527_v23  ;;  %v3538_v42 = vunpack.i.l.bf16 %v3537_v46  ;;  %v5904_v23 = vld [vmem:[#allocation16_spill] sm:$0xff] }
 0x1d4   : > { %v2311_v59 = vadd.f32 %v2310_v52, %v2255_v38  ;;  %v2865_v12 = vpack.c.bf16 %v2409_v18, %v2407_v43  ;;  %v5905_v52 = vld [vmem:[#allocation64_spill] sm:$0xff] }
 0x1d5   : > { %v2348_v8 = vadd.f32 %v2347_v51, %v2256_v22  ;;  %v2945_v39 = vpack.c.bf16 %v2410_v34, %v2408_v3  ;;  %v1643_v35 = vpop.f32.mrf.mxu1  ;;  %v1284_v29 = vsel %vm1158_vm2, %v4322_v49, %v3529_v37  ;;  %v5906_v49 = vld [vmem:[#allocation31_spill] sm:$0xff]  ;;  %v1285_v60 = vsel %vm1158_vm2, %v5907_v9, %v3538_v42  ;;  %v5913_v42 = vld [vmem:[#allocation49_spill] sm:$0xff] }
 0x1d6   : > { %3009 = vst [vmem:[%s5239_s23 + $0x30] sm:$0xff] %v2865_v12   ;;  %v1985_v36 = vpop.f32.mrf.mxu2  ;;  %v1644_v10 = vadd.f32 %v1643_v35, %v5047_v63  ;;  %v1317_v34 = vsel %vm1191_vm3, %v1285_v60, %v1023_v2  ;;  %v5909_v35 = vld [vmem:[#allocation46_spill] sm:$0xff] }
 0x1d7   : > { %3025 = vst [vmem:[%s5239_s23 + $0x38] sm:$0xff] %v2945_v39   ;;  %v2095_v4 = vpop.f32.mrf.mxu0  ;;  %v1986_v20 = vadd.f32 %v1985_v36, %v5904_v23  ;;  %v5910_v36 = vld [vmem:[#allocation25_spill] sm:$0xff] }
 0x1d8   : > { %v1757_v40 = vadd.f32 %v4936_v26, %v1644_v10  ;;  %v2096_v33 = vadd.f32 %v2095_v4, %v1983_v27  ;;  %1690 = vmatmul.f32.gmra.mxu1 %v1345_v30  ;;  %v1316_v30 = vsel %vm1191_vm3, %v1284_v29, %v3534_v48  ;;  %v1025_v17 = vpop.permute.xlu1 %1024 }
 0x1d9   : > { %v1348_v53 = vsel %vm1224_vm4, %v1316_v30, %v1117_v45 }
 0x1da   : > { %v2174_v61 = vadd.f32 %v2173_v7, %v1757_v40  ;;  %v2257_v47 = vmul.f32 %v1757_v40, %v1757_v40  ;;  %v2211_v1 = vadd.f32 %v2210_v15, %v2096_v33  ;;  %2803 = vmatmul.msk.f32.gmra.mxu0 %vm1158_vm2, %v5843_v25  ;;  %v2258_v63 = vmul.f32 %v2096_v33, %v2096_v33  ;;  %v5356_v37 = vpop.f32.mrf.mxu3 }
 0x1db   : > { %2035 = vmatmul.f32.gmra.mxu2 %v1347_v62  ;;  %v2411_v24 = vadd.f32 %v5214_v58, %v1757_v40  ;;  %v2412_v56 = vadd.f32 %v5222_v11, %v2096_v33  ;;  %v1121_v33 = vpop.permute.xlu2 %1120 }
 0x1dc   : > { %v2312_v54 = vadd.f32 %v2311_v59, %v2257_v47  ;;  %v2349_v26 = vadd.f32 %v2348_v8, %v2258_v63  ;;  %v1119_v59 = vpop.permute.xlu0 %1118  ;;  %v3539_v8 = vunpack.i.h.bf16 %v3537_v46  ;;  %v5911_v47 = vld [vmem:[#allocation33_spill] sm:$0xff] }
 0x1dd   : > { %v1646_v5 = vpop.f32.mrf.mxu1  ;;  %v1349_v40 = vsel %vm1224_vm4, %v1317_v34, %v1119_v59  ;;  %v5917_v34 = vld [vmem:[#allocation56_spill] sm:$0xff] }
 0x1de   : > { %v1988_v0 = vpop.f32.mrf.mxu2  ;;  %v1647_v25 = vadd.f32 %v1646_v5, %v5905_v52 }
 0x1df   : > { %v2098_v51 = vpop.f32.mrf.mxu0  ;;  %v1989_v12 = vadd.f32 %v1988_v0, %v5254_v50  ;;  %v5914_v0 = vld [vmem:[#allocation60_spill] sm:$0xff] }
 0x1e0   : > { %v1760_v31 = vadd.f32 %v5906_v49, %v1647_v25  ;;  %v2099_v19 = vadd.f32 %v2098_v51, %v1986_v20  ;;  %1693 = vmatmul.f32.gmra.mxu1 %v1346_v44  ;;  %v1027_v2 = vpop.permute.xlu1 %1026 }
 0x1e2   : > { %v2175_v16 = vadd.f32 %v2174_v61, %v1760_v31  ;;  %v2259_v13 = vmul.f32 %v1760_v31, %v1760_v31  ;;  %v2413_v14 = vadd.f32 %v5214_v58, %v1760_v31  ;;  %v2212_v43 = vadd.f32 %v2211_v1, %v2099_v19  ;;  %2804 = vmatmul.msk.f32.gmra.mxu0 %vm1158_vm2, %v5908_v32  ;;  %v5912_v1 = vld [vmem:[#allocation52_spill] sm:$0xff]  ;;  %v5915_v31 = vld [vmem:[#allocation63_spill] sm:$0xff] }
 0x1e3   : > { %v2260_v7 = vmul.f32 %v2099_v19, %v2099_v19  ;;  %v2414_v44 = vadd.f32 %v5222_v11, %v2099_v19  ;;  %2038 = vmatmul.f32.gmra.mxu2 %v1348_v53  ;;  %v1286_v29 = vsel %vm1158_vm2, %v5912_v1, %v3539_v8  ;;  %v1123_v32 = vpop.permute.xlu2 %1122 }
 0x1e4   : > { %v2313_v38 = vadd.f32 %v2312_v54, %v2259_v13  ;;  %v2870_v18 = vpack.c.bf16 %v2413_v14, %v2411_v24  ;;  %v1318_v54 = vsel %vm1191_vm3, %v1286_v29, %v1025_v17  ;;  %v5372_v24 = vpop.f32.mrf.mxu3  ;;  %v5916_v13 = vld [vmem:[#allocation35_spill] sm:$0xff] }
 0x1e5   : > { %v2350_v15 = vadd.f32 %v2349_v26, %v2260_v7  ;;  %v2950_v3 = vpack.c.bf16 %v2414_v44, %v2412_v56  ;;  %v1649_v22 = vpop.f32.mrf.mxu1  ;;  %v1350_v51 = vsel %vm1224_vm4, %v1318_v54, %v1121_v33  ;;  %v5921_v54 = vld [vmem:[#allocation5_spill] sm:$0xff] }
 0x1e6   : > { %3010 = vst [vmem:[%s5239_s23 + $0x40] sm:$0xff] %v2870_v18   ;;  %v1991_v39 = vpop.f32.mrf.mxu2  ;;  %v1650_v41 = vadd.f32 %v1649_v22, %v5909_v35 }
 0x1e7   : > { %3026 = vst [vmem:[%s5239_s23 + $0x48] sm:$0xff] %v2950_v3   ;;  %v2101_v27 = vpop.f32.mrf.mxu0  ;;  %v1992_v5 = vadd.f32 %v1991_v39, %v5270_v21  ;;  %v5918_v39 = vld [vmem:[#allocation61_spill] sm:$0xff] }
 0x1e8   : > { %v1763_v10 = vadd.f32 %v5910_v36, %v1650_v41  ;;  %v2102_v4 = vadd.f32 %v2101_v27, %v1989_v12  ;;  %1696 = vmatmul.f32.gmra.mxu1 %v1347_v62  ;;  %v931_v62 = vpop.permute.xlu0 %930 }
 0x1e9   : > { %v1287_v19 = vsel %vm1158_vm2, %v5915_v31, %v931_v62 }
 0x1ea   : > { %v2176_v48 = vadd.f32 %v2175_v16, %v1763_v10  ;;  %v2261_v61 = vmul.f32 %v1763_v10, %v1763_v10  ;;  %v2213_v50 = vadd.f32 %v2212_v43, %v2102_v4  ;;  %2805 = vmatmul.msk.f32.gmra.mxu0 %vm1158_vm2, %v5911_v47  ;;  %v2262_v46 = vmul.f32 %v2102_v4, %v2102_v4 }
 0x1eb   : > { %2041 = vmatmul.f32.gmra.mxu2 %v1349_v40  ;;  %v2415_v49 = vadd.f32 %v5214_v58, %v1763_v10 }
 0x1ec   : > { %v2314_v63 = vadd.f32 %v2313_v38, %v2261_v61  ;;  %v2351_v45 = vadd.f32 %v2350_v15, %v2262_v46  ;;  %v1319_v15 = vsel %vm1191_vm3, %v1287_v19, %v1027_v2  ;;  %v1125_v46 = vpop.permute.xlu2 %1124 }
 0x1ed   : > { %v1652_v26 = vpop.f32.mrf.mxu1  ;;  %v1351_v17 = vsel %vm1224_vm4, %v1319_v15, %v1123_v32 }
 0x1ee   : > { %v1994_v30 = vpop.f32.mrf.mxu2  ;;  %v1653_v23 = vadd.f32 %v1652_v26, %v5913_v42 }
 0x1ef   : > { %v2104_v20 = vpop.f32.mrf.mxu0  ;;  %v1995_v3 = vadd.f32 %v1994_v30, %v5285_v28  ;;  %v5920_v28 = vld [vmem:[#allocation2_spill] sm:$0xff] }
 0x1f0   : > { %v1766_v52 = vadd.f32 %v5914_v0, %v1653_v23  ;;  %v2105_v25 = vadd.f32 %v2104_v20, %v1992_v5  ;;  %1699 = vmatmul.f32.gmra.mxu1 %v1348_v53  ;;  %v2416_v53 = vadd.f32 %v5222_v11, %v2102_v4  ;;  %v933_v8 = vpop.permute.xlu0 %932  ;;  %v5919_v4 = vld [vmem:[#allocation38_spill] sm:$0xff]  ;;  %v5922_v5 = vld [vmem:[#allocation47_spill] sm:$0xff] }
 0x1f1   : > { %v1288_v33 = vsel %vm1158_vm2, %v5920_v28, %v933_v8 }
 0x1f2   : > { %v2177_v9 = vadd.f32 %v2176_v48, %v1766_v52  ;;  %v2263_v21 = vmul.f32 %v1766_v52, %v1766_v52  ;;  %v2417_v60 = vadd.f32 %v5214_v58, %v1766_v52  ;;  %v2214_v16 = vadd.f32 %v2213_v50, %v2105_v25  ;;  %2806 = vmatmul.msk.f32.gmra.mxu0 %vm1158_vm2, %v5916_v13  ;;  %v1029_v48 = vpop.permute.xlu1 %1028  ;;  %v5390_v50 = vpop.f32.mrf.mxu3 }
 0x1f3   : > { %v2264_v14 = vmul.f32 %v2105_v25, %v2105_v25  ;;  %v2418_v43 = vadd.f32 %v5222_v11, %v2105_v25  ;;  %2044 = vmatmul.f32.gmra.mxu2 %v1350_v51 }
 0x1f4   : > { %v2315_v56 = vadd.f32 %v2314_v63, %v2263_v21  ;;  %v2875_v7 = vpack.c.bf16 %v2417_v60, %v2415_v49  ;;  %v5923_v49 = vld [vmem:[#allocation41_spill] sm:$0xff] }
 0x1f5   : > { %v2352_v44 = vadd.f32 %v2351_v45, %v2264_v14  ;;  %v2955_v38 = vpack.c.bf16 %v2418_v43, %v2416_v53  ;;  %v1655_v18 = vpop.f32.mrf.mxu1  ;;  %v5924_v43 = vld [vmem:[#allocation10_spill] sm:$0xff] }
 0x1f6   : > { %3011 = vst [vmem:[%s5239_s23 + $0x50] sm:$0xff] %v2875_v7   ;;  %v1997_v22 = vpop.f32.mrf.mxu2  ;;  %v1656_v59 = vadd.f32 %v1655_v18, %v5917_v34  ;;  %v5925_v7 = vld [vmem:[#allocation39_spill] sm:$0xff] }
 0x1f7   : > { %3027 = vst [vmem:[%s5239_s23 + $0x58] sm:$0xff] %v2955_v38   ;;  %v2107_v12 = vpop.f32.mrf.mxu0  ;;  %v1998_v63 = vadd.f32 %v1997_v22, %v5304_v57  ;;  %v5926_v22 = vld [vmem:[#allocation45_spill] sm:$0xff] }
 0x1f8   : > { %v1769_v35 = vadd.f32 %v5918_v39, %v1656_v59  ;;  %v2108_v41 = vadd.f32 %v2107_v12, %v1995_v3  ;;  %1702 = vmatmul.f32.gmra.mxu1 %v1349_v40  ;;  %v1320_v40 = vsel %vm1191_vm3, %v1288_v33, %v1029_v48 }
 0x1f9   : > { %v1352_v23 = vsel %vm1224_vm4, %v1320_v40, %v1125_v46 }
 0x1fa   : > { %v2178_v27 = vadd.f32 %v2177_v9, %v1769_v35  ;;  %v2265_v36 = vmul.f32 %v1769_v35, %v1769_v35  ;;  %v2215_v10 = vadd.f32 %v2214_v16, %v2108_v41  ;;  %2807 = vmatmul.msk.f32.gmra.mxu0 %vm1158_vm2, %v5919_v4  ;;  %v2266_v61 = vmul.f32 %v2108_v41, %v2108_v41  ;;  %v5403_v13 = vpop.f32.mrf.mxu3 }
 0x1fb   : > { %2047 = vmatmul.f32.gmra.mxu2 %v1351_v17  ;;  %v2419_v20 = vadd.f32 %v5214_v58, %v1769_v35  ;;  %v2420_v57 = vadd.f32 %v5222_v11, %v2108_v41  ;;  %v5927_v35 = vld [vmem:[#allocation12_spill] sm:$0xff] }
 0x1fc   : > { %v2316_v47 = vadd.f32 %v2315_v56, %v2265_v36  ;;  %v2353_v1 = vadd.f32 %v2352_v44, %v2266_v61 }
 0x1fd   : > { %v1658_v29 = vpop.f32.mrf.mxu1 }
 0x1fe   : > { %v2000_v45 = vpop.f32.mrf.mxu2  ;;  %v1659_v26 = vadd.f32 %v1658_v29, %v5921_v54 }
 0x1ff   : > { %v2110_v62 = vpop.f32.mrf.mxu0  ;;  %v2001_v53 = vadd.f32 %v2000_v45, %v5323_v6 }
 0x200   : > { %v1772_v30 = vadd.f32 %v5922_v5, %v1659_v26  ;;  %v2111_v42 = vadd.f32 %v2110_v62, %v1998_v63  ;;  %1705 = vmatmul.f32.gmra.mxu1 %v1350_v51  ;;  %v5929_v5 = vld [vmem:[#allocation8_spill] sm:$0xff] }
 0x202   : > { %v2179_v0 = vadd.f32 %v2178_v27, %v1772_v30  ;;  %v2267_v52 = vmul.f32 %v1772_v30, %v1772_v30  ;;  %v2421_v25 = vadd.f32 %v5214_v58, %v1772_v30  ;;  %v2216_v2 = vadd.f32 %v2215_v10, %v2111_v42  ;;  %2808 = vmatmul.msk.f32.gmra.mxu0 %vm1158_vm2, %v5923_v49  ;;  %v5414_v36 = vpop.f32.mrf.mxu3  ;;  %v5928_v10 = vld [vmem:[#allocation66_spill] sm:$0xff] }
 0x203   : > { %v2268_v31 = vmul.f32 %v2111_v42, %v2111_v42  ;;  %v2422_v19 = vadd.f32 %v5222_v11, %v2111_v42  ;;  %2050 = vmatmul.f32.gmra.mxu2 %v1352_v23 }
 0x204   : > { %v2317_v51 = vadd.f32 %v2316_v47, %v2267_v52  ;;  %v2880_v9 = vpack.c.bf16 %v2421_v25, %v2419_v20 }
 0x205   : > { %v2354_v21 = vadd.f32 %v2353_v1, %v2268_v31  ;;  %v2960_v60 = vpack.c.bf16 %v2422_v19, %v2420_v57  ;;  %v1661_v16 = vpop.f32.mrf.mxu1 }
 0x206   : > { %3012 = vst [vmem:[%s5239_s23 + $0x60] sm:$0xff] %v2880_v9   ;;  %v2003_v14 = vpop.f32.mrf.mxu2  ;;  %v1662_v32 = vadd.f32 %v1661_v16, %v5924_v43 }
 0x207   : > { %3028 = vst [vmem:[%s5239_s23 + $0x68] sm:$0xff] %v2960_v60   ;;  %v2113_v56 = vpop.f32.mrf.mxu0  ;;  %v2004_v8 = vadd.f32 %v2003_v14, %v5337_v55 }
 0x208   : > { %v1775_v44 = vadd.f32 %v5925_v7, %v1662_v32  ;;  %v2114_v38 = vadd.f32 %v2113_v56, %v2001_v53  ;;  %1708 = vmatmul.f32.gmra.mxu1 %v1351_v17  ;;  %v5932_v53 = vld [vmem:[#allocation9_spill] sm:$0xff] }
 0x20a   : > { %v2180_v18 = vadd.f32 %v2179_v0, %v1775_v44  ;;  %v2269_v15 = vmul.f32 %v1775_v44, %v1775_v44  ;;  %v2217_v3 = vadd.f32 %v2216_v2, %v2114_v38  ;;  %2809 = vmatmul.msk.f32.gmra.mxu0 %vm1158_vm2, %v5926_v22  ;;  %v2270_v34 = vmul.f32 %v2114_v38, %v2114_v38  ;;  %v5426_v52 = vpop.f32.mrf.mxu3 }
 0x20b   : > { %v2423_v28 = vadd.f32 %v5214_v58, %v1775_v44  ;;  %v2424_v55 = vadd.f32 %v5222_v11, %v2114_v38 }
 0x20c   : > { %v2318_v59 = vadd.f32 %v2317_v51, %v2269_v15  ;;  %v2355_v12 = vadd.f32 %v2354_v21, %v2270_v34  ;;  %v5931_v21 = vld [vmem:[#allocation11_spill] sm:$0xff] }
 0x20d   : > { %v1664_v6 = vpop.f32.mrf.mxu1 }
 0x20e   : > { %v2006_v39 = vpop.f32.mrf.mxu2  ;;  %v1665_v41 = vadd.f32 %v1664_v6, %v5927_v35  ;;  %v5933_v35 = vld [vmem:[#allocation28_spill] sm:$0xff] }
 0x20f   : > { %v2116_v27 = vpop.f32.mrf.mxu0  ;;  %v2007_v26 = vadd.f32 %v2006_v39, %v5356_v37 }
 0x210   : > { %v1778_v17 = vadd.f32 %v5928_v10, %v1665_v41  ;;  %v2117_v4 = vadd.f32 %v2116_v27, %v2004_v8  ;;  %1711 = vmatmul.f32.gmra.mxu1 %v1352_v23  ;;  %v5930_v23 = vld [vmem:[#allocation67_spill] sm:$0xff]  ;;  %v5934_v10 = vld [vmem:[#allocation29_spill] sm:$0xff] }
 0x212   : > { %v2181_v33 = vadd.f32 %v2180_v18, %v1778_v17  ;;  %v2271_v48 = vmul.f32 %v1778_v17, %v1778_v17  ;;  %v2425_v61 = vadd.f32 %v5214_v58, %v1778_v17  ;;  %v2218_v47 = vadd.f32 %v2217_v3, %v2117_v4  ;;  %v5435_v3 = vpop.f32.mrf.mxu3 }
 0x213   : > { %v2272_v1 = vmul.f32 %v2117_v4, %v2117_v4  ;;  %v2426_v29 = vadd.f32 %v5222_v11, %v2117_v4 }
 0x214   : > { %v2319_v40 = vadd.f32 %v2318_v59, %v2271_v48  ;;  %v2885_v46 = vpack.c.bf16 %v2425_v61, %v2423_v28 }
 0x215   : > { %v2356_v63 = vadd.f32 %v2355_v12, %v2272_v1  ;;  %v2965_v45 = vpack.c.bf16 %v2426_v29, %v2424_v55  ;;  %v1667_v54 = vpop.f32.mrf.mxu1 }
 0x216   : > { %3013 = vst [vmem:[%s5239_s23 + $0x70] sm:$0xff] %v2885_v46   ;;  %v2009_v62 = vpop.f32.mrf.mxu2  ;;  %v1668_v30 = vadd.f32 %v1667_v54, %v5929_v5  ;;  %v5935_v46 = vld [vmem:[#allocation19_spill] sm:$0xff]  ;;  %v5936_v54 = vld [vmem:[#allocation18_spill] sm:$0xff] }
 0x217   : > { %3029 = vst [vmem:[%s5239_s23 + $0x78] sm:$0xff] %v2965_v45   ;;  %v2119_v42 = vpop.f32.mrf.mxu0  ;;  %v2010_v37 = vadd.f32 %v2009_v62, %v5372_v24 }
 0x218   : > { %v1781_v20 = vadd.f32 %v5930_v23, %v1668_v30  ;;  %v2120_v0 = vadd.f32 %v2119_v42, %v2007_v26 }
 0x21a   : > { %v2182_v25 = vadd.f32 %v2181_v33, %v1781_v20  ;;  %v2273_v2 = vmul.f32 %v1781_v20, %v1781_v20  ;;  %v2219_v49 = vadd.f32 %v2218_v47, %v2120_v0  ;;  %v2274_v57 = vmul.f32 %v2120_v0, %v2120_v0  ;;  %v1914_v29 = vpop.f32.mrf.mxu3 }
 0x21b   : > { %v2427_v32 = vadd.f32 %v5214_v58, %v1781_v20  ;;  %v2428_v18 = vadd.f32 %v5222_v11, %v2120_v0 }
 0x21c   : > { %v2320_v31 = vadd.f32 %v2319_v40, %v2273_v2  ;;  %v2357_v19 = vadd.f32 %v2356_v63, %v2274_v57 }
 0x21d   : > { %v1670_v51 = vpop.f32.mrf.mxu1 }
 0x21e   : > { %v2012_v9 = vpop.f32.mrf.mxu2  ;;  %v1671_v60 = vadd.f32 %v1670_v51, %v5931_v21  ;;  %v5937_v21 = vld [vmem:[#allocation22_spill] sm:$0xff] }
 0x21f   : > { %v2122_v16 = vpop.f32.mrf.mxu0  ;;  %v2013_v8 = vadd.f32 %v2012_v9, %v5390_v50 }
 0x220   : > { %v1784_v14 = vadd.f32 %v5932_v53, %v1671_v60  ;;  %v2123_v43 = vadd.f32 %v2122_v16, %v2010_v37 }
 0x222   : > { %v2183_v56 = vadd.f32 %v2182_v25, %v1784_v14  ;;  %v2275_v7 = vmul.f32 %v1784_v14, %v1784_v14  ;;  %v2429_v44 = vadd.f32 %v5214_v58, %v1784_v14  ;;  %v2220_v38 = vadd.f32 %v2219_v49, %v2123_v43  ;;  %v1917_v9 = vpop.f32.mrf.mxu3 }
 0x223   : > { %v2276_v15 = vmul.f32 %v2123_v43, %v2123_v43  ;;  %v2430_v24 = vadd.f32 %v5222_v11, %v2123_v43  ;;  %v5938_v43 = vld [vmem:[#allocation32_spill] sm:$0xff] }
 0x224   : > { %v2321_v22 = vadd.f32 %v2320_v31, %v2275_v7  ;;  %v2890_v34 = vpack.c.bf16 %v2429_v44, %v2427_v32  ;;  %v5939_v7 = vld [vmem:[#allocation37_spill] sm:$0xff] }
 0x225   : > { %v2358_v59 = vadd.f32 %v2357_v19, %v2276_v15  ;;  %v2970_v12 = vpack.c.bf16 %v2430_v24, %v2428_v18  ;;  %v1673_v6 = vpop.f32.mrf.mxu1  ;;  %v5940_v15 = vld [vmem:[#allocation17_spill] sm:$0xff] }
 0x226   : > { %3014 = vst [vmem:[%s5239_s23 + $0x80] sm:$0xff] %v2890_v34   ;;  %v2015_v39 = vpop.f32.mrf.mxu2  ;;  %v1674_v41 = vadd.f32 %v1673_v6, %v5933_v35 }
 0x227   : > { %3030 = vst [vmem:[%s5239_s23 + $0x88] sm:$0xff] %v2970_v12   ;;  %v2125_v27 = vpop.f32.mrf.mxu0  ;;  %v2016_v40 = vadd.f32 %v2015_v39, %v5403_v13 }
 0x228   : > { %v1787_v17 = vadd.f32 %v5934_v10, %v1674_v41  ;;  %v2126_v4 = vadd.f32 %v2125_v27, %v2013_v8  ;;  %v5941_v27 = vld [vmem:[#allocation27_spill] sm:$0xff] }
 0x22a   : > { %v2184_v28 = vadd.f32 %v2183_v56, %v1787_v17  ;;  %v2277_v33 = vmul.f32 %v1787_v17, %v1787_v17  ;;  %v2221_v48 = vadd.f32 %v2220_v38, %v2126_v4  ;;  %v2278_v61 = vmul.f32 %v2126_v4, %v2126_v4 }
 0x22b   : > { %v2431_v5 = vadd.f32 %v5214_v58, %v1787_v17  ;;  %v2432_v13 = vadd.f32 %v5222_v11, %v2126_v4 }
 0x22c   : > { %v2322_v47 = vadd.f32 %v2321_v22, %v2277_v33  ;;  %v2359_v55 = vadd.f32 %v2358_v59, %v2278_v61 }
 0x22d   : > { %v1676_v1 = vpop.f32.mrf.mxu1 }
 0x22e   : > { %v2018_v50 = vpop.f32.mrf.mxu2  ;;  %v1677_v63 = vadd.f32 %v1676_v1, %v5935_v46  ;;  %v5944_v46 = vld [vmem:[#allocation55_spill] sm:$0xff] }
 0x22f   : > { %v2128_v45 = vpop.f32.mrf.mxu0  ;;  %v2019_v16 = vadd.f32 %v2018_v50, %v5414_v36  ;;  %v1920_v36 = vpop.f32.mrf.mxu3 }
 0x230   : > { %v1790_v26 = vadd.f32 %v5936_v54, %v1677_v63  ;;  %v2129_v62 = vadd.f32 %v2128_v45, %v2016_v40 }
 0x232   : > { %v5446_v30 = vadd.f32 %v2184_v28, %v1790_v26  ;;  %v2279_v42 = vmul.f32 %v1790_v26, %v1790_v26  ;;  %v2433_v23 = vadd.f32 %v5214_v58, %v1790_v26  ;;  %v5449_v20 = vadd.f32 %v2221_v48, %v2129_v62  ;;  %v5942_v48 = vld [vmem:[#allocation42_spill] sm:$0xff] }
 0x233   : > { %v2280_v0 = vmul.f32 %v2129_v62, %v2129_v62  ;;  %v2434_v25 = vadd.f32 %v5222_v11, %v2129_v62 }
 0x234   : > { %v5453_v2 = vadd.f32 %v2322_v47, %v2279_v42  ;;  %v2895_v49 = vpack.c.bf16 %v2433_v23, %v2431_v5 }
 0x235   : > { %v5455_v57 = vadd.f32 %v2359_v55, %v2280_v0  ;;  %v2975_v31 = vpack.c.bf16 %v2434_v25, %v2432_v13  ;;  %v1679_v19 = vpop.f32.mrf.mxu1  ;;  %v5943_v55 = vld [vmem:[#allocation44_spill] sm:$0xff]  ;;  %v5945_v25 = vld [vmem:[#allocation62_spill] sm:$0xff] }
 0x236   : > { %3015 = vst [vmem:[%s5239_s23 + $0x90] sm:$0xff] %v2895_v49   ;;  %v2021_v51 = vpop.f32.mrf.mxu2  ;;  %v1680_v60 = vadd.f32 %v1679_v19, %v5937_v21 }
 0x237   : > { %3031 = vst [vmem:[%s5239_s23 + $0x98] sm:$0xff] %v2975_v31   ;;  %v2131_v37 = vpop.f32.mrf.mxu0  ;;  %v2022_v14 = vadd.f32 %v2021_v51, %v5426_v52  ;;  %v1923_v17 = vpop.f32.mrf.mxu3 }
 0x238   : > { %v5463_v32 = vadd.f32 %v5938_v43, %v1680_v60  ;;  %v5466_v38 = vadd.f32 %v2131_v37, %v2019_v16  ;;  %v5946_v37 = vld [vmem:[#allocation58_spill] sm:$0xff]  ;;  %v5947_v16 = vld [vmem:[#allocation65_spill] sm:$0xff] }
 0x23a   : > { %v2435_v52 = vadd.f32 %v5214_v58, %v5463_v32  ;;  %v2436_v59 = vadd.f32 %v5222_v11, %v5466_v38 }
 0x23d   : > { %v1682_v53 = vpop.f32.mrf.mxu1 }
 0x23e   : > { %v2024_v56 = vpop.f32.mrf.mxu2  ;;  %v1683_v44 = vadd.f32 %v1682_v53, %v5939_v7  ;;  %v5948_v7 = vld [vmem:[#allocation59_spill] sm:$0xff] }
 0x23f   : > { %v2134_v18 = vpop.f32.mrf.mxu0  ;;  %v2025_v4 = vadd.f32 %v2024_v56, %v5435_v3  ;;  %v1926_v23 = vpop.f32.mrf.mxu3 }
 0x240   : > { %v5469_v24 = vadd.f32 %v5940_v15, %v1683_v44  ;;  %v5471_v22 = vadd.f32 %v2134_v18, %v2022_v14 }
 0x242   : > { %v2437_v34 = vadd.f32 %v5214_v58, %v5469_v24  ;;  %v2438_v12 = vadd.f32 %v5222_v11, %v5471_v22 }
 0x244   : > { %v2900_v6 = vpack.c.bf16 %v2437_v34, %v2435_v52  ;;  %v2980_v8 = vpack.c.bf16 %v2438_v12, %v2436_v59 }
 0x245   : > { %v1685_v39 = vpop.f32.mrf.mxu1 }
 0x246   : > { %3016 = vst [vmem:[%s5239_s23 + $0xa0] sm:$0xff] %v2900_v6   ;;  %v2027_v35 = vpop.f32.mrf.mxu2  ;;  %v1686_v10 = vadd.f32 %v1685_v39, %v5941_v27 }
 0x247   : > { %3032 = vst [vmem:[%s5239_s23 + $0xa8] sm:$0xff] %v2980_v8   ;;  %v2137_v41 = vpop.f32.mrf.mxu0  ;;  %v2028_v33 = vadd.f32 %v2027_v35, %v1914_v29  ;;  %v1929_v56 = vpop.f32.mrf.mxu3  ;;  %v5949_v35 = vld [vmem:[#allocation50_spill] sm:$0xff] }
 0x248   : > { %v5486_v61 = vadd.f32 %v5942_v48, %v1686_v10  ;;  %v5489_v40 = vadd.f32 %v2137_v41, %v2025_v4 }
 0x24a   : > { %v2439_v3 = vadd.f32 %v5214_v58, %v5486_v61  ;;  %v2440_v54 = vadd.f32 %v5222_v11, %v5489_v40 }
 0x24d   : > { %v1688_v28 = vpop.f32.mrf.mxu1 }
 0x24e   : > { %v2030_v47 = vpop.f32.mrf.mxu2  ;;  %v1689_v1 = vadd.f32 %v1688_v28, %v5943_v55  ;;  %v5950_v28 = vld [vmem:[#allocation21_spill] sm:$0xff] }
 0x24f   : > { %v2140_v50 = vpop.f32.mrf.mxu0  ;;  %v2031_v31 = vadd.f32 %v2030_v47, %v1917_v9  ;;  %v1932_v39 = vpop.f32.mrf.mxu3  ;;  %v5951_v47 = vld [vmem:[#allocation54_spill] sm:$0xff] }
 0x250   : > { %v5492_v63 = vadd.f32 %v5944_v46, %v1689_v1  ;;  %v5494_v45 = vadd.f32 %v2140_v50, %v2028_v33  ;;  %v5952_v46 = vld [vmem:[#allocation6_spill] sm:$0xff] }
 0x252   : > { %v2441_v29 = vadd.f32 %v5214_v58, %v5492_v63  ;;  %v2442_v26 = vadd.f32 %v5222_v11, %v5494_v45 }
 0x254   : > { %v2905_v62 = vpack.c.bf16 %v2441_v29, %v2439_v3  ;;  %v2985_v5 = vpack.c.bf16 %v2442_v26, %v2440_v54 }
 0x255   : > { %v1691_v42 = vpop.f32.mrf.mxu1 }
 0x256   : > { %3017 = vst [vmem:[%s5239_s23 + $0xb0] sm:$0xff] %v2905_v62   ;;  %v2033_v13 = vpop.f32.mrf.mxu2  ;;  %v1692_v49 = vadd.f32 %v1691_v42, %v5945_v25  ;;  %v2281_v42 = vmul.f32 %v5463_v32, %v5463_v32 }
 0x257   : > { %3033 = vst [vmem:[%s5239_s23 + $0xb8] sm:$0xff] %v2985_v5   ;;  %v2143_v0 = vpop.f32.mrf.mxu0  ;;  %v2034_v51 = vadd.f32 %v2033_v13, %v1920_v36  ;;  %v5545_v5 = vpop.f32.mrf.mxu3  ;;  %v2282_v13 = vmul.f32 %v5466_v38, %v5466_v38 }
 0x258   : > { %v5508_v21 = vadd.f32 %v5946_v37, %v1692_v49  ;;  %v5511_v14 = vadd.f32 %v2143_v0, %v2031_v31  ;;  %v2223_v49 = vadd.f32 %v5449_v20, %v5466_v38  ;;  %v2283_v31 = vmul.f32 %v5469_v24, %v5469_v24 }
 0x259   : > { %v2285_v20 = vmul.f32 %v5486_v61, %v5486_v61  ;;  %v2361_v38 = vadd.f32 %v5455_v57, %v2282_v13  ;;  %v2287_v57 = vmul.f32 %v5492_v63, %v5492_v63 }
 0x25a   : > { %v2443_v9 = vadd.f32 %v5214_v58, %v5508_v21  ;;  %v2444_v36 = vadd.f32 %v5222_v11, %v5511_v14 }
 0x25d   : > { %v1694_v19 = vpop.f32.mrf.mxu1 }
 0x25e   : > { %v2036_v60 = vpop.f32.mrf.mxu2  ;;  %v1695_v53 = vadd.f32 %v1694_v19, %v5947_v16  ;;  %v2324_v16 = vadd.f32 %v5453_v2, %v2281_v42  ;;  %v2288_v2 = vmul.f32 %v5494_v45, %v5494_v45 }
 0x25f   : > { %v2146_v43 = vpop.f32.mrf.mxu0  ;;  %v2037_v27 = vadd.f32 %v2036_v60, %v1923_v17  ;;  %v2186_v60 = vadd.f32 %v5446_v30, %v5463_v32 }
 0x260   : > { %v5514_v44 = vadd.f32 %v5948_v7, %v1695_v53  ;;  %v5516_v18 = vadd.f32 %v2146_v43, %v2034_v51  ;;  %v2284_v51 = vmul.f32 %v5471_v22, %v5471_v22  ;;  %v2224_v53 = vadd.f32 %v2223_v49, %v5471_v22 }
 0x261   : > { %v2286_v43 = vmul.f32 %v5489_v40, %v5489_v40  ;;  %v2187_v7 = vadd.f32 %v2186_v60, %v5469_v24  ;;  %v2289_v24 = vmul.f32 %v5508_v21, %v5508_v21 }
 0x262   : > { %v2445_v15 = vadd.f32 %v5214_v58, %v5514_v44  ;;  %v2446_v52 = vadd.f32 %v5222_v11, %v5516_v18  ;;  %v2362_v30 = vadd.f32 %v2361_v38, %v2284_v51 }
 0x263   : > { %v2188_v32 = vadd.f32 %v2187_v7, %v5486_v61  ;;  %v5954_v61 = vld [vmem:[#allocation26_spill] sm:$0xff] }
 0x264   : > { %v2910_v34 = vpack.c.bf16 %v2445_v15, %v2443_v9  ;;  %v2990_v59 = vpack.c.bf16 %v2446_v52, %v2444_v36  ;;  %v2325_v9 = vadd.f32 %v2324_v16, %v2283_v31  ;;  %v2225_v15 = vadd.f32 %v2224_v53, %v5489_v40  ;;  %v5953_v36 = vld [vmem:[#allocation53_spill] sm:$0xff] }
 0x265   : > { %v1697_v12 = vpop.f32.mrf.mxu1  ;;  %v2290_v40 = vmul.f32 %v5511_v14, %v5511_v14 }
 0x266   : > { %3018 = vst [vmem:[%s5239_s23 + $0xc0] sm:$0xff] %v2910_v34   ;;  %v2039_v6 = vpop.f32.mrf.mxu2  ;;  %v1698_v41 = vadd.f32 %v1697_v12, %v5949_v35  ;;  %v2326_v22 = vadd.f32 %v2325_v9, %v2285_v20  ;;  %v2226_v34 = vadd.f32 %v2225_v15, %v5494_v45  ;;  %v2189_v45 = vadd.f32 %v2188_v32, %v5492_v63  ;;  %v5957_v9 = vld [vmem:[#allocation68_spill] sm:$0xff] }
 0x267   : > { %3034 = vst [vmem:[%s5239_s23 + $0xc8] sm:$0xff] %v2990_v59   ;;  %v2149_v8 = vpop.f32.mrf.mxu0  ;;  %v2040_v4 = vadd.f32 %v2039_v6, %v1926_v23  ;;  %v2363_v59 = vadd.f32 %v2362_v30, %v2286_v43 }
 0x268   : > { %v5530_v33 = vadd.f32 %v5950_v28, %v1698_v41  ;;  %v2150_v1 = vadd.f32 %v2149_v8, %v2037_v27  ;;  %v1938_v8 = vpop.f32.mrf.mxu3  ;;  %v2227_v35 = vadd.f32 %v2226_v34, %v5511_v14 }
 0x26a   : > { %v2447_v17 = vadd.f32 %v5214_v58, %v5530_v33  ;;  %v2448_v26 = vadd.f32 %v5222_v11, %v2150_v1  ;;  %v2294_v42 = vmul.f32 %v2150_v1, %v2150_v1 }
 0x26d   : > { %v1700_v10 = vpop.f32.mrf.mxu1 }
 0x26e   : > { %v2042_v48 = vpop.f32.mrf.mxu2  ;;  %v1701_v55 = vadd.f32 %v1700_v10, %v5951_v47  ;;  %v2364_v47 = vadd.f32 %v2363_v59, %v2288_v2 }
 0x26f   : > { %v2152_v50 = vpop.f32.mrf.mxu0  ;;  %v2043_v12 = vadd.f32 %v2042_v48, %v1929_v56  ;;  %v2228_v56 = vadd.f32 %v2227_v35, %v5516_v18  ;;  %v5956_v48 = vld [vmem:[#allocation15_spill] sm:$0xff] }
 0x270   : > { %v5534_v3 = vadd.f32 %v5952_v46, %v1701_v55  ;;  %v5536_v29 = vadd.f32 %v2152_v50, %v2040_v4  ;;  %v5955_v4 = vld [vmem:[#allocation3_spill] sm:$0xff]  ;;  %v2292_v55 = vmul.f32 %v5516_v18, %v5516_v18 }
 0x272   : > { %v2449_v54 = vadd.f32 %v5214_v58, %v5534_v3  ;;  %v2450_v62 = vadd.f32 %v5222_v11, %v5536_v29  ;;  %v2296_v18 = vmul.f32 %v5536_v29, %v5536_v29  ;;  %v2295_v38 = vmul.f32 %v5534_v3, %v5534_v3 }
 0x274   : > { %v2915_v23 = vpack.c.bf16 %v2449_v54, %v2447_v17  ;;  %v2995_v0 = vpack.c.bf16 %v2450_v62, %v2448_v26  ;;  %v2327_v17 = vadd.f32 %v2326_v22, %v2287_v57  ;;  %v2365_v26 = vadd.f32 %v2364_v47, %v2290_v40  ;;  %v5958_v40 = vld [vmem:[#allocation34_spill] sm:$0xff] }
 0x275   : > { %v1703_v25 = vpop.f32.mrf.mxu1  ;;  %v2291_v62 = vmul.f32 %v5514_v44, %v5514_v44 }
 0x276   : > { %3019 = vst [vmem:[%s5239_s23 + $0xd0] sm:$0xff] %v2915_v23   ;;  %v2045_v19 = vpop.f32.mrf.mxu2  ;;  %v1704_v52 = vadd.f32 %v1703_v25, %v5953_v36  ;;  %v2328_v63 = vadd.f32 %v2327_v17, %v2289_v24  ;;  %v2229_v23 = vadd.f32 %v2228_v56, %v2150_v1  ;;  %v2366_v25 = vadd.f32 %v2365_v26, %v2292_v55  ;;  %v2164_v36 = vpop.f32.mrf.mxu3 }
 0x277   : > { %3035 = vst [vmem:[%s5239_s23 + $0xd8] sm:$0xff] %v2995_v0   ;;  %v2155_v37 = vpop.f32.mrf.mxu0  ;;  %v2046_v41 = vadd.f32 %v2045_v19, %v1932_v39  ;;  %v2190_v39 = vadd.f32 %v2189_v45, %v5508_v21  ;;  %v2293_v19 = vmul.f32 %v5530_v33, %v5530_v33 }
 0x278   : > { %v1817_v27 = vadd.f32 %v5954_v61, %v1704_v52  ;;  %v2156_v50 = vadd.f32 %v2155_v37, %v2043_v12  ;;  %v2230_v1 = vadd.f32 %v2229_v23, %v5536_v29  ;;  %v2329_v37 = vadd.f32 %v2328_v63, %v2291_v62  ;;  %v5960_v23 = vld [vmem:[#allocation40_spill] sm:$0xff] }
 0x279   : > { %v2191_v31 = vadd.f32 %v2190_v39, %v5514_v44  ;;  %v2367_v60 = vadd.f32 %v2366_v25, %v2294_v42 }
 0x27a   : > { %v2451_v13 = vadd.f32 %v5214_v58, %v1817_v27  ;;  %v2452_v49 = vadd.f32 %v5222_v11, %v2156_v50  ;;  %v2298_v16 = vmul.f32 %v2156_v50, %v2156_v50  ;;  %v2231_v43 = vadd.f32 %v2230_v1, %v2156_v50 }
 0x27b   : > { %v2192_v29 = vadd.f32 %v2191_v31, %v5530_v33  ;;  %v2368_v52 = vadd.f32 %v2367_v60, %v2296_v18  ;;  %v2330_v22 = vadd.f32 %v2329_v37, %v2293_v19  ;;  %v2297_v57 = vmul.f32 %v1817_v27, %v1817_v27 }
 0x27d   : > { %v1706_v6 = vpop.f32.mrf.mxu1  ;;  %v2369_v24 = vadd.f32 %v2368_v52, %v2298_v16  ;;  %v2331_v35 = vadd.f32 %v2330_v22, %v2295_v38 }
 0x27e   : > { %v2048_v10 = vpop.f32.mrf.mxu2  ;;  %v1707_v28 = vadd.f32 %v1706_v6, %v5955_v4  ;;  %v2193_v6 = vadd.f32 %v2192_v29, %v5534_v3 }
 0x27f   : > { %v2158_v46 = vpop.f32.mrf.mxu0  ;;  %v2049_v7 = vadd.f32 %v2048_v10, %v5545_v5  ;;  %v2332_v45 = vadd.f32 %v2331_v35, %v2297_v57 }
 0x280   : > { %v1820_v54 = vadd.f32 %v5956_v48, %v1707_v28  ;;  %v2159_v14 = vadd.f32 %v2158_v46, %v2046_v41  ;;  %v2194_v28 = vadd.f32 %v2193_v6, %v1817_v27 }
 0x282   : > { %v2453_v0 = vadd.f32 %v5214_v58, %v1820_v54  ;;  %v2454_v21 = vadd.f32 %v5222_v11, %v2159_v14  ;;  %v2300_v30 = vmul.f32 %v2159_v14, %v2159_v14  ;;  %v2232_v34 = vadd.f32 %v2231_v43, %v2159_v14  ;;  %v5959_v14 = vld [vmem:[#allocation14_spill] sm:$0xff] }
 0x283   : > { %v2299_v41 = vmul.f32 %v1820_v54, %v1820_v54  ;;  %v2195_v48 = vadd.f32 %v2194_v28, %v1820_v54 }
 0x284   : > { %v2920_v51 = vpack.c.bf16 %v2453_v0, %v2451_v13  ;;  %v3000_v53 = vpack.c.bf16 %v2454_v21, %v2452_v49  ;;  %v2370_v10 = vadd.f32 %v2369_v24, %v2300_v30 }
 0x285   : > { %v1709_v20 = vpop.f32.mrf.mxu1  ;;  %v2333_v26 = vadd.f32 %v2332_v45, %v2299_v41 }
 0x286   : > { %3020 = vst [vmem:[%s5239_s23 + $0xe0] sm:$0xff] %v2920_v51   ;;  %v2051_v44 = vpop.f32.mrf.mxu2  ;;  %v1710_v15 = vadd.f32 %v1709_v20, %v5957_v9 }
 0x287   : > { %3036 = vst [vmem:[%s5239_s23 + $0xe8] sm:$0xff] %v3000_v53   ;;  %v2052_v2 = vadd.f32 %v2051_v44, %v1938_v8  ;;  %v2161_v32 = vpop.f32.mrf.mxu0 }
 0x288   : > { %v2162_v59 = vadd.f32 %v2161_v32, %v2049_v7  ;;  %v1823_v12 = vadd.f32 %v5958_v40, %v1710_v15 }
 0x289   : > { %v2165_v5 = vadd.f32 %v2164_v36, %v2052_v2 }
 0x28a   : > { %v2233_v61 = vadd.f32 %v2232_v34, %v2162_v59  ;;  %v2302_v33 = vmul.f32 %v2162_v59, %v2162_v59  ;;  %v2456_v4 = vadd.f32 %v5222_v11, %v2162_v59  ;;  %v2301_v55 = vmul.f32 %v1823_v12, %v1823_v12 }
 0x28b   : > { %v2458_v8 = vadd.f32 %v5222_v11, %v2165_v5  ;;  %v2304_v46 = vmul.f32 %v2165_v5, %v2165_v5  ;;  %v2196_v42 = vadd.f32 %v2195_v48, %v1823_v12  ;;  %v2455_v27 = vadd.f32 %v5214_v58, %v1823_v12 }
 0x28c   : > { %v2234_v47 = vadd.f32 %v2233_v61, %v2165_v5  ;;  %v2371_v50 = vadd.f32 %v2370_v10, %v2302_v33  ;;  %v2334_v11 = vadd.f32 %v2333_v26, %v2301_v55 }
 0x28d   : > { %v3005_v17 = vpack.c.bf16 %v2458_v8, %v2456_v4  ;;  %v1712_v56 = vpop.f32.mrf.mxu1 }
 0x28e   : > { %v2235_v3 = vrot.slane %v2234_v47, 4  ;;  %v1713_v39 = vadd.f32 %v1712_v56, %v5959_v14  ;;  %v2372_v62 = vadd.f32 %v2371_v50, %v2304_v46 }
 0x28f   : > { %3037 = vst [vmem:[%s5239_s23 + $0xf8] sm:$0xff] %v3005_v17  }
 0x290   : > { %v2236_v63 = vadd.f32 %v2235_v3, %v2234_v47  ;;  %v1826_v13 = vadd.f32 %v5960_v23, %v1713_v39  ;;  %v2373_v0 = vrot.slane %v2372_v62, 4 }
 0x292   : > { %v2237_v25 = vrot.slane %v2236_v63, 2  ;;  %v2197_v18 = vadd.f32 %v2196_v42, %v1826_v13  ;;  %v2303_v49 = vmul.f32 %v1826_v13, %v1826_v13  ;;  %v2457_v54 = vadd.f32 %v5214_v58, %v1826_v13 }
 0x293   : > { %v2374_v21 = vadd.f32 %v2373_v0, %v2372_v62 }
 0x294   : > { %v2238_v31 = vadd.f32 %v2237_v25, %v2236_v63  ;;  %v2198_v19 = vrot.slane %v2197_v18, 4  ;;  %v2335_v1 = vadd.f32 %v2334_v11, %v2303_v49  ;;  %v2925_v51 = vpack.c.bf16 %v2457_v54, %v2455_v27 }
 0x295   : > { %v2375_v37 = vrot.slane %v2374_v21, 2 }
 0x296   : > { %v2199_v60 = vadd.f32 %v2198_v19, %v2197_v18  ;;  %v2336_v16 = vrot.slane %v2335_v1, 4  ;;  %3021 = vst [vmem:[%s5239_s23 + $0xf0] sm:$0xff] %v2925_v51   ;;  %v2239_v53 = vrot.slane %v2238_v31, 1 }
 0x297   : > { %v2376_v20 = vadd.f32 %v2375_v37, %v2374_v21 }
 0x298   : > { %v2200_v38 = vrot.slane %v2199_v60, 2  ;;  %v2337_v43 = vadd.f32 %v2336_v16, %v2335_v1  ;;  %v2240_v15 = vadd.f32 %v2239_v53, %v2238_v31 }
 0x299   : > { %v2377_v7 = vrot.slane %v2376_v20, 1 }
 0x29a   : > { %v2201_v44 = vadd.f32 %v2200_v38, %v2199_v60  ;;  %v2338_v9 = vrot.slane %v2337_v43, 2 }
 0x29b   : > { %v2378_v58 = vadd.f32 %v2377_v7, %v2376_v20 }
 0x29c   : > { %v2202_v36 = vrot.slane %v2201_v44, 1  ;;  %v2339_v29 = vadd.f32 %v2338_v9, %v2337_v43 }
 0x29d   : > { %v2381_v52 = vsel %vm2379_vm5, %v2240_v15, %v2378_v58 }
 0x29e   : > { %v2340_v30 = vrot.slane %v2339_v29, 1  ;;  %v2203_v2 = vadd.f32 %v2202_v36, %v2201_v44  ;;  %v2384_v22 = vrot.slane %v2381_v52, 6 }
 0x2a0   : > { %v2341_v32 = vadd.f32 %v2340_v30, %v2339_v29 }
 0x2a2   : > { %v2380_v57 = vsel %vm2379_vm5, %v2203_v2, %v2341_v32 }
 0x2a3   : > { %v2386_v34 = vsel %vm2385_vm6, %v2380_v57, %v2384_v22 }
 0x2a4   : > { %2388 = vst [vmem:[%s259_s27] sm:$0xf] %v2386_v34 }
 0x2a5 PF: > { %s15_s17 = sadd.s32 1, %s3593_s17   ;;  %s5961_s15 = smov %s3589_s16 }
 0x2a6   : > { %p12_p5 = scmp.ge.s32.totalorder %s15_s17, 4   ;;  %s5962_s16 = smov %s5964_s18 }
 0x2a8   :  { %14 = sbr.rel (!%p12_p5) target bundleno = 2 (0x2), region = 75 }

// kernel: deconv_block.3
= control target key start
LH: loop header
LB: loop body
LE: loop exit
PB: predicated region body
PF: predicated region fallthrough
CT: control target
= control target key end

     0   :  { %s1547_s12 = smov 0   ;;  %s1549_s13 = smov 0   ;;  %s1995_s0 = inlined_call_operand.vmem [shape: bf16[2,32,32,64], index: 0, kind: input, shape index: {}]   ;;  %s1996_s1 = inlined_call_operand.vmem [shape: f32[1,64], index: 1, kind: input, shape index: {}]   ;;  %s1997_s2 = inlined_call_operand.vmem [shape: f32[1,64], index: 2, kind: input, shape index: {}]   ;;  %s1998_s3 = inlined_call_operand.vmem [shape: f32[2,64,1024], index: 3, kind: output, shape index: {}]  }
   0x1   :  { %s1551_s14 = smov 0  }
   0x2 LB: > { %s25_s15 = sadd.s32 1, %s1521_s13  ;;  %p1147_p0 = scmp.ge.s32.totalorder %s1525_s14, 1  ;;  %s1525_s14 = sphi %s1551_s14, %s13_s14   ;;  %s1521_s13 = sphi %s1549_s13, %s2000_s13   ;;  %s1517_s12 = sphi %s1547_s12, %s1999_s12  }
   0x3   : > { %p27_p1 = scmp.ge.s32.totalorder %s25_s15, 2  ;;  %p159_p2 = scmp.lt.s32.totalorder %s1525_s14, 3 }
   0x5   : > { %s2002_s15 = smov (%p27_p1, %s25_s15), 0  ;;  %p160_p3 = pnand %p1147_p0, %p159_p2 }
   0x6   : > { %p193_p4 = scmp.lt.s32.totalorder (!%p160_p3), %s1517_s12, 1 }
   0x7   : > { %163 = sbr.rel (%p160_p3) target bundleno = 501 (0x1f5), region = 32 }
   0xc   : > { %s2004_s12 = smov (!%p193_p4, %s1517_s12), 1  ;;  %v1578_v0 = vld [vmem:[%s1996_s1] ss:$0 sm:$0xff] }
   0xd   : > { %s1154_s16 = sshll.u32 %s2004_s12, 9  ;;  %v1585_v4 = vld [vmem:[%s1997_s2] ss:$0 sm:$0xff] }
   0xe   : > { %s1573_s19 = scalar_lea.vmem %s1995_s0, %s1154_s16  ;;  %s1804_s26 = scalar_lea.vmem %s1998_s3, %s1154_s16 }
   0xf   : > { %v1419_v1 = vld [vmem:[%s1573_s19 + $0x40] sm:$0xff]   ;;  %v1420_v14 = vld [vmem:[%s1573_s19 + $0x48] sm:$0xff]   ;;  %v1421_v28 = vld [vmem:[%s1573_s19 + $0x50] sm:$0xff]  }
  0x10   : > { %v1157_v2 = vld [vmem:[%s1573_s19] sm:$0xff]   ;;  %v1190_v3 = vunpack.c.l.bf16 %v1419_v1  ;;  %v1191_v8 = vunpack.c.h.bf16 %v1419_v1  ;;  %v1412_v15 = vld [vmem:[%s1573_s19 + $0x8] sm:$0xff]   ;;  %v1194_v18 = vunpack.c.l.bf16 %v1420_v14  ;;  %v1195_v24 = vunpack.c.h.bf16 %v1420_v14  ;;  %v1413_v29 = vld [vmem:[%s1573_s19 + $0x10] sm:$0xff]  }
  0x11   : > { %v1158_v5 = vunpack.c.l.bf16 %v1157_v2  ;;  %v1159_v9 = vunpack.c.h.bf16 %v1157_v2  ;;  %v1162_v19 = vunpack.c.l.bf16 %v1412_v15  ;;  %v1163_v25 = vunpack.c.h.bf16 %v1412_v15  ;;  %v1422_v42 = vld [vmem:[%s1573_s19 + $0x58] sm:$0xff]   ;;  %v1423_v56 = vld [vmem:[%s1573_s19 + $0x60] sm:$0xff]  }
  0x12   : > { %v489_v6 = vmul.f32 %v1578_v0, %v1190_v3  ;;  %v490_v12 = vmul.f32 %v1578_v0, %v1191_v8  ;;  %v491_v20 = vmul.f32 %v1578_v0, %v1194_v18  ;;  %v492_v26 = vmul.f32 %v1578_v0, %v1195_v24  ;;  %v1414_v43 = vld [vmem:[%s1573_s19 + $0x18] sm:$0xff]   ;;  %v1415_v57 = vld [vmem:[%s1573_s19 + $0x20] sm:$0xff]   ;;  %v1424_v8 = vld [vmem:[%s1573_s19 + $0x68] sm:$0xff]  }
  0x13   : > { %v473_v7 = vmul.f32 %v1578_v0, %v1158_v5  ;;  %v474_v13 = vmul.f32 %v1578_v0, %v1159_v9  ;;  %v475_v21 = vmul.f32 %v1578_v0, %v1162_v19  ;;  %v476_v27 = vmul.f32 %v1578_v0, %v1163_v25  ;;  %v1416_v9 = vld [vmem:[%s1573_s19 + $0x28] sm:$0xff]  }
  0x14   : > { %v621_v10 = vadd.f32 %v1585_v4, %v489_v6  ;;  %v622_v16 = vadd.f32 %v1585_v4, %v490_v12  ;;  %v623_v22 = vadd.f32 %v1585_v4, %v491_v20  ;;  %v624_v30 = vadd.f32 %v1585_v4, %v492_v26 }
  0x15   : > { %v605_v11 = vadd.f32 %v1585_v4, %v473_v7  ;;  %v606_v17 = vadd.f32 %v1585_v4, %v474_v13  ;;  %v607_v23 = vadd.f32 %v1585_v4, %v475_v21  ;;  %v608_v31 = vadd.f32 %v1585_v4, %v476_v27 }
  0x16   : > { %765 = vxpose.xlu1.b32.start [1/16] (narrow) %v621_v10, 64  ;;  %v1198_v32 = vunpack.c.l.bf16 %v1421_v28  ;;  %v1166_v33 = vunpack.c.l.bf16 %v1413_v29  ;;  %v1199_v38 = vunpack.c.h.bf16 %v1421_v28  ;;  %v1167_v39 = vunpack.c.h.bf16 %v1413_v29 }
  0x17   : > { %733 = vxpose.xlu0.b32.start [1/16] (narrow) %v605_v11, 64  ;;  %v1202_v46 = vunpack.c.l.bf16 %v1422_v42  ;;  %v1170_v47 = vunpack.c.l.bf16 %v1414_v43  ;;  %v1203_v52 = vunpack.c.h.bf16 %v1422_v42  ;;  %v1171_v53 = vunpack.c.h.bf16 %v1414_v43  ;;  %v1427_v42 = vld [vmem:[%s1573_s19 + $0x80] sm:$0xff]  }
  0x18   : > { %v493_v34 = vmul.f32 %v1578_v0, %v1198_v32  ;;  %v477_v35 = vmul.f32 %v1578_v0, %v1166_v33  ;;  %v494_v40 = vmul.f32 %v1578_v0, %v1199_v38  ;;  %v478_v41 = vmul.f32 %v1578_v0, %v1167_v39 }
  0x19   : > { %v495_v48 = vmul.f32 %v1578_v0, %v1202_v46  ;;  %v479_v49 = vmul.f32 %v1578_v0, %v1170_v47  ;;  %v496_v54 = vmul.f32 %v1578_v0, %v1203_v52  ;;  %v480_v55 = vmul.f32 %v1578_v0, %v1171_v53 }
  0x1a   : > { %v625_v36 = vadd.f32 %v1585_v4, %v493_v34  ;;  %v609_v37 = vadd.f32 %v1585_v4, %v477_v35  ;;  %v626_v44 = vadd.f32 %v1585_v4, %v494_v40  ;;  %v610_v45 = vadd.f32 %v1585_v4, %v478_v41 }
  0x1b   : > { %v627_v50 = vadd.f32 %v1585_v4, %v495_v48  ;;  %v611_v51 = vadd.f32 %v1585_v4, %v479_v49  ;;  %v628_v58 = vadd.f32 %v1585_v4, %v496_v54  ;;  %v612_v59 = vadd.f32 %v1585_v4, %v480_v55 }
  0x1c   : > { %v1206_v60 = vunpack.c.l.bf16 %v1423_v56  ;;  %v1174_v61 = vunpack.c.l.bf16 %v1415_v57  ;;  %v1207_v3 = vunpack.c.h.bf16 %v1423_v56  ;;  %v1175_v5 = vunpack.c.h.bf16 %v1415_v57  ;;  %v1443_v56 = vld [vmem:[%s1573_s19 + $0x100] sm:$0xff]  }
  0x1d   : > { %v1210_v12 = vunpack.c.l.bf16 %v1424_v8  ;;  %v1178_v13 = vunpack.c.l.bf16 %v1416_v9  ;;  %v1211_v18 = vunpack.c.h.bf16 %v1424_v8  ;;  %v1179_v19 = vunpack.c.h.bf16 %v1416_v9  ;;  %v1435_v57 = vld [vmem:[%s1573_s19 + $0xc0] sm:$0xff]  }
  0x1e   : > { %766 = vxpose.xlu1.b32.cont [2/16] (narrow) %v622_v16, 64  ;;  %v497_v62 = vmul.f32 %v1578_v0, %v1206_v60  ;;  %v481_v63 = vmul.f32 %v1578_v0, %v1174_v61  ;;  %v498_v6 = vmul.f32 %v1578_v0, %v1207_v3  ;;  %v482_v7 = vmul.f32 %v1578_v0, %v1175_v5 }
  0x1f   : > { %734 = vxpose.xlu0.b32.cont [2/16] (narrow) %v606_v17, 64  ;;  %v499_v14 = vmul.f32 %v1578_v0, %v1210_v12  ;;  %v483_v15 = vmul.f32 %v1578_v0, %v1178_v13  ;;  %v500_v20 = vmul.f32 %v1578_v0, %v1211_v18  ;;  %v484_v21 = vmul.f32 %v1578_v0, %v1179_v19 }
  0x20   : > { %v629_v1 = vadd.f32 %v1585_v4, %v497_v62  ;;  %v613_v2 = vadd.f32 %v1585_v4, %v481_v63  ;;  %v630_v10 = vadd.f32 %v1585_v4, %v498_v6  ;;  %v614_v11 = vadd.f32 %v1585_v4, %v482_v7  ;;  %v1428_v63 = vld [vmem:[%s1573_s19 + $0x88] sm:$0xff]  }
  0x21   : > { %v631_v16 = vadd.f32 %v1585_v4, %v499_v14  ;;  %v615_v17 = vadd.f32 %v1585_v4, %v483_v15  ;;  %v632_v24 = vadd.f32 %v1585_v4, %v500_v20  ;;  %v616_v25 = vadd.f32 %v1585_v4, %v484_v21  ;;  %v1444_v15 = vld [vmem:[%s1573_s19 + $0x108] sm:$0xff]  }
  0x22   : > { %v1222_v43 = vunpack.c.l.bf16 %v1427_v42  ;;  %v1223_v52 = vunpack.c.h.bf16 %v1427_v42  ;;  %v1286_v61 = vunpack.c.l.bf16 %v1443_v56  ;;  %v1254_v62 = vunpack.c.l.bf16 %v1435_v57 }
  0x23   : > { %v1287_v7 = vunpack.c.h.bf16 %v1443_v56  ;;  %v1255_v9 = vunpack.c.h.bf16 %v1435_v57  ;;  %v1290_v20 = vunpack.c.l.bf16 %v1444_v15  ;;  %v1446_v57 = vld [vmem:[%s1573_s19 + $0x118] sm:$0xff]  }
  0x24   : > { %v506_v53 = vmul.f32 %v1578_v0, %v1223_v52  ;;  %v537_v3 = vmul.f32 %v1578_v0, %v1286_v61  ;;  %v521_v5 = vmul.f32 %v1578_v0, %v1254_v62  ;;  %v1298_v62 = vunpack.c.l.bf16 %v1446_v57 }
  0x25   : > { %v538_v13 = vmul.f32 %v1578_v0, %v1287_v7  ;;  %v522_v14 = vmul.f32 %v1578_v0, %v1255_v9 }
  0x26   : > { %767 = vxpose.xlu1.b32.cont [3/16] (narrow) %v623_v22, 64  ;;  %v1425_v22 = vld [vmem:[%s1573_s19 + $0x70] sm:$0xff]   ;;  %v669_v8 = vadd.f32 %v1585_v4, %v537_v3 }
  0x27   : > { %735 = vxpose.xlu0.b32.cont [3/16] (narrow) %v607_v23, 64  ;;  %v1417_v23 = vld [vmem:[%s1573_s19 + $0x30] sm:$0xff]   ;;  %v1214_v26 = vunpack.c.l.bf16 %v1425_v22  ;;  %v1215_v32 = vunpack.c.h.bf16 %v1425_v22  ;;  %v670_v18 = vadd.f32 %v1585_v4, %v538_v13  ;;  %v654_v19 = vadd.f32 %v1585_v4, %v522_v14 }
  0x28   : > { %v1182_v27 = vunpack.c.l.bf16 %v1417_v23  ;;  %v1183_v33 = vunpack.c.h.bf16 %v1417_v23  ;;  %v1429_v22 = vld [vmem:[%s1573_s19 + $0x90] sm:$0xff]  }
  0x29   : > { %v501_v28 = vmul.f32 %v1578_v0, %v1214_v26  ;;  %v502_v34 = vmul.f32 %v1578_v0, %v1215_v32  ;;  %v1230_v23 = vunpack.c.l.bf16 %v1429_v22  ;;  %v1231_v32 = vunpack.c.h.bf16 %v1429_v22 }
  0x2a   : > { %v485_v29 = vmul.f32 %v1578_v0, %v1182_v27  ;;  %v486_v35 = vmul.f32 %v1578_v0, %v1183_v33 }
  0x2b   : > { %v634_v38 = vadd.f32 %v1585_v4, %v502_v34  ;;  %v510_v33 = vmul.f32 %v1578_v0, %v1231_v32 }
  0x2c   : > { %v618_v39 = vadd.f32 %v1585_v4, %v486_v35 }
  0x2e   : > { %768 = vxpose.xlu1.b32.cont [4/16] (narrow) %v624_v30, 64  ;;  %v633_v30 = vadd.f32 %v1585_v4, %v501_v28 }
  0x2f   : > { %736 = vxpose.xlu0.b32.cont [4/16] (narrow) %v608_v31, 64  ;;  %v617_v31 = vadd.f32 %v1585_v4, %v485_v29 }
  0x36   : > { %769 = vxpose.xlu1.b32.cont [5/16] (narrow) %v625_v36, 64  ;;  %v1426_v36 = vld [vmem:[%s1573_s19 + $0x78] sm:$0xff]  }
  0x37   : > { %737 = vxpose.xlu0.b32.cont [5/16] (narrow) %v609_v37, 64  ;;  %v1418_v37 = vld [vmem:[%s1573_s19 + $0x38] sm:$0xff]   ;;  %v1218_v40 = vunpack.c.l.bf16 %v1426_v36 }
  0x38   : > { %v1186_v41 = vunpack.c.l.bf16 %v1418_v37 }
  0x3a   : > { %v487_v46 = vmul.f32 %v1578_v0, %v1186_v41 }
  0x3c   : > { %v619_v49 = vadd.f32 %v1585_v4, %v487_v46 }
  0x3e   : > { %770 = vxpose.xlu1.b32.cont [6/16] (narrow) %v626_v44, 64  ;;  %v505_v44 = vmul.f32 %v1578_v0, %v1222_v43  ;;  %v1430_v43 = vld [vmem:[%s1573_s19 + $0x98] sm:$0xff]  }
  0x3f   : > { %738 = vxpose.xlu0.b32.cont [6/16] (narrow) %v610_v45, 64  ;;  %v503_v45 = vmul.f32 %v1578_v0, %v1218_v40 }
  0x40   : > { %v637_v47 = vadd.f32 %v1585_v4, %v505_v44  ;;  %v1234_v44 = vunpack.c.l.bf16 %v1430_v43 }
  0x41   : > { %v635_v48 = vadd.f32 %v1585_v4, %v503_v45 }
  0x42   : > { %797 = vxpose.xlu2.b32.start [1/16] (narrow) %v637_v47, 64  ;;  %v511_v45 = vmul.f32 %v1578_v0, %v1234_v44  ;;  %v1433_v44 = vld [vmem:[%s1573_s19 + $0xb0] sm:$0xff]  }
  0x46   : > { %771 = vxpose.xlu1.b32.cont [7/16] (narrow) %v627_v50, 64  ;;  %v1219_v50 = vunpack.c.h.bf16 %v1426_v36  ;;  %v1445_v36 = vld [vmem:[%s1573_s19 + $0x110] sm:$0xff]  }
  0x47   : > { %739 = vxpose.xlu0.b32.cont [7/16] (narrow) %v611_v51, 64  ;;  %v1187_v51 = vunpack.c.h.bf16 %v1418_v37  ;;  %v1437_v37 = vld [vmem:[%s1573_s19 + $0xd0] sm:$0xff]   ;;  %v1294_v41 = vunpack.c.l.bf16 %v1445_v36 }
  0x48   : > { %v504_v54 = vmul.f32 %v1578_v0, %v1219_v50  ;;  %v1262_v42 = vunpack.c.l.bf16 %v1437_v37  ;;  %v1263_v52 = vunpack.c.h.bf16 %v1437_v37  ;;  %v1448_v37 = vld [vmem:[%s1573_s19 + $0x128] sm:$0xff]  }
  0x49   : > { %v488_v55 = vmul.f32 %v1578_v0, %v1187_v51  ;;  %v541_v46 = vmul.f32 %v1578_v0, %v1294_v41  ;;  %v1295_v51 = vunpack.c.h.bf16 %v1445_v36 }
  0x4a   : > { %v525_v47 = vmul.f32 %v1578_v0, %v1262_v42  ;;  %v526_v56 = vmul.f32 %v1578_v0, %v1263_v52  ;;  %v1306_v42 = vunpack.c.l.bf16 %v1448_v37  ;;  %v1307_v52 = vunpack.c.h.bf16 %v1448_v37 }
  0x4b   : > { %v620_v60 = vadd.f32 %v1585_v4, %v488_v55  ;;  %v542_v55 = vmul.f32 %v1578_v0, %v1295_v51 }
  0x4c   : > { %v657_v50 = vadd.f32 %v1585_v4, %v525_v47  ;;  %v658_v61 = vadd.f32 %v1585_v4, %v526_v56  ;;  %v547_v47 = vmul.f32 %v1578_v0, %v1306_v42  ;;  %v548_v56 = vmul.f32 %v1578_v0, %v1307_v52 }
  0x4e   : > { %772 = vxpose.xlu1.b32.cont [8/16] (narrow) %v628_v58, 64  ;;  %v638_v58 = vadd.f32 %v1585_v4, %v506_v53  ;;  %v1235_v53 = vunpack.c.h.bf16 %v1430_v43 }
  0x4f   : > { %740 = vxpose.xlu0.b32.cont [8/16] (narrow) %v612_v59, 64  ;;  %v636_v59 = vadd.f32 %v1585_v4, %v504_v54 }
  0x50   : > { %798 = vxpose.xlu2.b32.cont [2/16] (narrow) %v638_v58, 64  ;;  %v512_v54 = vmul.f32 %v1578_v0, %v1235_v53  ;;  %v1438_v58 = vld [vmem:[%s1573_s19 + $0xd8] sm:$0xff]  }
  0x56   : > { %773 = vxpose.xlu1.b32.cont [9/16] (narrow) %v629_v1, 64  ;;  %v1226_v1 = vunpack.c.l.bf16 %v1428_v63 }
  0x57   : > { %741 = vxpose.xlu0.b32.cont [9/16] (narrow) %v613_v2, 64 }
  0x58   : > { %v507_v2 = vmul.f32 %v1578_v0, %v1226_v1  ;;  %v1431_v1 = vld [vmem:[%s1573_s19 + $0xa0] sm:$0xff]  }
  0x5a   : > { %v639_v6 = vadd.f32 %v1585_v4, %v507_v2  ;;  %v1238_v2 = vunpack.c.l.bf16 %v1431_v1 }
  0x5c   : > { %799 = vxpose.xlu2.b32.cont [3/16] (narrow) %v639_v6, 64  ;;  %v513_v3 = vmul.f32 %v1578_v0, %v1238_v2  ;;  %v1434_v2 = vld [vmem:[%s1573_s19 + $0xb8] sm:$0xff]  }
  0x5e   : > { %774 = vxpose.xlu1.b32.cont [10/16] (narrow) %v630_v10, 64  ;;  %v653_v10 = vadd.f32 %v1585_v4, %v521_v5  ;;  %v543_v5 = vmul.f32 %v1578_v0, %v1298_v62  ;;  %v645_v7 = vadd.f32 %v1585_v4, %v513_v3  ;;  %v1250_v3 = vunpack.c.l.bf16 %v1434_v2 }
  0x5f   : > { %742 = vxpose.xlu0.b32.cont [10/16] (narrow) %v614_v11, 64  ;;  %v1227_v11 = vunpack.c.h.bf16 %v1428_v63  ;;  %v1266_v63 = vunpack.c.l.bf16 %v1438_v58 }
  0x61   : > { %v508_v12 = vmul.f32 %v1578_v0, %v1227_v11  ;;  %v527_v6 = vmul.f32 %v1578_v0, %v1266_v63  ;;  %v1267_v11 = vunpack.c.h.bf16 %v1438_v58  ;;  %v1449_v58 = vld [vmem:[%s1573_s19 + $0x130] sm:$0xff]  }
  0x62   : > { %v1310_v63 = vunpack.c.l.bf16 %v1449_v58 }
  0x63   : > { %v659_v9 = vadd.f32 %v1585_v4, %v527_v6 }
  0x64   : > { %v549_v6 = vmul.f32 %v1578_v0, %v1310_v63 }
  0x66   : > { %775 = vxpose.xlu1.b32.cont [11/16] (narrow) %v631_v16, 64  ;;  %v1436_v16 = vld [vmem:[%s1573_s19 + $0xc8] sm:$0xff]  }
  0x67   : > { %743 = vxpose.xlu0.b32.cont [11/16] (narrow) %v615_v17, 64  ;;  %v640_v17 = vadd.f32 %v1585_v4, %v508_v12  ;;  %v1258_v21 = vunpack.c.l.bf16 %v1436_v16  ;;  %v1239_v12 = vunpack.c.h.bf16 %v1431_v1 }
  0x69   : > { %800 = vxpose.xlu2.b32.cont [4/16] (narrow) %v640_v17, 64  ;;  %v523_v26 = vmul.f32 %v1578_v0, %v1258_v21  ;;  %v514_v13 = vmul.f32 %v1578_v0, %v1239_v12  ;;  %v1439_v17 = vld [vmem:[%s1573_s19 + $0xe0] sm:$0xff]  }
  0x6a   : > { %v1270_v22 = vunpack.c.l.bf16 %v1439_v17  ;;  %v1271_v32 = vunpack.c.h.bf16 %v1439_v17  ;;  %v1450_v17 = vld [vmem:[%s1573_s19 + $0x138] sm:$0xff]  }
  0x6b   : > { %v655_v29 = vadd.f32 %v1585_v4, %v523_v26 }
  0x6c   : > { %v530_v36 = vmul.f32 %v1578_v0, %v1271_v32 }
  0x6e   : > { %776 = vxpose.xlu1.b32.cont [12/16] (narrow) %v632_v24, 64  ;;  %v509_v24 = vmul.f32 %v1578_v0, %v1230_v23  ;;  %v1432_v23 = vld [vmem:[%s1573_s19 + $0xa8] sm:$0xff]   ;;  %v662_v41 = vadd.f32 %v1585_v4, %v530_v36 }
  0x6f   : > { %744 = vxpose.xlu0.b32.cont [12/16] (narrow) %v616_v25, 64  ;;  %v539_v25 = vmul.f32 %v1578_v0, %v1290_v20 }
  0x70   : > { %v641_v27 = vadd.f32 %v1585_v4, %v509_v24  ;;  %v1242_v24 = vunpack.c.l.bf16 %v1432_v23 }
  0x71   : > { %v671_v28 = vadd.f32 %v1585_v4, %v539_v25 }
  0x72   : > { %801 = vxpose.xlu2.b32.cont [5/16] (narrow) %v641_v27, 64  ;;  %v515_v25 = vmul.f32 %v1578_v0, %v1242_v24  ;;  %v529_v27 = vmul.f32 %v1578_v0, %v1270_v22  ;;  %v1314_v22 = vunpack.c.l.bf16 %v1450_v17  ;;  %v1451_v24 = vld [vmem:[%s1573_s19 + $0x140] sm:$0xff]  }
  0x76   : > { %777 = vxpose.xlu1.b32.cont [13/16] (narrow) %v633_v30, 64  ;;  %v1291_v30 = vunpack.c.h.bf16 %v1444_v15  ;;  %v528_v15 = vmul.f32 %v1578_v0, %v1267_v11  ;;  %v1311_v11 = vunpack.c.h.bf16 %v1449_v58 }
  0x77   : > { %745 = vxpose.xlu0.b32.cont [13/16] (narrow) %v617_v31, 64  ;;  %v1259_v31 = vunpack.c.h.bf16 %v1436_v16  ;;  %v1447_v16 = vld [vmem:[%s1573_s19 + $0x120] sm:$0xff]  }
  0x78   : > { %v540_v34 = vmul.f32 %v1578_v0, %v1291_v30  ;;  %v660_v20 = vadd.f32 %v1585_v4, %v528_v15  ;;  %v1302_v21 = vunpack.c.l.bf16 %v1447_v16  ;;  %v661_v30 = vadd.f32 %v1585_v4, %v529_v27 }
  0x79   : > { %v524_v35 = vmul.f32 %v1578_v0, %v1259_v31  ;;  %v1303_v31 = vunpack.c.h.bf16 %v1447_v16  ;;  %v550_v15 = vmul.f32 %v1578_v0, %v1311_v11  ;;  %v551_v27 = vmul.f32 %v1578_v0, %v1314_v22 }
  0x7a   : > { %v545_v26 = vmul.f32 %v1578_v0, %v1302_v21 }
  0x7b   : > { %v656_v40 = vadd.f32 %v1585_v4, %v524_v35  ;;  %v546_v35 = vmul.f32 %v1578_v0, %v1303_v31  ;;  %v683_v31 = vadd.f32 %v1585_v4, %v551_v27 }
  0x7e   : > { %778 = vxpose.xlu1.b32.cont [14/16] (narrow) %v634_v38, 64  ;;  %v642_v38 = vadd.f32 %v1585_v4, %v510_v33  ;;  %v1243_v33 = vunpack.c.h.bf16 %v1432_v23 }
  0x7f   : > { %746 = vxpose.xlu0.b32.cont [14/16] (narrow) %v618_v39, 64  ;;  %v672_v39 = vadd.f32 %v1585_v4, %v540_v34 }
  0x80   : > { %802 = vxpose.xlu2.b32.cont [6/16] (narrow) %v642_v38, 64  ;;  %v516_v34 = vmul.f32 %v1578_v0, %v1243_v33  ;;  %v1440_v38 = vld [vmem:[%s1573_s19 + $0xe8] sm:$0xff]   ;;  %v1315_v33 = vunpack.c.h.bf16 %v1450_v17 }
  0x81   : > { %v1274_v43 = vunpack.c.l.bf16 %v1440_v38  ;;  %v1275_v53 = vunpack.c.h.bf16 %v1440_v38  ;;  %v1467_v38 = vld [vmem:[%s1573_s19 + $0x1c0] sm:$0xff]  }
  0x82   : > { %v552_v36 = vmul.f32 %v1578_v0, %v1315_v33 }
  0x86   : > { %779 = vxpose.xlu1.b32.cont [15/16] (narrow) %v635_v48, 64  ;;  %v643_v48 = vadd.f32 %v1585_v4, %v511_v45  ;;  %v1246_v45 = vunpack.c.l.bf16 %v1433_v44 }
  0x87   : > { %747 = vxpose.xlu0.b32.cont [15/16] (narrow) %v619_v49, 64  ;;  %v673_v49 = vadd.f32 %v1585_v4, %v541_v46 }
  0x88   : > { %803 = vxpose.xlu2.b32.cont [7/16] (narrow) %v643_v48, 64  ;;  %v517_v46 = vmul.f32 %v1578_v0, %v1246_v45  ;;  %v531_v48 = vmul.f32 %v1578_v0, %v1274_v43  ;;  %v1382_v43 = vunpack.c.l.bf16 %v1467_v38  ;;  %v1452_v45 = vld [vmem:[%s1573_s19 + $0x148] sm:$0xff]  }
  0x8a   : > { %v663_v51 = vadd.f32 %v1585_v4, %v531_v48  ;;  %v585_v48 = vmul.f32 %v1578_v0, %v1382_v43 }
  0x8c   : > { %v717_v52 = vadd.f32 %v1585_v4, %v585_v48 }
  0x8e   : > { %780 = vxpose.xlu1.b32.end [16/16] (narrow) %v636_v59, 64  ;;  %v644_v59 = vadd.f32 %v1585_v4, %v512_v54  ;;  %v1247_v54 = vunpack.c.h.bf16 %v1433_v44 }
  0x8f   : > { %748 = vxpose.xlu0.b32.end [16/16] (narrow) %v620_v60, 64  ;;  %v674_v60 = vadd.f32 %v1585_v4, %v542_v55 }
  0x90   : > { %804 = vxpose.xlu2.b32.cont [8/16] (narrow) %v644_v59, 64  ;;  %v518_v55 = vmul.f32 %v1578_v0, %v1247_v54  ;;  %v1441_v59 = vld [vmem:[%s1573_s19 + $0xf0] sm:$0xff]  }
  0x91   : > { %v1278_v1 = vunpack.c.l.bf16 %v1441_v59  ;;  %v1279_v12 = vunpack.c.h.bf16 %v1441_v59 }
  0x93   : > { %v534_v16 = vmul.f32 %v1578_v0, %v1279_v12 }
  0x95   : > { %v666_v21 = vadd.f32 %v1585_v4, %v534_v16 }
  0x96   : > { %861 = vxpose.xlu1.b32.start [1/16] (narrow) %v669_v8, 64  ;;  %v675_v8 = vadd.f32 %v1585_v4, %v543_v5  ;;  %v519_v5 = vmul.f32 %v1578_v0, %v1250_v3 }
  0x97   : > { %829 = vxpose.xlu0.b32.start [1/16] (narrow) %v653_v10, 64  ;;  %v1299_v10 = vunpack.c.h.bf16 %v1446_v57  ;;  %v532_v57 = vmul.f32 %v1578_v0, %v1275_v53 }
  0x98   : > { %805 = vxpose.xlu2.b32.cont [9/16] (narrow) %v645_v7, 64  ;;  %v533_v7 = vmul.f32 %v1578_v0, %v1278_v1 }
  0x99   : > { %v544_v14 = vmul.f32 %v1578_v0, %v1299_v10  ;;  %v664_v62 = vadd.f32 %v1585_v4, %v532_v57 }
  0x9a   : > { %v665_v10 = vadd.f32 %v1585_v4, %v533_v7 }
  0x9e   : > { %862 = vxpose.xlu1.b32.cont [2/16] (narrow) %v670_v18, 64  ;;  %v646_v18 = vadd.f32 %v1585_v4, %v514_v13  ;;  %v1251_v13 = vunpack.c.h.bf16 %v1434_v2 }
  0x9f   : > { %830 = vxpose.xlu0.b32.cont [2/16] (narrow) %v654_v19, 64  ;;  %v676_v19 = vadd.f32 %v1585_v4, %v544_v14 }
  0xa0   : > { %806 = vxpose.xlu2.b32.cont [10/16] (narrow) %v646_v18, 64  ;;  %v520_v14 = vmul.f32 %v1578_v0, %v1251_v13  ;;  %v1442_v18 = vld [vmem:[%s1573_s19 + $0xf8] sm:$0xff]  }
  0xa1   : > { %v1282_v23 = vunpack.c.l.bf16 %v1442_v18 }
  0xa6   : > { %863 = vxpose.xlu1.b32.cont [3/16] (narrow) %v671_v28, 64  ;;  %v647_v28 = vadd.f32 %v1585_v4, %v515_v25  ;;  %v1318_v25 = vunpack.c.l.bf16 %v1451_v24 }
  0xa7   : > { %831 = vxpose.xlu0.b32.cont [3/16] (narrow) %v655_v29, 64  ;;  %v677_v29 = vadd.f32 %v1585_v4, %v545_v26 }
  0xa8   : > { %807 = vxpose.xlu2.b32.cont [11/16] (narrow) %v647_v28, 64  ;;  %v553_v26 = vmul.f32 %v1578_v0, %v1318_v25  ;;  %v535_v28 = vmul.f32 %v1578_v0, %v1282_v23  ;;  %v1461_v25 = vld [vmem:[%s1573_s19 + $0x190] sm:$0xff]  }
  0xaa   : > { %v667_v32 = vadd.f32 %v1585_v4, %v535_v28 }
  0xae   : > { %864 = vxpose.xlu1.b32.cont [4/16] (narrow) %v672_v39, 64  ;;  %v648_v39 = vadd.f32 %v1585_v4, %v516_v34  ;;  %v1283_v34 = vunpack.c.h.bf16 %v1442_v18 }
  0xaf   : > { %832 = vxpose.xlu0.b32.cont [4/16] (narrow) %v656_v40, 64  ;;  %v678_v40 = vadd.f32 %v1585_v4, %v546_v35 }
  0xb0   : > { %808 = vxpose.xlu2.b32.cont [12/16] (narrow) %v648_v39, 64  ;;  %v536_v37 = vmul.f32 %v1578_v0, %v1283_v34  ;;  %v1459_v39 = vld [vmem:[%s1573_s19 + $0x180] sm:$0xff]  }
  0xb1   : > { %v1350_v44 = vunpack.c.l.bf16 %v1459_v39  ;;  %v1351_v53 = vunpack.c.h.bf16 %v1459_v39 }
  0xb2   : > { %v668_v42 = vadd.f32 %v1585_v4, %v536_v37 }
  0xb3   : > { %v570_v58 = vmul.f32 %v1578_v0, %v1351_v53 }
  0xb5   : > { %v702_v2 = vadd.f32 %v1585_v4, %v570_v58 }
  0xb6   : > { %865 = vxpose.xlu1.b32.cont [5/16] (narrow) %v673_v49, 64  ;;  %v649_v49 = vadd.f32 %v1585_v4, %v517_v46  ;;  %v1322_v46 = vunpack.c.l.bf16 %v1452_v45 }
  0xb7   : > { %833 = vxpose.xlu0.b32.cont [5/16] (narrow) %v657_v50, 64  ;;  %v679_v50 = vadd.f32 %v1585_v4, %v547_v47 }
  0xb8   : > { %809 = vxpose.xlu2.b32.cont [13/16] (narrow) %v649_v49, 64  ;;  %v555_v47 = vmul.f32 %v1578_v0, %v1322_v46  ;;  %v569_v49 = vmul.f32 %v1578_v0, %v1350_v44 }
  0xba   : > { %v701_v54 = vadd.f32 %v1585_v4, %v569_v49  ;;  %v781_v59 = vpop.trf.xlu1  ;;  %v1470_v49 = vld [vmem:[%s1573_s19 + $0x1d8] sm:$0xff]  }
  0xbb   : > { %990 = vst [vmem:[%s1804_s26 + $0x8] sm:$0xff] %v781_v59 }
  0xbe   : > { %866 = vxpose.xlu1.b32.cont [6/16] (narrow) %v674_v60, 64  ;;  %v650_v60 = vadd.f32 %v1585_v4, %v518_v55  ;;  %v1323_v55 = vunpack.c.h.bf16 %v1452_v45 }
  0xbf   : > { %834 = vxpose.xlu0.b32.cont [6/16] (narrow) %v658_v61, 64  ;;  %v680_v61 = vadd.f32 %v1585_v4, %v548_v56 }
  0xc0   : > { %810 = vxpose.xlu2.b32.cont [14/16] (narrow) %v650_v60, 64  ;;  %v556_v56 = vmul.f32 %v1578_v0, %v1323_v55  ;;  %v749_v60 = vpop.trf.xlu0 }
  0xc1   : > { %989 = vst [vmem:[%s1804_s26] sm:$0xff] %v749_v60 }
  0xc2   : > { %v688_v63 = vadd.f32 %v1585_v4, %v556_v56  ;;  %v782_v11 = vpop.trf.xlu1  ;;  %v1455_v56 = vld [vmem:[%s1573_s19 + $0x160] sm:$0xff]  }
  0xc3   : > { %998 = vst [vmem:[%s1804_s26 + $0x48] sm:$0xff] %v782_v11 }
  0xc6   : > { %867 = vxpose.xlu1.b32.cont [7/16] (narrow) %v675_v8, 64  ;;  %v651_v8 = vadd.f32 %v1585_v4, %v519_v5 }
  0xc7   : > { %835 = vxpose.xlu0.b32.cont [7/16] (narrow) %v659_v9, 64  ;;  %v681_v9 = vadd.f32 %v1585_v4, %v549_v6  ;;  %v1453_v6 = vld [vmem:[%s1573_s19 + $0x150] sm:$0xff]  }
  0xc8   : > { %811 = vxpose.xlu2.b32.cont [15/16] (narrow) %v651_v8, 64  ;;  %v1326_v7 = vunpack.c.l.bf16 %v1453_v6  ;;  %v750_v12 = vpop.trf.xlu0  ;;  %v1327_v18 = vunpack.c.h.bf16 %v1453_v6  ;;  %v1335_v6 = vunpack.c.h.bf16 %v1455_v56 }
  0xc9   : > { %997 = vst [vmem:[%s1804_s26 + $0x40] sm:$0xff] %v750_v12  ;;  %v1471_v12 = vld [vmem:[%s1573_s19 + $0x1e0] sm:$0xff]  }
  0xca   : > { %v557_v8 = vmul.f32 %v1578_v0, %v1326_v7  ;;  %v783_v22 = vpop.trf.xlu1  ;;  %v562_v7 = vmul.f32 %v1578_v0, %v1335_v6 }
  0xcb   : > { %1006 = vst [vmem:[%s1804_s26 + $0x88] sm:$0xff] %v783_v22 }
  0xcc   : > { %v689_v13 = vadd.f32 %v1585_v4, %v557_v8 }
  0xce   : > { %868 = vxpose.xlu1.b32.cont [8/16] (narrow) %v676_v19, 64  ;;  %v652_v19 = vadd.f32 %v1585_v4, %v520_v14 }
  0xcf   : > { %836 = vxpose.xlu0.b32.cont [8/16] (narrow) %v660_v20, 64  ;;  %v682_v20 = vadd.f32 %v1585_v4, %v550_v15 }
  0xd0   : > { %812 = vxpose.xlu2.b32.end [16/16] (narrow) %v652_v19, 64  ;;  %v558_v19 = vmul.f32 %v1578_v0, %v1327_v18  ;;  %v751_v23 = vpop.trf.xlu0 }
  0xd1   : > { %1005 = vst [vmem:[%s1804_s26 + $0x80] sm:$0xff] %v751_v23 }
  0xd6   : > { %869 = vxpose.xlu1.b32.cont [9/16] (narrow) %v677_v29, 64  ;;  %v685_v29 = vadd.f32 %v1585_v4, %v553_v26  ;;  %v690_v26 = vadd.f32 %v1585_v4, %v558_v19  ;;  %v1456_v19 = vld [vmem:[%s1573_s19 + $0x168] sm:$0xff]  }
  0xd7   : > { %837 = vxpose.xlu0.b32.cont [9/16] (narrow) %v661_v30, 64  ;;  %v1319_v30 = vunpack.c.h.bf16 %v1451_v24  ;;  %v1469_v24 = vld [vmem:[%s1573_s19 + $0x1d0] sm:$0xff]  }
  0xd8   : > { %893 = vxpose.xlu2.b32.start [1/16] (narrow) %v685_v29, 64  ;;  %v1390_v29 = vunpack.c.l.bf16 %v1469_v24  ;;  %v752_v37 = vpop.trf.xlu0 }
  0xd9   : > { %v554_v35 = vmul.f32 %v1578_v0, %v1319_v30  ;;  %v1358_v30 = vunpack.c.l.bf16 %v1461_v25  ;;  %1013 = vst [vmem:[%s1804_s26 + $0xc0] sm:$0xff] %v752_v37  ;;  %v1472_v37 = vld [vmem:[%s1573_s19 + $0x1e8] sm:$0xff]  }
  0xda   : > { %v589_v34 = vmul.f32 %v1578_v0, %v1390_v29  ;;  %v1399_v29 = vunpack.c.h.bf16 %v1471_v12 }
  0xdc   : > { %v721_v39 = vadd.f32 %v1585_v4, %v589_v34 }
  0xde   : > { %870 = vxpose.xlu1.b32.cont [10/16] (narrow) %v678_v40, 64  ;;  %v686_v40 = vadd.f32 %v1585_v4, %v554_v35  ;;  %v573_v35 = vmul.f32 %v1578_v0, %v1358_v30 }
  0xdf   : > { %838 = vxpose.xlu0.b32.cont [10/16] (narrow) %v662_v41, 64  ;;  %v684_v41 = vadd.f32 %v1585_v4, %v552_v36  ;;  %v784_v36 = vpop.trf.xlu1 }
  0xe0   : > { %894 = vxpose.xlu2.b32.cont [2/16] (narrow) %v686_v40, 64  ;;  %1014 = vst [vmem:[%s1804_s26 + $0xc8] sm:$0xff] %v784_v36  ;;  %v705_v40 = vadd.f32 %v1585_v4, %v573_v35  ;;  %v753_v48 = vpop.trf.xlu0 }
  0xe1   : > { %1021 = vst [vmem:[%s1804_s26 + $0x100] sm:$0xff] %v753_v48 }
  0xe6   : > { %871 = vxpose.xlu1.b32.cont [11/16] (narrow) %v679_v50, 64  ;;  %v687_v50 = vadd.f32 %v1585_v4, %v555_v47 }
  0xe7   : > { %839 = vxpose.xlu0.b32.cont [11/16] (narrow) %v663_v51, 64  ;;  %v1383_v51 = vunpack.c.h.bf16 %v1467_v38  ;;  %v785_v47 = vpop.trf.xlu1 }
  0xe8   : > { %895 = vxpose.xlu2.b32.cont [3/16] (narrow) %v687_v50, 64  ;;  %v1462_v50 = vld [vmem:[%s1573_s19 + $0x198] sm:$0xff]   ;;  %1022 = vst [vmem:[%s1804_s26 + $0x108] sm:$0xff] %v785_v47 }
  0xe9   : > { %v586_v57 = vmul.f32 %v1578_v0, %v1383_v51  ;;  %v1362_v55 = vunpack.c.l.bf16 %v1462_v50 }
  0xeb   : > { %v718_v1 = vadd.f32 %v1585_v4, %v586_v57  ;;  %v1334_v57 = vunpack.c.l.bf16 %v1455_v56  ;;  %v575_v60 = vmul.f32 %v1578_v0, %v1362_v55  ;;  %v1403_v56 = vunpack.c.h.bf16 %v1472_v37 }
  0xed   : > { %v561_v58 = vmul.f32 %v1578_v0, %v1334_v57 }
  0xee   : > { %872 = vxpose.xlu1.b32.cont [12/16] (narrow) %v680_v61, 64  ;;  %v1468_v61 = vld [vmem:[%s1573_s19 + $0x1c8] sm:$0xff]  }
  0xef   : > { %840 = vxpose.xlu0.b32.cont [12/16] (narrow) %v664_v62, 64  ;;  %v1460_v62 = vld [vmem:[%s1573_s19 + $0x188] sm:$0xff]   ;;  %v1386_v3 = vunpack.c.l.bf16 %v1468_v61  ;;  %v1387_v16 = vunpack.c.h.bf16 %v1468_v61  ;;  %v786_v61 = vpop.trf.xlu1 }
  0xf0   : > { %896 = vxpose.xlu2.b32.cont [4/16] (narrow) %v688_v63, 64  ;;  %v1354_v5 = vunpack.c.l.bf16 %v1460_v62  ;;  %v1355_v17 = vunpack.c.h.bf16 %v1460_v62  ;;  %v754_v62 = vpop.trf.xlu0  ;;  %v693_v63 = vadd.f32 %v1585_v4, %v561_v58  ;;  %1030 = vst [vmem:[%s1804_s26 + $0x148] sm:$0xff] %v786_v61 }
  0xf1   : > { %1029 = vst [vmem:[%s1804_s26 + $0x140] sm:$0xff] %v754_v62  ;;  %v813_v35 = vpop.trf.xlu2 }
  0xf2   : > { %991 = vst [vmem:[%s1804_s26 + $0x10] sm:$0xff] %v813_v35 }
  0xf6   : > { %873 = vxpose.xlu1.b32.cont [13/16] (narrow) %v681_v9, 64  ;;  %v587_v9 = vmul.f32 %v1578_v0, %v1386_v3  ;;  %v1395_v3 = vunpack.c.h.bf16 %v1470_v49 }
  0xf7   : > { %841 = vxpose.xlu0.b32.cont [13/16] (narrow) %v665_v10, 64  ;;  %v571_v10 = vmul.f32 %v1578_v0, %v1354_v5  ;;  %v1363_v5 = vunpack.c.h.bf16 %v1462_v50 }
  0xf8   : > { %897 = vxpose.xlu2.b32.cont [5/16] (narrow) %v689_v13, 64  ;;  %v719_v14 = vadd.f32 %v1585_v4, %v587_v9  ;;  %v592_v8 = vmul.f32 %v1578_v0, %v1395_v3  ;;  %v755_v11 = vpop.trf.xlu0  ;;  %v1463_v13 = vld [vmem:[%s1573_s19 + $0x1a0] sm:$0xff]  }
  0xf9   : > { %v703_v15 = vadd.f32 %v1585_v4, %v571_v10  ;;  %v576_v9 = vmul.f32 %v1578_v0, %v1363_v5  ;;  %v787_v10 = vpop.trf.xlu1  ;;  %1037 = vst [vmem:[%s1804_s26 + $0x180] sm:$0xff] %v755_v11  ;;  %v1366_v18 = vunpack.c.l.bf16 %v1463_v13  ;;  %v1367_v30 = vunpack.c.h.bf16 %v1463_v13  ;;  %v814_v50 = vpop.trf.xlu2 }
  0xfa   : > { %1038 = vst [vmem:[%s1804_s26 + $0x188] sm:$0xff] %v787_v10  ;;  %v1458_v10 = vld [vmem:[%s1573_s19 + $0x178] sm:$0xff]  }
  0xfb   : > { %999 = vst [vmem:[%s1804_s26 + $0x50] sm:$0xff] %v814_v50  ;;  %v1346_v11 = vunpack.c.l.bf16 %v1458_v10 }
  0xfe   : > { %874 = vxpose.xlu1.b32.cont [14/16] (narrow) %v682_v20, 64  ;;  %v588_v20 = vmul.f32 %v1578_v0, %v1387_v16  ;;  %v708_v16 = vadd.f32 %v1585_v4, %v576_v9 }
  0xff   : > { %842 = vxpose.xlu0.b32.cont [14/16] (narrow) %v666_v21, 64  ;;  %v572_v21 = vmul.f32 %v1578_v0, %v1355_v17  ;;  %v1398_v17 = vunpack.c.l.bf16 %v1471_v12 }
 0x100   : > { %898 = vxpose.xlu2.b32.cont [6/16] (narrow) %v690_v26, 64  ;;  %v720_v27 = vadd.f32 %v1585_v4, %v588_v20  ;;  %v1338_v20 = vunpack.c.l.bf16 %v1456_v19 }
 0x101   : > { %v704_v28 = vadd.f32 %v1585_v4, %v572_v21  ;;  %v815_v62 = vpop.trf.xlu2 }
 0x102   : > { %1007 = vst [vmem:[%s1804_s26 + $0x90] sm:$0xff] %v815_v62 }
 0x106   : > { %875 = vxpose.xlu1.b32.cont [15/16] (narrow) %v683_v31, 64  ;;  %v1454_v31 = vld [vmem:[%s1573_s19 + $0x158] sm:$0xff]  }
 0x107   : > { %843 = vxpose.xlu0.b32.cont [15/16] (narrow) %v667_v32, 64  ;;  %v1330_v32 = vunpack.c.l.bf16 %v1454_v31  ;;  %v1331_v43 = vunpack.c.h.bf16 %v1454_v31  ;;  %v1339_v31 = vunpack.c.h.bf16 %v1456_v19 }
 0x109   : > { %v559_v33 = vmul.f32 %v1578_v0, %v1330_v32  ;;  %v560_v44 = vmul.f32 %v1578_v0, %v1331_v43  ;;  %v1402_v43 = vunpack.c.l.bf16 %v1472_v37 }
 0x10b   : > { %v691_v38 = vadd.f32 %v1585_v4, %v559_v33  ;;  %v692_v51 = vadd.f32 %v1585_v4, %v560_v44 }
 0x10d   : > { %899 = vxpose.xlu2.b32.cont [7/16] (narrow) %v691_v38, 64  ;;  %v1464_v38 = vld [vmem:[%s1573_s19 + $0x1a8] sm:$0xff]  }
 0x10e   : > { %876 = vxpose.xlu1.b32.end [16/16] (narrow) %v684_v41, 64  ;;  %v1391_v41 = vunpack.c.h.bf16 %v1469_v24  ;;  %v788_v24 = vpop.trf.xlu1  ;;  %v1370_v44 = vunpack.c.l.bf16 %v1464_v38  ;;  %v1371_v57 = vunpack.c.h.bf16 %v1464_v38 }
 0x10f   : > { %844 = vxpose.xlu0.b32.end [16/16] (narrow) %v668_v42, 64  ;;  %v1359_v42 = vunpack.c.h.bf16 %v1461_v25  ;;  %v1885_v25 = vld [vmem:[%s1997_s2] ss:$0 sm:$0xff]  ;;  %1046 = vst [vmem:[%s1804_s26 + $0x1c8] sm:$0xff] %v788_v24 }
 0x110   : > { %v590_v45 = vmul.f32 %v1578_v0, %v1391_v41 }
 0x111   : > { %v574_v46 = vmul.f32 %v1578_v0, %v1359_v42 }
 0x113   : > { %v706_v53 = vadd.f32 %v1585_v4, %v574_v46 }
 0x115   : > { %900 = vxpose.xlu2.b32.cont [8/16] (narrow) %v692_v51, 64 }
 0x116   : > { %957 = vxpose.xlu1.b32.start [1/16] (narrow) %v717_v52, 64  ;;  %v722_v52 = vadd.f32 %v1585_v4, %v590_v45  ;;  %v1457_v45 = vld [vmem:[%s1573_s19 + $0x170] sm:$0xff]  }
 0x117   : > { %925 = vxpose.xlu0.b32.start [1/16] (narrow) %v701_v54, 64  ;;  %v1394_v54 = vunpack.c.l.bf16 %v1470_v49  ;;  %v1342_v46 = vunpack.c.l.bf16 %v1457_v45  ;;  %v1343_v58 = vunpack.c.h.bf16 %v1457_v45 }
 0x119   : > { %v591_v59 = vmul.f32 %v1578_v0, %v1394_v54  ;;  %v1877_v0 = vld [vmem:[%s1996_s1] ss:$0 sm:$0xff] }
 0x11a   : > { %v563_v21 = vmul.f32 %v1877_v0, %v1338_v20  ;;  %v593_v22 = vmul.f32 %v1877_v0, %v1398_v17  ;;  %v577_v23 = vmul.f32 %v1877_v0, %v1366_v18  ;;  %v564_v32 = vmul.f32 %v1877_v0, %v1339_v31  ;;  %v1466_v31 = vld [vmem:[%s1573_s19 + $0x1b8] sm:$0xff]  }
 0x11b   : > { %v594_v33 = vmul.f32 %v1877_v0, %v1399_v29  ;;  %v578_v34 = vmul.f32 %v1877_v0, %v1367_v30  ;;  %v565_v47 = vmul.f32 %v1877_v0, %v1342_v46  ;;  %v595_v48 = vmul.f32 %v1877_v0, %v1402_v43  ;;  %v1474_v30 = vld [vmem:[%s1573_s19 + $0x1f8] sm:$0xff]  }
 0x11c   : > { %v695_v26 = vadd.f32 %v1885_v25, %v563_v21  ;;  %v579_v49 = vmul.f32 %v1877_v0, %v1370_v44  ;;  %v580_v61 = vmul.f32 %v1877_v0, %v1371_v57  ;;  %v567_v12 = vmul.f32 %v1877_v0, %v1346_v11 }
 0x11d   : > { %901 = vxpose.xlu2.b32.cont [9/16] (narrow) %v693_v63, 64  ;;  %v726_v41 = vadd.f32 %v1885_v25, %v594_v33  ;;  %v710_v42 = vadd.f32 %v1885_v25, %v578_v34  ;;  %v727_v54 = vadd.f32 %v1885_v25, %v595_v48  ;;  %v1347_v17 = vunpack.c.h.bf16 %v1458_v10 }
 0x11e   : > { %958 = vxpose.xlu1.b32.cont [2/16] (narrow) %v718_v1, 64  ;;  %v723_v1 = vadd.f32 %v1585_v4, %v591_v59  ;;  %v711_v55 = vadd.f32 %v1885_v25, %v579_v49  ;;  %v566_v59 = vmul.f32 %v1877_v0, %v1343_v58  ;;  %v699_v18 = vadd.f32 %v1885_v25, %v567_v12 }
 0x11f   : > { %926 = vxpose.xlu0.b32.cont [2/16] (narrow) %v702_v2, 64  ;;  %v707_v2 = vadd.f32 %v1585_v4, %v575_v60  ;;  %v596_v60 = vmul.f32 %v1877_v0, %v1403_v56  ;;  %v568_v20 = vmul.f32 %v1877_v0, %v1347_v17  ;;  %v1410_v35 = vunpack.c.l.bf16 %v1474_v30 }
 0x120   : > { %v698_v3 = vadd.f32 %v1885_v25, %v566_v59  ;;  %v1411_v44 = vunpack.c.h.bf16 %v1474_v30  ;;  %v1379_v45 = vunpack.c.h.bf16 %v1466_v31 }
 0x121   : > { %v728_v6 = vadd.f32 %v1885_v25, %v596_v60  ;;  %v599_v37 = vmul.f32 %v1877_v0, %v1410_v35 }
 0x122   : > { %v600_v46 = vmul.f32 %v1877_v0, %v1411_v44 }
 0x126   : > { %959 = vxpose.xlu1.b32.cont [3/16] (narrow) %v719_v14, 64  ;;  %v694_v14 = vadd.f32 %v1585_v4, %v562_v7  ;;  %v712_v7 = vadd.f32 %v1885_v25, %v580_v61 }
 0x127   : > { %927 = vxpose.xlu0.b32.cont [3/16] (narrow) %v703_v15, 64  ;;  %v724_v15 = vadd.f32 %v1585_v4, %v592_v8  ;;  %v756_v4 = vpop.trf.xlu0 }
 0x128   : > { %902 = vxpose.xlu2.b32.cont [10/16] (narrow) %v694_v14, 64  ;;  %1045 = vst [vmem:[%s1804_s26 + $0x1c0] sm:$0xff] %v756_v4  ;;  %v700_v4 = vadd.f32 %v1885_v25, %v568_v20 }
 0x12e   : > { %960 = vxpose.xlu1.b32.cont [4/16] (narrow) %v720_v27, 64  ;;  %v725_v27 = vadd.f32 %v1885_v25, %v593_v22 }
 0x12f   : > { %928 = vxpose.xlu0.b32.cont [4/16] (narrow) %v704_v28, 64  ;;  %v709_v28 = vadd.f32 %v1885_v25, %v577_v23 }
 0x130   : > { %903 = vxpose.xlu2.b32.cont [11/16] (narrow) %v695_v26, 64 }
 0x136   : > { %961 = vxpose.xlu1.b32.cont [5/16] (narrow) %v721_v39, 64  ;;  %v696_v39 = vadd.f32 %v1885_v25, %v564_v32 }
 0x137   : > { %929 = vxpose.xlu0.b32.cont [5/16] (narrow) %v705_v40, 64 }
 0x138   : > { %904 = vxpose.xlu2.b32.cont [12/16] (narrow) %v696_v39, 64 }
 0x13a   : > { %v877_v36 = vpop.trf.xlu1 }
 0x13b   : > { %v845_v40 = vpop.trf.xlu0  ;;  %993 = vst [vmem:[%s1804_s26 + $0x20] sm:$0xff] %v877_v36  ;;  %v1378_v36 = vunpack.c.l.bf16 %v1466_v31 }
 0x13c   : > { %992 = vst [vmem:[%s1804_s26 + $0x18] sm:$0xff] %v845_v40 }
 0x13d   : > { %v583_v38 = vmul.f32 %v1877_v0, %v1378_v36 }
 0x13e   : > { %962 = vxpose.xlu1.b32.cont [6/16] (narrow) %v722_v52, 64  ;;  %v697_v52 = vadd.f32 %v1885_v25, %v565_v47  ;;  %v584_v47 = vmul.f32 %v1877_v0, %v1379_v45 }
 0x13f   : > { %930 = vxpose.xlu0.b32.cont [6/16] (narrow) %v706_v53, 64  ;;  %v715_v43 = vadd.f32 %v1885_v25, %v583_v38 }
 0x140   : > { %905 = vxpose.xlu2.b32.cont [13/16] (narrow) %v697_v52, 64  ;;  %v716_v52 = vadd.f32 %v1885_v25, %v584_v47 }
 0x142   : > { %v878_v51 = vpop.trf.xlu1 }
 0x143   : > { %v846_v53 = vpop.trf.xlu0  ;;  %1001 = vst [vmem:[%s1804_s26 + $0x60] sm:$0xff] %v878_v51  ;;  %v732_v51 = vadd.f32 %v1885_v25, %v600_v46 }
 0x144   : > { %1000 = vst [vmem:[%s1804_s26 + $0x58] sm:$0xff] %v846_v53 }
 0x146   : > { %963 = vxpose.xlu1.b32.cont [7/16] (narrow) %v723_v1, 64  ;;  %v1473_v1 = vld [vmem:[%s1573_s19 + $0x1f0] sm:$0xff]  }
 0x147   : > { %931 = vxpose.xlu0.b32.cont [7/16] (narrow) %v707_v2, 64  ;;  %v1465_v2 = vld [vmem:[%s1573_s19 + $0x1b0] sm:$0xff]   ;;  %v1406_v8 = vunpack.c.l.bf16 %v1473_v1  ;;  %v1407_v23 = vunpack.c.h.bf16 %v1473_v1 }
 0x148   : > { %906 = vxpose.xlu2.b32.cont [14/16] (narrow) %v698_v3, 64  ;;  %v1374_v9 = vunpack.c.l.bf16 %v1465_v2  ;;  %v1375_v24 = vunpack.c.h.bf16 %v1465_v2 }
 0x149   : > { %v597_v13 = vmul.f32 %v1877_v0, %v1406_v8  ;;  %v598_v26 = vmul.f32 %v1877_v0, %v1407_v23 }
 0x14a   : > { %v879_v63 = vpop.trf.xlu1  ;;  %v581_v14 = vmul.f32 %v1877_v0, %v1374_v9 }
 0x14b   : > { %v847_v5 = vpop.trf.xlu0  ;;  %1009 = vst [vmem:[%s1804_s26 + $0xa0] sm:$0xff] %v879_v63  ;;  %v729_v21 = vadd.f32 %v1885_v25, %v597_v13  ;;  %v730_v33 = vadd.f32 %v1885_v25, %v598_v26 }
 0x14c   : > { %1008 = vst [vmem:[%s1804_s26 + $0x98] sm:$0xff] %v847_v5  ;;  %v713_v22 = vadd.f32 %v1885_v25, %v581_v14 }
 0x14e   : > { %964 = vxpose.xlu1.b32.cont [8/16] (narrow) %v724_v15, 64  ;;  %v816_v15 = vpop.trf.xlu2 }
 0x14f   : > { %932 = vxpose.xlu0.b32.cont [8/16] (narrow) %v708_v16, 64  ;;  %1015 = vst [vmem:[%s1804_s26 + $0xd0] sm:$0xff] %v816_v15 }
 0x150   : > { %907 = vxpose.xlu2.b32.cont [15/16] (narrow) %v699_v18, 64 }
 0x152   : > { %v880_v16 = vpop.trf.xlu1 }
 0x153   : > { %v848_v19 = vpop.trf.xlu0  ;;  %1017 = vst [vmem:[%s1804_s26 + $0xe0] sm:$0xff] %v880_v16 }
 0x154   : > { %1016 = vst [vmem:[%s1804_s26 + $0xd8] sm:$0xff] %v848_v19 }
 0x156   : > { %965 = vxpose.xlu1.b32.cont [9/16] (narrow) %v725_v27, 64  ;;  %v582_v27 = vmul.f32 %v1877_v0, %v1375_v24 }
 0x157   : > { %933 = vxpose.xlu0.b32.cont [9/16] (narrow) %v709_v28, 64  ;;  %v817_v28 = vpop.trf.xlu2 }
 0x158   : > { %1023 = vst [vmem:[%s1804_s26 + $0x110] sm:$0xff] %v817_v28  ;;  %908 = vxpose.xlu2.b32.end [16/16] (narrow) %v700_v4, 64  ;;  %v714_v34 = vadd.f32 %v1885_v25, %v582_v27 }
 0x15a   : > { %v881_v29 = vpop.trf.xlu1 }
 0x15b   : > { %v849_v32 = vpop.trf.xlu0  ;;  %1025 = vst [vmem:[%s1804_s26 + $0x120] sm:$0xff] %v881_v29 }
 0x15c   : > { %1024 = vst [vmem:[%s1804_s26 + $0x118] sm:$0xff] %v849_v32 }
 0x15e   : > { %966 = vxpose.xlu1.b32.cont [10/16] (narrow) %v726_v41, 64 }
 0x15f   : > { %934 = vxpose.xlu0.b32.cont [10/16] (narrow) %v710_v42, 64  ;;  %v818_v39 = vpop.trf.xlu2  ;;  %v731_v42 = vadd.f32 %v1885_v25, %v599_v37 }
 0x160   : > { %1031 = vst [vmem:[%s1804_s26 + $0x150] sm:$0xff] %v818_v39 }
 0x162   : > { %v882_v40 = vpop.trf.xlu1 }
 0x163   : > { %v850_v41 = vpop.trf.xlu0  ;;  %1033 = vst [vmem:[%s1804_s26 + $0x160] sm:$0xff] %v882_v40 }
 0x164   : > { %1032 = vst [vmem:[%s1804_s26 + $0x158] sm:$0xff] %v850_v41 }
 0x166   : > { %967 = vxpose.xlu1.b32.cont [11/16] (narrow) %v727_v54, 64 }
 0x167   : > { %935 = vxpose.xlu0.b32.cont [11/16] (narrow) %v711_v55, 64  ;;  %v819_v48 = vpop.trf.xlu2 }
 0x168   : > { %1039 = vst [vmem:[%s1804_s26 + $0x190] sm:$0xff] %v819_v48 }
 0x16a   : > { %v883_v49 = vpop.trf.xlu1 }
 0x16b   : > { %v851_v50 = vpop.trf.xlu0  ;;  %1041 = vst [vmem:[%s1804_s26 + $0x1a0] sm:$0xff] %v883_v49 }
 0x16c   : > { %1040 = vst [vmem:[%s1804_s26 + $0x198] sm:$0xff] %v851_v50 }
 0x16e   : > { %968 = vxpose.xlu1.b32.cont [12/16] (narrow) %v728_v6, 64 }
 0x16f   : > { %936 = vxpose.xlu0.b32.cont [12/16] (narrow) %v712_v7, 64  ;;  %v820_v53 = vpop.trf.xlu2 }
 0x170   : > { %1047 = vst [vmem:[%s1804_s26 + $0x1d0] sm:$0xff] %v820_v53 }
 0x172   : > { %v884_v0 = vpop.trf.xlu1 }
 0x173   : > { %v852_v54 = vpop.trf.xlu0  ;;  %1049 = vst [vmem:[%s1804_s26 + $0x1e0] sm:$0xff] %v884_v0 }
 0x174   : > { %1048 = vst [vmem:[%s1804_s26 + $0x1d8] sm:$0xff] %v852_v54 }
 0x176   : > { %969 = vxpose.xlu1.b32.cont [13/16] (narrow) %v729_v21, 64 }
 0x177   : > { %937 = vxpose.xlu0.b32.cont [13/16] (narrow) %v713_v22, 64 }
 0x179   : > { %v909_v55 = vpop.trf.xlu2 }
 0x17a   : > { %994 = vst [vmem:[%s1804_s26 + $0x28] sm:$0xff] %v909_v55 }
 0x17e   : > { %970 = vxpose.xlu1.b32.cont [14/16] (narrow) %v730_v33, 64 }
 0x17f   : > { %938 = vxpose.xlu0.b32.cont [14/16] (narrow) %v714_v34, 64 }
 0x181   : > { %v910_v56 = vpop.trf.xlu2 }
 0x182   : > { %1002 = vst [vmem:[%s1804_s26 + $0x68] sm:$0xff] %v910_v56 }
 0x186   : > { %971 = vxpose.xlu1.b32.cont [15/16] (narrow) %v731_v42, 64 }
 0x187   : > { %939 = vxpose.xlu0.b32.cont [15/16] (narrow) %v715_v43, 64 }
 0x189   : > { %v911_v25 = vpop.trf.xlu2 }
 0x18a   : > { %1010 = vst [vmem:[%s1804_s26 + $0xa8] sm:$0xff] %v911_v25 }
 0x18e   : > { %972 = vxpose.xlu1.b32.end [16/16] (narrow) %v732_v51, 64 }
 0x18f   : > { %940 = vxpose.xlu0.b32.end [16/16] (narrow) %v716_v52, 64 }
 0x191   : > { %v912_v57 = vpop.trf.xlu2 }
 0x192   : > { %1018 = vst [vmem:[%s1804_s26 + $0xe8] sm:$0xff] %v912_v57 }
 0x199   : > { %v913_v60 = vpop.trf.xlu2 }
 0x19a   : > { %1026 = vst [vmem:[%s1804_s26 + $0x128] sm:$0xff] %v913_v60 }
 0x1a1   : > { %v914_v63 = vpop.trf.xlu2 }
 0x1a2   : > { %1034 = vst [vmem:[%s1804_s26 + $0x168] sm:$0xff] %v914_v63 }
 0x1a9   : > { %v915_v3 = vpop.trf.xlu2 }
 0x1aa   : > { %1042 = vst [vmem:[%s1804_s26 + $0x1a8] sm:$0xff] %v915_v3 }
 0x1b1   : > { %v916_v7 = vpop.trf.xlu2 }
 0x1b2   : > { %1050 = vst [vmem:[%s1804_s26 + $0x1e8] sm:$0xff] %v916_v7 }
 0x1ba   : > { %v973_v58 = vpop.trf.xlu1 }
 0x1bb   : > { %v941_v59 = vpop.trf.xlu0  ;;  %996 = vst [vmem:[%s1804_s26 + $0x38] sm:$0xff] %v973_v58 }
 0x1bc   : > { %995 = vst [vmem:[%s1804_s26 + $0x30] sm:$0xff] %v941_v59 }
 0x1c2   : > { %v974_v61 = vpop.trf.xlu1 }
 0x1c3   : > { %v942_v62 = vpop.trf.xlu0  ;;  %1004 = vst [vmem:[%s1804_s26 + $0x78] sm:$0xff] %v974_v61 }
 0x1c4   : > { %1003 = vst [vmem:[%s1804_s26 + $0x70] sm:$0xff] %v942_v62 }
 0x1ca   : > { %v975_v1 = vpop.trf.xlu1 }
 0x1cb   : > { %v943_v2 = vpop.trf.xlu0  ;;  %1012 = vst [vmem:[%s1804_s26 + $0xb8] sm:$0xff] %v975_v1 }
 0x1cc   : > { %1011 = vst [vmem:[%s1804_s26 + $0xb0] sm:$0xff] %v943_v2 }
 0x1d2   : > { %v976_v5 = vpop.trf.xlu1 }
 0x1d3   : > { %v944_v6 = vpop.trf.xlu0  ;;  %1020 = vst [vmem:[%s1804_s26 + $0xf8] sm:$0xff] %v976_v5 }
 0x1d4   : > { %1019 = vst [vmem:[%s1804_s26 + $0xf0] sm:$0xff] %v944_v6 }
 0x1da   : > { %v977_v8 = vpop.trf.xlu1 }
 0x1db   : > { %v945_v9 = vpop.trf.xlu0  ;;  %1028 = vst [vmem:[%s1804_s26 + $0x138] sm:$0xff] %v977_v8 }
 0x1dc   : > { %1027 = vst [vmem:[%s1804_s26 + $0x130] sm:$0xff] %v945_v9 }
 0x1e2   : > { %v978_v10 = vpop.trf.xlu1 }
 0x1e3   : > { %v946_v11 = vpop.trf.xlu0  ;;  %1036 = vst [vmem:[%s1804_s26 + $0x178] sm:$0xff] %v978_v10 }
 0x1e4   : > { %1035 = vst [vmem:[%s1804_s26 + $0x170] sm:$0xff] %v946_v11 }
 0x1ea   : > { %v979_v12 = vpop.trf.xlu1 }
 0x1eb   : > { %v947_v13 = vpop.trf.xlu0  ;;  %1044 = vst [vmem:[%s1804_s26 + $0x1b8] sm:$0xff] %v979_v12 }
 0x1ec   : > { %1043 = vst [vmem:[%s1804_s26 + $0x1b0] sm:$0xff] %v947_v13 }
 0x1f2   : > { %v980_v14 = vpop.trf.xlu1 }
 0x1f3   : > { %v948_v15 = vpop.trf.xlu0  ;;  %1052 = vst [vmem:[%s1804_s26 + $0x1f8] sm:$0xff] %v980_v14 }
 0x1f4   : > { %1051 = vst [vmem:[%s1804_s26 + $0x1f0] sm:$0xff] %v948_v15 }
 0x1f5 PF: > { %s13_s14 = sadd.s32 1, %s1525_s14   ;;  %s1999_s12 = smov %s1521_s13 }
 0x1f6   : > { %p10_p5 = scmp.ge.s32.totalorder %s13_s14, 4   ;;  %s2000_s13 = smov %s2002_s15 }
 0x1f8   :  { %12 = sbr.rel (!%p10_p5) target bundleno = 2 (0x2), region = 62 }

</bundles_post_ra>
